<compile_context>
chip_gen: v7x
topology: tpu7x:2x2x1
jax: 0.10.0
libtpu: 0.0.40
codegen_flags: <defaults>
</compile_context>

<pallas_src>
import functools

import jax
import jax.numpy as jnp
from jax.experimental import pallas as pl
from jax.experimental.pallas import tpu as pltpu


def ode_rnn_seq_kernel(
    y0_ref, h0_ref, gi_ref,                 # initial state (split) + precomputed input gates
    wcat1_ref, b1_ref, wcat2_ref,           # fused ODE/GRU-hidden weights
    bht_ref, bgh_ref, bhn_ref,              # folded biases
    wly_ref, blyk_ref,                      # Ly weight; [bly ; keep-mask]
    y_out_ref, h_out_ref,                   # outputs [T,B,k_out], [T,B,k_h]
):
    B, k_h = h0_ref.shape
    T = gi_ref.shape[0]
    k_out = y0_ref.shape[1]

    # Resident weights: loaded once, reused for the whole sequence.
    wcat1 = wcat1_ref[...]                                  # [k_h, 2k_h + 3k_h]
    wcat2 = wcat2_ref[...]                                  # [2k_h, k_h + 3k_h]
    # Biases hoisted & pre-broadcast ONCE (broadcast_in_dim is not CSE'd).
    b1 = jnp.broadcast_to(b1_ref[...], (B, 2 * k_h))
    bht = jnp.broadcast_to(bht_ref[...], (B, k_h))          # 0.1*b2
    bgh = jnp.broadcast_to(bgh_ref[...], (B, 3 * k_h))      # (0.1*b2) @ W_hh^T
    bhn = jnp.broadcast_to(bhn_ref[...], (B, k_h))          # b_hh_n

    # --- serial recurrence: fully unrolled, carry h stays in vregs ---------
    h = h0_ref[...]
    for t in range(T):
        gi = gi_ref[t]                                      # x_t gates (precomputed)

        # matmul 1: [h @ W1 | h @ W_hh] in one MXU op
        m1 = jnp.dot(h, wcat1, preferred_element_type=jnp.float32)
        hmid = jnp.tanh(m1[:, : 2 * k_h] + b1)

        # matmul 2: [hmid @ 0.1W2 | hmid @ 0.1W2 @ W_hh] (exactly 128 lanes)
        m2 = jnp.dot(hmid, wcat2, preferred_element_type=jnp.float32)

        ht_ = h + m2[:, :k_h] + bht                         # Euler step
        gh = m1[:, 2 * k_h:] + m2[:, k_h:] + bgh            # == ht_ @ W_hh^T

        r = jax.nn.sigmoid(gi[:, 0 * k_h:1 * k_h] + gh[:, 0 * k_h:1 * k_h])
        z = jax.nn.sigmoid(gi[:, 1 * k_h:2 * k_h] + gh[:, 1 * k_h:2 * k_h])
        n = jnp.tanh(gi[:, 2 * k_h:3 * k_h] + r * (gh[:, 2 * k_h:3 * k_h] + bhn))
        h = (1.0 - z) * n + z * ht_

        h_out_ref[t] = h                                    # off the critical path

    # --- post-hoc batched Ly + keep-mask select (parallel over T) ----------
    h_all = h_out_ref[...]                                  # [T, B, k_h]
    ly = jnp.dot(h_all.reshape(T * B, k_h), wly_ref[...],
                 preferred_element_type=jnp.float32)
    ly = (ly + blyk_ref[0:1, :]).reshape(T, B, k_out)
    keep = blyk_ref[1:2, :] > 0.5                           # 1 -> keep y0, 0 -> Ly(h)
    y0 = y0_ref[...]
    y_out_ref[...] = jnp.where(keep[None, :, :], y0[None, :, :], ly)


def ode_rnn_forward_seq(state0, x_seq, params, *, k_out, k_h):
    """Run T recurrent steps in ONE pallas_call. Returns (y_seq, h_seq)."""
    B = state0.shape[0]
    T, _, in_total = x_seq.shape
    y0 = state0[:, :k_out]
    h0 = state0[:, k_out:]

    # Input-gate matmul hoisted out of the recurrence: one [T*B, in] @ [in, 3k_h]
    # batched matmul in XLA (kept outside the kernel so it can overlap).
    gi_seq = (x_seq.reshape(T * B, in_total) @ params["w_ih"]
              + params["b_i"]).reshape(T, B, 3 * k_h)

    vmem = pl.BlockSpec(memory_space=pltpu.MemorySpace.VMEM)
    y_seq, h_seq = pl.pallas_call(
        ode_rnn_seq_kernel,
        out_shape=(
            jax.ShapeDtypeStruct((T, B, k_out), jnp.float32),
            jax.ShapeDtypeStruct((T, B, k_h), jnp.float32),
        ),
        in_specs=[vmem] * 11,
        out_specs=(vmem, vmem),
    )(
        y0, h0, gi_seq,
        params["wcat1"], params["b1"], params["wcat2"],
        params["bht"], params["bgh"], params["bhn"],
        params["wly"], params["blyk"],
    )
    return y_seq, h_seq


def ode_rnn_forward(state, xt, dt, ti, params, *, k_out, k_h):
    """Single-step forward matching the PyTorch signature (dt/ti unused)."""
    del dt, ti
    y_seq, h_seq = ode_rnn_forward_seq(state, xt[None], params, k_out=k_out, k_h=k_h)
    return jnp.concatenate([y_seq[0], h_seq[0]], axis=-1)


# ----------------------------- params & reference -----------------------------

def make_raw_params(key, k_in, k_out, k_h, k_expand_in, y_type):
    """Synthetic parameters in the original PyTorch layouts ([out, in] weights)."""
    in_total = k_in + k_expand_in
    keys = jax.random.split(key, 10)

    def lin(kw, kb, fan_out, fan_in):
        s = 1.0 / jnp.sqrt(fan_in)
        w = jax.random.uniform(kw, (fan_out, fan_in), jnp.float32, -s, s)
        b = jax.random.uniform(kb, (fan_out,), jnp.float32, -s, s)
        return w, b

    w1, b1 = lin(keys[0], keys[1], 2 * k_h, k_h)       # Linear(k_h, 2k_h)
    w2, b2 = lin(keys[2], keys[3], k_h, 2 * k_h)       # Linear(2k_h, k_h)

    s = 1.0 / jnp.sqrt(k_h)                            # GRUCell(in_total, k_h)
    w_ih = jax.random.uniform(keys[4], (3 * k_h, in_total), jnp.float32, -s, s)
    w_hh = jax.random.uniform(keys[5], (3 * k_h, k_h), jnp.float32, -s, s)
    b_ih = jax.random.uniform(keys[6], (3 * k_h,), jnp.float32, -s, s)
    b_hh = jax.random.uniform(keys[7], (3 * k_h,), jnp.float32, -s, s)

    wly, bly = lin(keys[8], keys[9], k_out, k_h)       # Ly = Linear(k_h, k_out)

    y_type_int = [0 if x in ("d", "s", "n") else int(x) for x in y_type]
    replace_mask = jnp.asarray([v == 0 for v in y_type_int], dtype=bool).reshape(1, k_out)

    return dict(w1=w1, b1=b1, w2=w2, b2=b2, w_ih=w_ih, w_hh=w_hh,
                b_ih=b_ih, b_hh=b_hh, wly=wly, bly=bly, replace_mask=replace_mask)


def pack_params(raw, k_out, k_h):
    """Transpose / fuse / fold parameters into the kernel layout."""
    hi = jax.lax.Precision.HIGHEST
    w1t = raw["w1"].T                                  # [k_h, 2k_h]
    w2s = 0.1 * raw["w2"].T                            # [2k_h, k_h]  (Euler 0.1 folded)
    b2s = 0.1 * raw["b2"]                              # [k_h]
    whh = raw["w_hh"].T                                # [k_h, 3k_h]

    # r/z hidden biases folded into the input bias (only b_hh_n must stay separate).
    b_i = raw["b_ih"].at[: 2 * k_h].add(raw["b_hh"][: 2 * k_h])
    keep = jnp.where(raw["replace_mask"], 0.0, 1.0).astype(jnp.float32)   # [1, k_out]

    return dict(
        w_ih=raw["w_ih"].T,                                        # [in_total, 3k_h]
        b_i=b_i.reshape(1, 3 * k_h),
        wcat1=jnp.concatenate([w1t, whh], axis=1),                 # [k_h, 5k_h]
        b1=raw["b1"].reshape(1, 2 * k_h),
        wcat2=jnp.concatenate(
            [w2s, jnp.dot(w2s, whh, precision=hi)], axis=1),       # [2k_h, 4k_h]
        bht=b2s.reshape(1, k_h),
        bgh=jnp.dot(b2s[None, :], whh, precision=hi),              # [1, 3k_h]
        bhn=raw["b_hh"][2 * k_h:].reshape(1, k_h),
        wly=raw["wly"].T,                                          # [k_h, k_out]
        blyk=jnp.concatenate([raw["bly"].reshape(1, k_out), keep], axis=0),  # [2, k_out]
    )


def reference_step(state, xt, raw, k_out, k_h):
    """Pure-JAX single step mirroring the PyTorch forward exactly (unfused math)."""
    yt, ht = state[:, :k_out], state[:, k_out:]
    hmid = jnp.tanh(ht @ raw["w1"].T + raw["b1"])
    f = hmid @ raw["w2"].T + raw["b2"]
    ht_ = ht + 0.1 * f
    gi = xt @ raw["w_ih"].T + raw["b_ih"]
    gh = ht_ @ raw["w_hh"].T + raw["b_hh"]
    r = jax.nn.sigmoid(gi[:, :k_h] + gh[:, :k_h])
    z = jax.nn.sigmoid(gi[:, k_h:2 * k_h] + gh[:, k_h:2 * k_h])
    n = jnp.tanh(gi[:, 2 * k_h:] + r * gh[:, 2 * k_h:])
    h_new = (1.0 - z) * n + z * ht_
    ly = h_new @ raw["wly"].T + raw["bly"]
    y_new = jnp.where(raw["replace_mask"], ly, yt)
    return jnp.concatenate([y_new, h_new], axis=-1)


if __name__ == "__main__":
    # Small shapes consistent with the module's forward.
    B = 8
    T = 16                              # recurrent steps handled inside one kernel call
    k_in, k_expand_in = 4, 4            # GRU input size = k_expand_in + k_in = 8
    k_h = 32
    k_out = 4
    y_type = ["d", "s", 1, "n"]         # entry 2 is kept, others replaced by Ly(ht)

    key = jax.random.PRNGKey(0)
    k_state, k_x, k_params = jax.random.split(key, 3)

    raw = make_raw_params(k_params, k_in, k_out, k_h, k_expand_in, y_type)
    packed = pack_params(raw, k_out, k_h)

    state0 = jax.random.normal(k_state, (B, k_out + k_h), jnp.float32)
    x_seq = jax.random.normal(k_x, (T, B, k_in + k_expand_in), jnp.float32)

    fwd = jax.jit(functools.partial(ode_rnn_forward_seq, k_out=k_out, k_h=k_h))
    y_seq, h_seq = fwd(state0, x_seq, packed)
    jax.block_until_ready((y_seq, h_seq))

    # Reference: apply the exact (unfused) single-step forward T times.
    ref_states = []
    s = state0
    for t in range(T):
        s = reference_step(s, x_seq[t], raw, k_out, k_h)
        ref_states.append(s)
    ref_seq = jnp.stack(ref_states, axis=0)

    assert y_seq.shape == (T, B, k_out) and h_seq.shape == (T, B, k_h)
    err_h = float(jnp.max(jnp.abs(h_seq - ref_seq[..., k_out:])))
    err_y = float(jnp.max(jnp.abs(y_seq - ref_seq[..., :k_out])))
    assert jnp.allclose(h_seq, ref_seq[..., k_out:], atol=1e-4, rtol=1e-5), err_h
    assert jnp.allclose(y_seq, ref_seq[..., :k_out], atol=1e-4, rtol=1e-5), err_y

    # Single-step path with the original PyTorch signature (dt/ti unused).
    step_out = ode_rnn_forward(state0, x_seq[0], None, None, packed, k_out=k_out, k_h=k_h)
    jax.block_until_ready(step_out)
    step_ref = reference_step(state0, x_seq[0], raw, k_out, k_h)
    assert jnp.allclose(step_out, step_ref, atol=1e-4, rtol=1e-5), float(
        jnp.max(jnp.abs(step_out - step_ref)))

    print("KERNEL_OK")
</pallas_src>

<mosaic_0001>
module attributes {stable_mosaic.version = 11 : i64} {
  func.func @ode_rnn_seq_kernel(%arg0: memref<8x4xf32, #tpu.memory_space<vmem>>, %arg1: memref<8x32xf32, #tpu.memory_space<vmem>>, %arg2: memref<16x8x96xf32, #tpu.memory_space<vmem>>, %arg3: memref<32x160xf32, #tpu.memory_space<vmem>>, %arg4: memref<1x64xf32, #tpu.memory_space<vmem>>, %arg5: memref<64x128xf32, #tpu.memory_space<vmem>>, %arg6: memref<1x32xf32, #tpu.memory_space<vmem>>, %arg7: memref<1x96xf32, #tpu.memory_space<vmem>>, %arg8: memref<1x32xf32, #tpu.memory_space<vmem>>, %arg9: memref<32x4xf32, #tpu.memory_space<vmem>>, %arg10: memref<2x4xf32, #tpu.memory_space<vmem>>, %arg11: memref<16x8x4xf32, #tpu.memory_space<vmem>>, %arg12: memref<16x8x32xf32, #tpu.memory_space<vmem>>) attributes {dimension_semantics = [], scalar_prefetch = 0 : i64, scratch_operands = 0 : i64, tpu.core_type = #tpu.core_type<tc>} {
    %c0 = arith.constant 0 : index
    %c0_0 = arith.constant 0 : index
    %0 = vector.load %arg3[%c0, %c0_0] : memref<32x160xf32, #tpu.memory_space<vmem>>, vector<32x160xf32>
    %c0_1 = arith.constant 0 : index
    %c0_2 = arith.constant 0 : index
    %1 = vector.load %arg5[%c0_1, %c0_2] : memref<64x128xf32, #tpu.memory_space<vmem>>, vector<64x128xf32>
    %c0_3 = arith.constant 0 : index
    %c0_4 = arith.constant 0 : index
    %2 = vector.load %arg4[%c0_3, %c0_4] : memref<1x64xf32, #tpu.memory_space<vmem>>, vector<1x64xf32>
    %3 = vector.shape_cast %2 : vector<1x64xf32> to vector<1x64xf32>
    %4 = vector.broadcast %3 : vector<1x64xf32> to vector<8x64xf32>
    %c0_5 = arith.constant 0 : index
    %c0_6 = arith.constant 0 : index
    %5 = vector.load %arg6[%c0_5, %c0_6] : memref<1x32xf32, #tpu.memory_space<vmem>>, vector<1x32xf32>
    %6 = vector.shape_cast %5 : vector<1x32xf32> to vector<1x32xf32>
    %7 = vector.broadcast %6 : vector<1x32xf32> to vector<8x32xf32>
    %c0_7 = arith.constant 0 : index
    %c0_8 = arith.constant 0 : index
    %8 = vector.load %arg7[%c0_7, %c0_8] : memref<1x96xf32, #tpu.memory_space<vmem>>, vector<1x96xf32>
    %9 = vector.shape_cast %8 : vector<1x96xf32> to vector<1x96xf32>
    %10 = vector.broadcast %9 : vector<1x96xf32> to vector<8x96xf32>
    %c0_9 = arith.constant 0 : index
    %c0_10 = arith.constant 0 : index
    %11 = vector.load %arg8[%c0_9, %c0_10] : memref<1x32xf32, #tpu.memory_space<vmem>>, vector<1x32xf32>
    %12 = vector.shape_cast %11 : vector<1x32xf32> to vector<1x32xf32>
    %13 = vector.broadcast %12 : vector<1x32xf32> to vector<8x32xf32>
    %c0_11 = arith.constant 0 : index
    %c0_12 = arith.constant 0 : index
    %14 = vector.load %arg1[%c0_11, %c0_12] : memref<8x32xf32, #tpu.memory_space<vmem>>, vector<8x32xf32>
    %c0_13 = arith.constant 0 : index
    %c0_14 = arith.constant 0 : index
    %c0_15 = arith.constant 0 : index
    %15 = vector.load %arg2[%c0_13, %c0_14, %c0_15] : memref<16x8x96xf32, #tpu.memory_space<vmem>>, vector<1x8x96xf32>
    %16 = vector.shape_cast %15 : vector<1x8x96xf32> to vector<8x96xf32>
    %cst = arith.constant dense<0.000000e+00> : vector<8x160xf32>
    %17 = tpu.matmul %14, %0, %cst {dimension_numbers = #tpu.dot_dimension_numbers<[1], [0], [0], [1], [0, 0, 1, 1], [], []>} : vector<8x32xf32>, vector<32x160xf32>, vector<8x160xf32> -> vector<8x160xf32>
    %18 = vector.extract_strided_slice %17 {offsets = [0, 0], sizes = [8, 64], strides = [1, 1]} : vector<8x160xf32> to vector<8x64xf32>
    %19 = arith.addf %18, %4 : vector<8x64xf32>
    %20 = math.tanh %19 : vector<8x64xf32>
    %cst_16 = arith.constant dense<0.000000e+00> : vector<8x128xf32>
    %21 = tpu.matmul %20, %1, %cst_16 {dimension_numbers = #tpu.dot_dimension_numbers<[1], [0], [0], [1], [0, 0, 1, 1], [], []>} : vector<8x64xf32>, vector<64x128xf32>, vector<8x128xf32> -> vector<8x128xf32>
    %22 = vector.extract_strided_slice %21 {offsets = [0, 0], sizes = [8, 32], strides = [1, 1]} : vector<8x128xf32> to vector<8x32xf32>
    %23 = arith.addf %14, %22 : vector<8x32xf32>
    %24 = arith.addf %23, %7 : vector<8x32xf32>
    %25 = vector.extract_strided_slice %17 {offsets = [0, 64], sizes = [8, 96], strides = [1, 1]} : vector<8x160xf32> to vector<8x96xf32>
    %26 = vector.extract_strided_slice %21 {offsets = [0, 32], sizes = [8, 96], strides = [1, 1]} : vector<8x128xf32> to vector<8x96xf32>
    %27 = arith.addf %25, %26 : vector<8x96xf32>
    %28 = arith.addf %27, %10 : vector<8x96xf32>
    %29 = vector.extract_strided_slice %16 {offsets = [0, 0], sizes = [8, 32], strides = [1, 1]} : vector<8x96xf32> to vector<8x32xf32>
    %30 = vector.extract_strided_slice %28 {offsets = [0, 0], sizes = [8, 32], strides = [1, 1]} : vector<8x96xf32> to vector<8x32xf32>
    %31 = arith.addf %29, %30 : vector<8x32xf32>
    %32 = arith.negf %31 : vector<8x32xf32>
    %33 = math.exp %32 : vector<8x32xf32>
    %cst_17 = arith.constant 1.000000e+00 : f32
    %34 = vector.broadcast %cst_17 : f32 to vector<8x32xf32>
    %35 = arith.addf %34, %33 : vector<8x32xf32>
    %36 = arith.divf %34, %35 : vector<8x32xf32>
    %37 = vector.extract_strided_slice %16 {offsets = [0, 32], sizes = [8, 32], strides = [1, 1]} : vector<8x96xf32> to vector<8x32xf32>
    %38 = vector.extract_strided_slice %28 {offsets = [0, 32], sizes = [8, 32], strides = [1, 1]} : vector<8x96xf32> to vector<8x32xf32>
    %39 = arith.addf %37, %38 : vector<8x32xf32>
    %40 = arith.negf %39 : vector<8x32xf32>
    %41 = math.exp %40 : vector<8x32xf32>
    %cst_18 = arith.constant 1.000000e+00 : f32
    %42 = vector.broadcast %cst_18 : f32 to vector<8x32xf32>
    %43 = arith.addf %42, %41 : vector<8x32xf32>
    %44 = arith.divf %42, %43 : vector<8x32xf32>
    %45 = vector.extract_strided_slice %16 {offsets = [0, 64], sizes = [8, 32], strides = [1, 1]} : vector<8x96xf32> to vector<8x32xf32>
    %46 = vector.extract_strided_slice %28 {offsets = [0, 64], sizes = [8, 32], strides = [1, 1]} : vector<8x96xf32> to vector<8x32xf32>
    %47 = arith.addf %46, %13 : vector<8x32xf32>
    %48 = arith.mulf %36, %47 : vector<8x32xf32>
    %49 = arith.addf %45, %48 : vector<8x32xf32>
    %50 = math.tanh %49 : vector<8x32xf32>
    %cst_19 = arith.constant 1.000000e+00 : f32
    %51 = vector.broadcast %cst_19 : f32 to vector<8x32xf32>
    %52 = arith.subf %51, %44 : vector<8x32xf32>
    %53 = arith.mulf %52, %50 : vector<8x32xf32>
    %54 = arith.mulf %44, %24 : vector<8x32xf32>
    %55 = arith.addf %53, %54 : vector<8x32xf32>
    %c0_20 = arith.constant 0 : index
    %c0_21 = arith.constant 0 : index
    %c0_22 = arith.constant 0 : index
    %56 = vector.load %arg12[%c0_20, %c0_21, %c0_22] : memref<16x8x32xf32, #tpu.memory_space<vmem>>, vector<1x8x32xf32>
    %57 = vector.shape_cast %56 : vector<1x8x32xf32> to vector<8x32xf32>
    %58 = vector.shape_cast %55 : vector<8x32xf32> to vector<1x8x32xf32>
    tpu.vector_store %arg12[%c0_20, %c0_21, %c0_22], %58 {strides = array<i32>} : memref<16x8x32xf32, #tpu.memory_space<vmem>>, vector<1x8x32xf32>,
    %c1 = arith.constant 1 : index
    %c0_23 = arith.constant 0 : index
    %c0_24 = arith.constant 0 : index
    %59 = vector.load %arg2[%c1, %c0_23, %c0_24] : memref<16x8x96xf32, #tpu.memory_space<vmem>>, vector<1x8x96xf32>
    %60 = vector.shape_cast %59 : vector<1x8x96xf32> to vector<8x96xf32>
    %cst_25 = arith.constant dense<0.000000e+00> : vector<8x160xf32>
    %61 = tpu.matmul %55, %0, %cst_25 {dimension_numbers = #tpu.dot_dimension_numbers<[1], [0], [0], [1], [0, 0, 1, 1], [], []>} : vector<8x32xf32>, vector<32x160xf32>, vector<8x160xf32> -> vector<8x160xf32>
    %62 = vector.extract_strided_slice %61 {offsets = [0, 0], sizes = [8, 64], strides = [1, 1]} : vector<8x160xf32> to vector<8x64xf32>
    %63 = arith.addf %62, %4 : vector<8x64xf32>
    %64 = math.tanh %63 : vector<8x64xf32>
    %cst_26 = arith.constant dense<0.000000e+00> : vector<8x128xf32>
    %65 = tpu.matmul %64, %1, %cst_26 {dimension_numbers = #tpu.dot_dimension_numbers<[1], [0], [0], [1], [0, 0, 1, 1], [], []>} : vector<8x64xf32>, vector<64x128xf32>, vector<8x128xf32> -> vector<8x128xf32>
    %66 = vector.extract_strided_slice %65 {offsets = [0, 0], sizes = [8, 32], strides = [1, 1]} : vector<8x128xf32> to vector<8x32xf32>
    %67 = arith.addf %55, %66 : vector<8x32xf32>
    %68 = arith.addf %67, %7 : vector<8x32xf32>
    %69 = vector.extract_strided_slice %61 {offsets = [0, 64], sizes = [8, 96], strides = [1, 1]} : vector<8x160xf32> to vector<8x96xf32>
    %70 = vector.extract_strided_slice %65 {offsets = [0, 32], sizes = [8, 96], strides = [1, 1]} : vector<8x128xf32> to vector<8x96xf32>
    %71 = arith.addf %69, %70 : vector<8x96xf32>
    %72 = arith.addf %71, %10 : vector<8x96xf32>
    %73 = vector.extract_strided_slice %60 {offsets = [0, 0], sizes = [8, 32], strides = [1, 1]} : vector<8x96xf32> to vector<8x32xf32>
    %74 = vector.extract_strided_slice %72 {offsets = [0, 0], sizes = [8, 32], strides = [1, 1]} : vector<8x96xf32> to vector<8x32xf32>
    %75 = arith.addf %73, %74 : vector<8x32xf32>
    %76 = arith.negf %75 : vector<8x32xf32>
    %77 = math.exp %76 : vector<8x32xf32>
    %cst_27 = arith.constant 1.000000e+00 : f32
    %78 = vector.broadcast %cst_27 : f32 to vector<8x32xf32>
    %79 = arith.addf %78, %77 : vector<8x32xf32>
    %80 = arith.divf %78, %79 : vector<8x32xf32>
    %81 = vector.extract_strided_slice %60 {offsets = [0, 32], sizes = [8, 32], strides = [1, 1]} : vector<8x96xf32> to vector<8x32xf32>
    %82 = vector.extract_strided_slice %72 {offsets = [0, 32], sizes = [8, 32], strides = [1, 1]} : vector<8x96xf32> to vector<8x32xf32>
    %83 = arith.addf %81, %82 : vector<8x32xf32>
    %84 = arith.negf %83 : vector<8x32xf32>
    %85 = math.exp %84 : vector<8x32xf32>
    %cst_28 = arith.constant 1.000000e+00 : f32
    %86 = vector.broadcast %cst_28 : f32 to vector<8x32xf32>
    %87 = arith.addf %86, %85 : vector<8x32xf32>
    %88 = arith.divf %86, %87 : vector<8x32xf32>
    %89 = vector.extract_strided_slice %60 {offsets = [0, 64], sizes = [8, 32], strides = [1, 1]} : vector<8x96xf32> to vector<8x32xf32>
    %90 = vector.extract_strided_slice %72 {offsets = [0, 64], sizes = [8, 32], strides = [1, 1]} : vector<8x96xf32> to vector<8x32xf32>
    %91 = arith.addf %90, %13 : vector<8x32xf32>
    %92 = arith.mulf %80, %91 : vector<8x32xf32>
    %93 = arith.addf %89, %92 : vector<8x32xf32>
    %94 = math.tanh %93 : vector<8x32xf32>
    %cst_29 = arith.constant 1.000000e+00 : f32
    %95 = vector.broadcast %cst_29 : f32 to vector<8x32xf32>
    %96 = arith.subf %95, %88 : vector<8x32xf32>
    %97 = arith.mulf %96, %94 : vector<8x32xf32>
    %98 = arith.mulf %88, %68 : vector<8x32xf32>
    %99 = arith.addf %97, %98 : vector<8x32xf32>
    %c1_30 = arith.constant 1 : index
    %c0_31 = arith.constant 0 : index
    %c0_32 = arith.constant 0 : index
    %100 = vector.load %arg12[%c1_30, %c0_31, %c0_32] : memref<16x8x32xf32, #tpu.memory_space<vmem>>, vector<1x8x32xf32>
    %101 = vector.shape_cast %100 : vector<1x8x32xf32> to vector<8x32xf32>
    %102 = vector.shape_cast %99 : vector<8x32xf32> to vector<1x8x32xf32>
    tpu.vector_store %arg12[%c1_30, %c0_31, %c0_32], %102 {strides = array<i32>} : memref<16x8x32xf32, #tpu.memory_space<vmem>>, vector<1x8x32xf32>,
    %c2 = arith.constant 2 : index
    %c0_33 = arith.constant 0 : index
    %c0_34 = arith.constant 0 : index
    %103 = vector.load %arg2[%c2, %c0_33, %c0_34] : memref<16x8x96xf32, #tpu.memory_space<vmem>>, vector<1x8x96xf32>
    %104 = vector.shape_cast %103 : vector<1x8x96xf32> to vector<8x96xf32>
    %cst_35 = arith.constant dense<0.000000e+00> : vector<8x160xf32>
    %105 = tpu.matmul %99, %0, %cst_35 {dimension_numbers = #tpu.dot_dimension_numbers<[1], [0], [0], [1], [0, 0, 1, 1], [], []>} : vector<8x32xf32>, vector<32x160xf32>, vector<8x160xf32> -> vector<8x160xf32>
    %106 = vector.extract_strided_slice %105 {offsets = [0, 0], sizes = [8, 64], strides = [1, 1]} : vector<8x160xf32> to vector<8x64xf32>
    %107 = arith.addf %106, %4 : vector<8x64xf32>
    %108 = math.tanh %107 : vector<8x64xf32>
    %cst_36 = arith.constant dense<0.000000e+00> : vector<8x128xf32>
    %109 = tpu.matmul %108, %1, %cst_36 {dimension_numbers = #tpu.dot_dimension_numbers<[1], [0], [0], [1], [0, 0, 1, 1], [], []>} : vector<8x64xf32>, vector<64x128xf32>, vector<8x128xf32> -> vector<8x128xf32>
    %110 = vector.extract_strided_slice %109 {offsets = [0, 0], sizes = [8, 32], strides = [1, 1]} : vector<8x128xf32> to vector<8x32xf32>
    %111 = arith.addf %99, %110 : vector<8x32xf32>
    %112 = arith.addf %111, %7 : vector<8x32xf32>
    %113 = vector.extract_strided_slice %105 {offsets = [0, 64], sizes = [8, 96], strides = [1, 1]} : vector<8x160xf32> to vector<8x96xf32>
    %114 = vector.extract_strided_slice %109 {offsets = [0, 32], sizes = [8, 96], strides = [1, 1]} : vector<8x128xf32> to vector<8x96xf32>
    %115 = arith.addf %113, %114 : vector<8x96xf32>
    %116 = arith.addf %115, %10 : vector<8x96xf32>
    %117 = vector.extract_strided_slice %104 {offsets = [0, 0], sizes = [8, 32], strides = [1, 1]} : vector<8x96xf32> to vector<8x32xf32>
    %118 = vector.extract_strided_slice %116 {offsets = [0, 0], sizes = [8, 32], strides = [1, 1]} : vector<8x96xf32> to vector<8x32xf32>
    %119 = arith.addf %117, %118 : vector<8x32xf32>
    %120 = arith.negf %119 : vector<8x32xf32>
    %121 = math.exp %120 : vector<8x32xf32>
    %cst_37 = arith.constant 1.000000e+00 : f32
    %122 = vector.broadcast %cst_37 : f32 to vector<8x32xf32>
    %123 = arith.addf %122, %121 : vector<8x32xf32>
    %124 = arith.divf %122, %123 : vector<8x32xf32>
    %125 = vector.extract_strided_slice %104 {offsets = [0, 32], sizes = [8, 32], strides = [1, 1]} : vector<8x96xf32> to vector<8x32xf32>
    %126 = vector.extract_strided_slice %116 {offsets = [0, 32], sizes = [8, 32], strides = [1, 1]} : vector<8x96xf32> to vector<8x32xf32>
    %127 = arith.addf %125, %126 : vector<8x32xf32>
    %128 = arith.negf %127 : vector<8x32xf32>
    %129 = math.exp %128 : vector<8x32xf32>
    %cst_38 = arith.constant 1.000000e+00 : f32
    %130 = vector.broadcast %cst_38 : f32 to vector<8x32xf32>
    %131 = arith.addf %130, %129 : vector<8x32xf32>
    %132 = arith.divf %130, %131 : vector<8x32xf32>
    %133 = vector.extract_strided_slice %104 {offsets = [0, 64], sizes = [8, 32], strides = [1, 1]} : vector<8x96xf32> to vector<8x32xf32>
    %134 = vector.extract_strided_slice %116 {offsets = [0, 64], sizes = [8, 32], strides = [1, 1]} : vector<8x96xf32> to vector<8x32xf32>
    %135 = arith.addf %134, %13 : vector<8x32xf32>
    %136 = arith.mulf %124, %135 : vector<8x32xf32>
    %137 = arith.addf %133, %136 : vector<8x32xf32>
    %138 = math.tanh %137 : vector<8x32xf32>
    %cst_39 = arith.constant 1.000000e+00 : f32
    %139 = vector.broadcast %cst_39 : f32 to vector<8x32xf32>
    %140 = arith.subf %139, %132 : vector<8x32xf32>
    %141 = arith.mulf %140, %138 : vector<8x32xf32>
    %142 = arith.mulf %132, %112 : vector<8x32xf32>
    %143 = arith.addf %141, %142 : vector<8x32xf32>
    %c2_40 = arith.constant 2 : index
    %c0_41 = arith.constant 0 : index
    %c0_42 = arith.constant 0 : index
    %144 = vector.load %arg12[%c2_40, %c0_41, %c0_42] : memref<16x8x32xf32, #tpu.memory_space<vmem>>, vector<1x8x32xf32>
    %145 = vector.shape_cast %144 : vector<1x8x32xf32> to vector<8x32xf32>
    %146 = vector.shape_cast %143 : vector<8x32xf32> to vector<1x8x32xf32>
    tpu.vector_store %arg12[%c2_40, %c0_41, %c0_42], %146 {strides = array<i32>} : memref<16x8x32xf32, #tpu.memory_space<vmem>>, vector<1x8x32xf32>,
    %c3 = arith.constant 3 : index
    %c0_43 = arith.constant 0 : index
    %c0_44 = arith.constant 0 : index
    %147 = vector.load %arg2[%c3, %c0_43, %c0_44] : memref<16x8x96xf32, #tpu.memory_space<vmem>>, vector<1x8x96xf32>
    %148 = vector.shape_cast %147 : vector<1x8x96xf32> to vector<8x96xf32>
    %cst_45 = arith.constant dense<0.000000e+00> : vector<8x160xf32>
    %149 = tpu.matmul %143, %0, %cst_45 {dimension_numbers = #tpu.dot_dimension_numbers<[1], [0], [0], [1], [0, 0, 1, 1], [], []>} : vector<8x32xf32>, vector<32x160xf32>, vector<8x160xf32> -> vector<8x160xf32>
    %150 = vector.extract_strided_slice %149 {offsets = [0, 0], sizes = [8, 64], strides = [1, 1]} : vector<8x160xf32> to vector<8x64xf32>
    %151 = arith.addf %150, %4 : vector<8x64xf32>
    %152 = math.tanh %151 : vector<8x64xf32>
    %cst_46 = arith.constant dense<0.000000e+00> : vector<8x128xf32>
    %153 = tpu.matmul %152, %1, %cst_46 {dimension_numbers = #tpu.dot_dimension_numbers<[1], [0], [0], [1], [0, 0, 1, 1], [], []>} : vector<8x64xf32>, vector<64x128xf32>, vector<8x128xf32> -> vector<8x128xf32>
    %154 = vector.extract_strided_slice %153 {offsets = [0, 0], sizes = [8, 32], strides = [1, 1]} : vector<8x128xf32> to vector<8x32xf32>
    %155 = arith.addf %143, %154 : vector<8x32xf32>
    %156 = arith.addf %155, %7 : vector<8x32xf32>
    %157 = vector.extract_strided_slice %149 {offsets = [0, 64], sizes = [8, 96], strides = [1, 1]} : vector<8x160xf32> to vector<8x96xf32>
    %158 = vector.extract_strided_slice %153 {offsets = [0, 32], sizes = [8, 96], strides = [1, 1]} : vector<8x128xf32> to vector<8x96xf32>
    %159 = arith.addf %157, %158 : vector<8x96xf32>
    %160 = arith.addf %159, %10 : vector<8x96xf32>
    %161 = vector.extract_strided_slice %148 {offsets = [0, 0], sizes = [8, 32], strides = [1, 1]} : vector<8x96xf32> to vector<8x32xf32>
    %162 = vector.extract_strided_slice %160 {offsets = [0, 0], sizes = [8, 32], strides = [1, 1]} : vector<8x96xf32> to vector<8x32xf32>
    %163 = arith.addf %161, %162 : vector<8x32xf32>
    %164 = arith.negf %163 : vector<8x32xf32>
    %165 = math.exp %164 : vector<8x32xf32>
    %cst_47 = arith.constant 1.000000e+00 : f32
    %166 = vector.broadcast %cst_47 : f32 to vector<8x32xf32>
    %167 = arith.addf %166, %165 : vector<8x32xf32>
    %168 = arith.divf %166, %167 : vector<8x32xf32>
    %169 = vector.extract_strided_slice %148 {offsets = [0, 32], sizes = [8, 32], strides = [1, 1]} : vector<8x96xf32> to vector<8x32xf32>
    %170 = vector.extract_strided_slice %160 {offsets = [0, 32], sizes = [8, 32], strides = [1, 1]} : vector<8x96xf32> to vector<8x32xf32>
    %171 = arith.addf %169, %170 : vector<8x32xf32>
    %172 = arith.negf %171 : vector<8x32xf32>
    %173 = math.exp %172 : vector<8x32xf32>
    %cst_48 = arith.constant 1.000000e+00 : f32
    %174 = vector.broadcast %cst_48 : f32 to vector<8x32xf32>
    %175 = arith.addf %174, %173 : vector<8x32xf32>
    %176 = arith.divf %174, %175 : vector<8x32xf32>
    %177 = vector.extract_strided_slice %148 {offsets = [0, 64], sizes = [8, 32], strides = [1, 1]} : vector<8x96xf32> to vector<8x32xf32>
    %178 = vector.extract_strided_slice %160 {offsets = [0, 64], sizes = [8, 32], strides = [1, 1]} : vector<8x96xf32> to vector<8x32xf32>
    %179 = arith.addf %178, %13 : vector<8x32xf32>
    %180 = arith.mulf %168, %179 : vector<8x32xf32>
    %181 = arith.addf %177, %180 : vector<8x32xf32>
    %182 = math.tanh %181 : vector<8x32xf32>
    %cst_49 = arith.constant 1.000000e+00 : f32
    %183 = vector.broadcast %cst_49 : f32 to vector<8x32xf32>
    %184 = arith.subf %183, %176 : vector<8x32xf32>
    %185 = arith.mulf %184, %182 : vector<8x32xf32>
    %186 = arith.mulf %176, %156 : vector<8x32xf32>
    %187 = arith.addf %185, %186 : vector<8x32xf32>
    %c3_50 = arith.constant 3 : index
    %c0_51 = arith.constant 0 : index
    %c0_52 = arith.constant 0 : index
    %188 = vector.load %arg12[%c3_50, %c0_51, %c0_52] : memref<16x8x32xf32, #tpu.memory_space<vmem>>, vector<1x8x32xf32>
    %189 = vector.shape_cast %188 : vector<1x8x32xf32> to vector<8x32xf32>
    %190 = vector.shape_cast %187 : vector<8x32xf32> to vector<1x8x32xf32>
    tpu.vector_store %arg12[%c3_50, %c0_51, %c0_52], %190 {strides = array<i32>} : memref<16x8x32xf32, #tpu.memory_space<vmem>>, vector<1x8x32xf32>,
    %c4 = arith.constant 4 : index
    %c0_53 = arith.constant 0 : index
    %c0_54 = arith.constant 0 : index
    %191 = vector.load %arg2[%c4, %c0_53, %c0_54] : memref<16x8x96xf32, #tpu.memory_space<vmem>>, vector<1x8x96xf32>
    %192 = vector.shape_cast %191 : vector<1x8x96xf32> to vector<8x96xf32>
    %cst_55 = arith.constant dense<0.000000e+00> : vector<8x160xf32>
    %193 = tpu.matmul %187, %0, %cst_55 {dimension_numbers = #tpu.dot_dimension_numbers<[1], [0], [0], [1], [0, 0, 1, 1], [], []>} : vector<8x32xf32>, vector<32x160xf32>, vector<8x160xf32> -> vector<8x160xf32>
    %194 = vector.extract_strided_slice %193 {offsets = [0, 0], sizes = [8, 64], strides = [1, 1]} : vector<8x160xf32> to vector<8x64xf32>
    %195 = arith.addf %194, %4 : vector<8x64xf32>
    %196 = math.tanh %195 : vector<8x64xf32>
    %cst_56 = arith.constant dense<0.000000e+00> : vector<8x128xf32>
    %197 = tpu.matmul %196, %1, %cst_56 {dimension_numbers = #tpu.dot_dimension_numbers<[1], [0], [0], [1], [0, 0, 1, 1], [], []>} : vector<8x64xf32>, vector<64x128xf32>, vector<8x128xf32> -> vector<8x128xf32>
    %198 = vector.extract_strided_slice %197 {offsets = [0, 0], sizes = [8, 32], strides = [1, 1]} : vector<8x128xf32> to vector<8x32xf32>
    %199 = arith.addf %187, %198 : vector<8x32xf32>
    %200 = arith.addf %199, %7 : vector<8x32xf32>
    %201 = vector.extract_strided_slice %193 {offsets = [0, 64], sizes = [8, 96], strides = [1, 1]} : vector<8x160xf32> to vector<8x96xf32>
    %202 = vector.extract_strided_slice %197 {offsets = [0, 32], sizes = [8, 96], strides = [1, 1]} : vector<8x128xf32> to vector<8x96xf32>
    %203 = arith.addf %201, %202 : vector<8x96xf32>
    %204 = arith.addf %203, %10 : vector<8x96xf32>
    %205 = vector.extract_strided_slice %192 {offsets = [0, 0], sizes = [8, 32], strides = [1, 1]} : vector<8x96xf32> to vector<8x32xf32>
    %206 = vector.extract_strided_slice %204 {offsets = [0, 0], sizes = [8, 32], strides = [1, 1]} : vector<8x96xf32> to vector<8x32xf32>
    %207 = arith.addf %205, %206 : vector<8x32xf32>
    %208 = arith.negf %207 : vector<8x32xf32>
    %209 = math.exp %208 : vector<8x32xf32>
    %cst_57 = arith.constant 1.000000e+00 : f32
    %210 = vector.broadcast %cst_57 : f32 to vector<8x32xf32>
    %211 = arith.addf %210, %209 : vector<8x32xf32>
    %212 = arith.divf %210, %211 : vector<8x32xf32>
    %213 = vector.extract_strided_slice %192 {offsets = [0, 32], sizes = [8, 32], strides = [1, 1]} : vector<8x96xf32> to vector<8x32xf32>
    %214 = vector.extract_strided_slice %204 {offsets = [0, 32], sizes = [8, 32], strides = [1, 1]} : vector<8x96xf32> to vector<8x32xf32>
    %215 = arith.addf %213, %214 : vector<8x32xf32>
    %216 = arith.negf %215 : vector<8x32xf32>
    %217 = math.exp %216 : vector<8x32xf32>
    %cst_58 = arith.constant 1.000000e+00 : f32
    %218 = vector.broadcast %cst_58 : f32 to vector<8x32xf32>
    %219 = arith.addf %218, %217 : vector<8x32xf32>
    %220 = arith.divf %218, %219 : vector<8x32xf32>
    %221 = vector.extract_strided_slice %192 {offsets = [0, 64], sizes = [8, 32], strides = [1, 1]} : vector<8x96xf32> to vector<8x32xf32>
    %222 = vector.extract_strided_slice %204 {offsets = [0, 64], sizes = [8, 32], strides = [1, 1]} : vector<8x96xf32> to vector<8x32xf32>
    %223 = arith.addf %222, %13 : vector<8x32xf32>
    %224 = arith.mulf %212, %223 : vector<8x32xf32>
    %225 = arith.addf %221, %224 : vector<8x32xf32>
    %226 = math.tanh %225 : vector<8x32xf32>
    %cst_59 = arith.constant 1.000000e+00 : f32
    %227 = vector.broadcast %cst_59 : f32 to vector<8x32xf32>
    %228 = arith.subf %227, %220 : vector<8x32xf32>
    %229 = arith.mulf %228, %226 : vector<8x32xf32>
    %230 = arith.mulf %220, %200 : vector<8x32xf32>
    %231 = arith.addf %229, %230 : vector<8x32xf32>
    %c4_60 = arith.constant 4 : index
    %c0_61 = arith.constant 0 : index
    %c0_62 = arith.constant 0 : index
    %232 = vector.load %arg12[%c4_60, %c0_61, %c0_62] : memref<16x8x32xf32, #tpu.memory_space<vmem>>, vector<1x8x32xf32>
    %233 = vector.shape_cast %232 : vector<1x8x32xf32> to vector<8x32xf32>
    %234 = vector.shape_cast %231 : vector<8x32xf32> to vector<1x8x32xf32>
    tpu.vector_store %arg12[%c4_60, %c0_61, %c0_62], %234 {strides = array<i32>} : memref<16x8x32xf32, #tpu.memory_space<vmem>>, vector<1x8x32xf32>,
    %c5 = arith.constant 5 : index
    %c0_63 = arith.constant 0 : index
    %c0_64 = arith.constant 0 : index
    %235 = vector.load %arg2[%c5, %c0_63, %c0_64] : memref<16x8x96xf32, #tpu.memory_space<vmem>>, vector<1x8x96xf32>
    %236 = vector.shape_cast %235 : vector<1x8x96xf32> to vector<8x96xf32>
    %cst_65 = arith.constant dense<0.000000e+00> : vector<8x160xf32>
    %237 = tpu.matmul %231, %0, %cst_65 {dimension_numbers = #tpu.dot_dimension_numbers<[1], [0], [0], [1], [0, 0, 1, 1], [], []>} : vector<8x32xf32>, vector<32x160xf32>, vector<8x160xf32> -> vector<8x160xf32>
    %238 = vector.extract_strided_slice %237 {offsets = [0, 0], sizes = [8, 64], strides = [1, 1]} : vector<8x160xf32> to vector<8x64xf32>
    %239 = arith.addf %238, %4 : vector<8x64xf32>
    %240 = math.tanh %239 : vector<8x64xf32>
    %cst_66 = arith.constant dense<0.000000e+00> : vector<8x128xf32>
    %241 = tpu.matmul %240, %1, %cst_66 {dimension_numbers = #tpu.dot_dimension_numbers<[1], [0], [0], [1], [0, 0, 1, 1], [], []>} : vector<8x64xf32>, vector<64x128xf32>, vector<8x128xf32> -> vector<8x128xf32>
    %242 = vector.extract_strided_slice %241 {offsets = [0, 0], sizes = [8, 32], strides = [1, 1]} : vector<8x128xf32> to vector<8x32xf32>
    %243 = arith.addf %231, %242 : vector<8x32xf32>
    %244 = arith.addf %243, %7 : vector<8x32xf32>
    %245 = vector.extract_strided_slice %237 {offsets = [0, 64], sizes = [8, 96], strides = [1, 1]} : vector<8x160xf32> to vector<8x96xf32>
    %246 = vector.extract_strided_slice %241 {offsets = [0, 32], sizes = [8, 96], strides = [1, 1]} : vector<8x128xf32> to vector<8x96xf32>
    %247 = arith.addf %245, %246 : vector<8x96xf32>
    %248 = arith.addf %247, %10 : vector<8x96xf32>
    %249 = vector.extract_strided_slice %236 {offsets = [0, 0], sizes = [8, 32], strides = [1, 1]} : vector<8x96xf32> to vector<8x32xf32>
    %250 = vector.extract_strided_slice %248 {offsets = [0, 0], sizes = [8, 32], strides = [1, 1]} : vector<8x96xf32> to vector<8x32xf32>
    %251 = arith.addf %249, %250 : vector<8x32xf32>
    %252 = arith.negf %251 : vector<8x32xf32>
    %253 = math.exp %252 : vector<8x32xf32>
    %cst_67 = arith.constant 1.000000e+00 : f32
    %254 = vector.broadcast %cst_67 : f32 to vector<8x32xf32>
    %255 = arith.addf %254, %253 : vector<8x32xf32>
    %256 = arith.divf %254, %255 : vector<8x32xf32>
    %257 = vector.extract_strided_slice %236 {offsets = [0, 32], sizes = [8, 32], strides = [1, 1]} : vector<8x96xf32> to vector<8x32xf32>
    %258 = vector.extract_strided_slice %248 {offsets = [0, 32], sizes = [8, 32], strides = [1, 1]} : vector<8x96xf32> to vector<8x32xf32>
    %259 = arith.addf %257, %258 : vector<8x32xf32>
    %260 = arith.negf %259 : vector<8x32xf32>
    %261 = math.exp %260 : vector<8x32xf32>
    %cst_68 = arith.constant 1.000000e+00 : f32
    %262 = vector.broadcast %cst_68 : f32 to vector<8x32xf32>
    %263 = arith.addf %262, %261 : vector<8x32xf32>
    %264 = arith.divf %262, %263 : vector<8x32xf32>
    %265 = vector.extract_strided_slice %236 {offsets = [0, 64], sizes = [8, 32], strides = [1, 1]} : vector<8x96xf32> to vector<8x32xf32>
    %266 = vector.extract_strided_slice %248 {offsets = [0, 64], sizes = [8, 32], strides = [1, 1]} : vector<8x96xf32> to vector<8x32xf32>
    %267 = arith.addf %266, %13 : vector<8x32xf32>
    %268 = arith.mulf %256, %267 : vector<8x32xf32>
    %269 = arith.addf %265, %268 : vector<8x32xf32>
    %270 = math.tanh %269 : vector<8x32xf32>
    %cst_69 = arith.constant 1.000000e+00 : f32
    %271 = vector.broadcast %cst_69 : f32 to vector<8x32xf32>
    %272 = arith.subf %271, %264 : vector<8x32xf32>
    %273 = arith.mulf %272, %270 : vector<8x32xf32>
    %274 = arith.mulf %264, %244 : vector<8x32xf32>
    %275 = arith.addf %273, %274 : vector<8x32xf32>
    %c5_70 = arith.constant 5 : index
    %c0_71 = arith.constant 0 : index
    %c0_72 = arith.constant 0 : index
    %276 = vector.load %arg12[%c5_70, %c0_71, %c0_72] : memref<16x8x32xf32, #tpu.memory_space<vmem>>, vector<1x8x32xf32>
    %277 = vector.shape_cast %276 : vector<1x8x32xf32> to vector<8x32xf32>
    %278 = vector.shape_cast %275 : vector<8x32xf32> to vector<1x8x32xf32>
    tpu.vector_store %arg12[%c5_70, %c0_71, %c0_72], %278 {strides = array<i32>} : memref<16x8x32xf32, #tpu.memory_space<vmem>>, vector<1x8x32xf32>,
    %c6 = arith.constant 6 : index
    %c0_73 = arith.constant 0 : index
    %c0_74 = arith.constant 0 : index
    %279 = vector.load %arg2[%c6, %c0_73, %c0_74] : memref<16x8x96xf32, #tpu.memory_space<vmem>>, vector<1x8x96xf32>
    %280 = vector.shape_cast %279 : vector<1x8x96xf32> to vector<8x96xf32>
    %cst_75 = arith.constant dense<0.000000e+00> : vector<8x160xf32>
    %281 = tpu.matmul %275, %0, %cst_75 {dimension_numbers = #tpu.dot_dimension_numbers<[1], [0], [0], [1], [0, 0, 1, 1], [], []>} : vector<8x32xf32>, vector<32x160xf32>, vector<8x160xf32> -> vector<8x160xf32>
    %282 = vector.extract_strided_slice %281 {offsets = [0, 0], sizes = [8, 64], strides = [1, 1]} : vector<8x160xf32> to vector<8x64xf32>
    %283 = arith.addf %282, %4 : vector<8x64xf32>
    %284 = math.tanh %283 : vector<8x64xf32>
    %cst_76 = arith.constant dense<0.000000e+00> : vector<8x128xf32>
    %285 = tpu.matmul %284, %1, %cst_76 {dimension_numbers = #tpu.dot_dimension_numbers<[1], [0], [0], [1], [0, 0, 1, 1], [], []>} : vector<8x64xf32>, vector<64x128xf32>, vector<8x128xf32> -> vector<8x128xf32>
    %286 = vector.extract_strided_slice %285 {offsets = [0, 0], sizes = [8, 32], strides = [1, 1]} : vector<8x128xf32> to vector<8x32xf32>
    %287 = arith.addf %275, %286 : vector<8x32xf32>
    %288 = arith.addf %287, %7 : vector<8x32xf32>
    %289 = vector.extract_strided_slice %281 {offsets = [0, 64], sizes = [8, 96], strides = [1, 1]} : vector<8x160xf32> to vector<8x96xf32>
    %290 = vector.extract_strided_slice %285 {offsets = [0, 32], sizes = [8, 96], strides = [1, 1]} : vector<8x128xf32> to vector<8x96xf32>
    %291 = arith.addf %289, %290 : vector<8x96xf32>
    %292 = arith.addf %291, %10 : vector<8x96xf32>
    %293 = vector.extract_strided_slice %280 {offsets = [0, 0], sizes = [8, 32], strides = [1, 1]} : vector<8x96xf32> to vector<8x32xf32>
    %294 = vector.extract_strided_slice %292 {offsets = [0, 0], sizes = [8, 32], strides = [1, 1]} : vector<8x96xf32> to vector<8x32xf32>
    %295 = arith.addf %293, %294 : vector<8x32xf32>
    %296 = arith.negf %295 : vector<8x32xf32>
    %297 = math.exp %296 : vector<8x32xf32>
    %cst_77 = arith.constant 1.000000e+00 : f32
    %298 = vector.broadcast %cst_77 : f32 to vector<8x32xf32>
    %299 = arith.addf %298, %297 : vector<8x32xf32>
    %300 = arith.divf %298, %299 : vector<8x32xf32>
    %301 = vector.extract_strided_slice %280 {offsets = [0, 32], sizes = [8, 32], strides = [1, 1]} : vector<8x96xf32> to vector<8x32xf32>
    %302 = vector.extract_strided_slice %292 {offsets = [0, 32], sizes = [8, 32], strides = [1, 1]} : vector<8x96xf32> to vector<8x32xf32>
    %303 = arith.addf %301, %302 : vector<8x32xf32>
    %304 = arith.negf %303 : vector<8x32xf32>
    %305 = math.exp %304 : vector<8x32xf32>
    %cst_78 = arith.constant 1.000000e+00 : f32
    %306 = vector.broadcast %cst_78 : f32 to vector<8x32xf32>
    %307 = arith.addf %306, %305 : vector<8x32xf32>
    %308 = arith.divf %306, %307 : vector<8x32xf32>
    %309 = vector.extract_strided_slice %280 {offsets = [0, 64], sizes = [8, 32], strides = [1, 1]} : vector<8x96xf32> to vector<8x32xf32>
    %310 = vector.extract_strided_slice %292 {offsets = [0, 64], sizes = [8, 32], strides = [1, 1]} : vector<8x96xf32> to vector<8x32xf32>
    %311 = arith.addf %310, %13 : vector<8x32xf32>
    %312 = arith.mulf %300, %311 : vector<8x32xf32>
    %313 = arith.addf %309, %312 : vector<8x32xf32>
    %314 = math.tanh %313 : vector<8x32xf32>
    %cst_79 = arith.constant 1.000000e+00 : f32
    %315 = vector.broadcast %cst_79 : f32 to vector<8x32xf32>
    %316 = arith.subf %315, %308 : vector<8x32xf32>
    %317 = arith.mulf %316, %314 : vector<8x32xf32>
    %318 = arith.mulf %308, %288 : vector<8x32xf32>
    %319 = arith.addf %317, %318 : vector<8x32xf32>
    %c6_80 = arith.constant 6 : index
    %c0_81 = arith.constant 0 : index
    %c0_82 = arith.constant 0 : index
    %320 = vector.load %arg12[%c6_80, %c0_81, %c0_82] : memref<16x8x32xf32, #tpu.memory_space<vmem>>, vector<1x8x32xf32>
    %321 = vector.shape_cast %320 : vector<1x8x32xf32> to vector<8x32xf32>
    %322 = vector.shape_cast %319 : vector<8x32xf32> to vector<1x8x32xf32>
    tpu.vector_store %arg12[%c6_80, %c0_81, %c0_82], %322 {strides = array<i32>} : memref<16x8x32xf32, #tpu.memory_space<vmem>>, vector<1x8x32xf32>,
    %c7 = arith.constant 7 : index
    %c0_83 = arith.constant 0 : index
    %c0_84 = arith.constant 0 : index
    %323 = vector.load %arg2[%c7, %c0_83, %c0_84] : memref<16x8x96xf32, #tpu.memory_space<vmem>>, vector<1x8x96xf32>
    %324 = vector.shape_cast %323 : vector<1x8x96xf32> to vector<8x96xf32>
    %cst_85 = arith.constant dense<0.000000e+00> : vector<8x160xf32>
    %325 = tpu.matmul %319, %0, %cst_85 {dimension_numbers = #tpu.dot_dimension_numbers<[1], [0], [0], [1], [0, 0, 1, 1], [], []>} : vector<8x32xf32>, vector<32x160xf32>, vector<8x160xf32> -> vector<8x160xf32>
    %326 = vector.extract_strided_slice %325 {offsets = [0, 0], sizes = [8, 64], strides = [1, 1]} : vector<8x160xf32> to vector<8x64xf32>
    %327 = arith.addf %326, %4 : vector<8x64xf32>
    %328 = math.tanh %327 : vector<8x64xf32>
    %cst_86 = arith.constant dense<0.000000e+00> : vector<8x128xf32>
    %329 = tpu.matmul %328, %1, %cst_86 {dimension_numbers = #tpu.dot_dimension_numbers<[1], [0], [0], [1], [0, 0, 1, 1], [], []>} : vector<8x64xf32>, vector<64x128xf32>, vector<8x128xf32> -> vector<8x128xf32>
    %330 = vector.extract_strided_slice %329 {offsets = [0, 0], sizes = [8, 32], strides = [1, 1]} : vector<8x128xf32> to vector<8x32xf32>
    %331 = arith.addf %319, %330 : vector<8x32xf32>
    %332 = arith.addf %331, %7 : vector<8x32xf32>
    %333 = vector.extract_strided_slice %325 {offsets = [0, 64], sizes = [8, 96], strides = [1, 1]} : vector<8x160xf32> to vector<8x96xf32>
    %334 = vector.extract_strided_slice %329 {offsets = [0, 32], sizes = [8, 96], strides = [1, 1]} : vector<8x128xf32> to vector<8x96xf32>
    %335 = arith.addf %333, %334 : vector<8x96xf32>
    %336 = arith.addf %335, %10 : vector<8x96xf32>
    %337 = vector.extract_strided_slice %324 {offsets = [0, 0], sizes = [8, 32], strides = [1, 1]} : vector<8x96xf32> to vector<8x32xf32>
    %338 = vector.extract_strided_slice %336 {offsets = [0, 0], sizes = [8, 32], strides = [1, 1]} : vector<8x96xf32> to vector<8x32xf32>
    %339 = arith.addf %337, %338 : vector<8x32xf32>
    %340 = arith.negf %339 : vector<8x32xf32>
    %341 = math.exp %340 : vector<8x32xf32>
    %cst_87 = arith.constant 1.000000e+00 : f32
    %342 = vector.broadcast %cst_87 : f32 to vector<8x32xf32>
    %343 = arith.addf %342, %341 : vector<8x32xf32>
    %344 = arith.divf %342, %343 : vector<8x32xf32>
    %345 = vector.extract_strided_slice %324 {offsets = [0, 32], sizes = [8, 32], strides = [1, 1]} : vector<8x96xf32> to vector<8x32xf32>
    %346 = vector.extract_strided_slice %336 {offsets = [0, 32], sizes = [8, 32], strides = [1, 1]} : vector<8x96xf32> to vector<8x32xf32>
    %347 = arith.addf %345, %346 : vector<8x32xf32>
    %348 = arith.negf %347 : vector<8x32xf32>
    %349 = math.exp %348 : vector<8x32xf32>
    %cst_88 = arith.constant 1.000000e+00 : f32
    %350 = vector.broadcast %cst_88 : f32 to vector<8x32xf32>
    %351 = arith.addf %350, %349 : vector<8x32xf32>
    %352 = arith.divf %350, %351 : vector<8x32xf32>
    %353 = vector.extract_strided_slice %324 {offsets = [0, 64], sizes = [8, 32], strides = [1, 1]} : vector<8x96xf32> to vector<8x32xf32>
    %354 = vector.extract_strided_slice %336 {offsets = [0, 64], sizes = [8, 32], strides = [1, 1]} : vector<8x96xf32> to vector<8x32xf32>
    %355 = arith.addf %354, %13 : vector<8x32xf32>
    %356 = arith.mulf %344, %355 : vector<8x32xf32>
    %357 = arith.addf %353, %356 : vector<8x32xf32>
    %358 = math.tanh %357 : vector<8x32xf32>
    %cst_89 = arith.constant 1.000000e+00 : f32
    %359 = vector.broadcast %cst_89 : f32 to vector<8x32xf32>
    %360 = arith.subf %359, %352 : vector<8x32xf32>
    %361 = arith.mulf %360, %358 : vector<8x32xf32>
    %362 = arith.mulf %352, %332 : vector<8x32xf32>
    %363 = arith.addf %361, %362 : vector<8x32xf32>
    %c7_90 = arith.constant 7 : index
    %c0_91 = arith.constant 0 : index
    %c0_92 = arith.constant 0 : index
    %364 = vector.load %arg12[%c7_90, %c0_91, %c0_92] : memref<16x8x32xf32, #tpu.memory_space<vmem>>, vector<1x8x32xf32>
    %365 = vector.shape_cast %364 : vector<1x8x32xf32> to vector<8x32xf32>
    %366 = vector.shape_cast %363 : vector<8x32xf32> to vector<1x8x32xf32>
    tpu.vector_store %arg12[%c7_90, %c0_91, %c0_92], %366 {strides = array<i32>} : memref<16x8x32xf32, #tpu.memory_space<vmem>>, vector<1x8x32xf32>,
    %c8 = arith.constant 8 : index
    %c0_93 = arith.constant 0 : index
    %c0_94 = arith.constant 0 : index
    %367 = vector.load %arg2[%c8, %c0_93, %c0_94] : memref<16x8x96xf32, #tpu.memory_space<vmem>>, vector<1x8x96xf32>
    %368 = vector.shape_cast %367 : vector<1x8x96xf32> to vector<8x96xf32>
    %cst_95 = arith.constant dense<0.000000e+00> : vector<8x160xf32>
    %369 = tpu.matmul %363, %0, %cst_95 {dimension_numbers = #tpu.dot_dimension_numbers<[1], [0], [0], [1], [0, 0, 1, 1], [], []>} : vector<8x32xf32>, vector<32x160xf32>, vector<8x160xf32> -> vector<8x160xf32>
    %370 = vector.extract_strided_slice %369 {offsets = [0, 0], sizes = [8, 64], strides = [1, 1]} : vector<8x160xf32> to vector<8x64xf32>
    %371 = arith.addf %370, %4 : vector<8x64xf32>
    %372 = math.tanh %371 : vector<8x64xf32>
    %cst_96 = arith.constant dense<0.000000e+00> : vector<8x128xf32>
    %373 = tpu.matmul %372, %1, %cst_96 {dimension_numbers = #tpu.dot_dimension_numbers<[1], [0], [0], [1], [0, 0, 1, 1], [], []>} : vector<8x64xf32>, vector<64x128xf32>, vector<8x128xf32> -> vector<8x128xf32>
    %374 = vector.extract_strided_slice %373 {offsets = [0, 0], sizes = [8, 32], strides = [1, 1]} : vector<8x128xf32> to vector<8x32xf32>
    %375 = arith.addf %363, %374 : vector<8x32xf32>
    %376 = arith.addf %375, %7 : vector<8x32xf32>
    %377 = vector.extract_strided_slice %369 {offsets = [0, 64], sizes = [8, 96], strides = [1, 1]} : vector<8x160xf32> to vector<8x96xf32>
    %378 = vector.extract_strided_slice %373 {offsets = [0, 32], sizes = [8, 96], strides = [1, 1]} : vector<8x128xf32> to vector<8x96xf32>
    %379 = arith.addf %377, %378 : vector<8x96xf32>
    %380 = arith.addf %379, %10 : vector<8x96xf32>
    %381 = vector.extract_strided_slice %368 {offsets = [0, 0], sizes = [8, 32], strides = [1, 1]} : vector<8x96xf32> to vector<8x32xf32>
    %382 = vector.extract_strided_slice %380 {offsets = [0, 0], sizes = [8, 32], strides = [1, 1]} : vector<8x96xf32> to vector<8x32xf32>
    %383 = arith.addf %381, %382 : vector<8x32xf32>
    %384 = arith.negf %383 : vector<8x32xf32>
    %385 = math.exp %384 : vector<8x32xf32>
    %cst_97 = arith.constant 1.000000e+00 : f32
    %386 = vector.broadcast %cst_97 : f32 to vector<8x32xf32>
    %387 = arith.addf %386, %385 : vector<8x32xf32>
    %388 = arith.divf %386, %387 : vector<8x32xf32>
    %389 = vector.extract_strided_slice %368 {offsets = [0, 32], sizes = [8, 32], strides = [1, 1]} : vector<8x96xf32> to vector<8x32xf32>
    %390 = vector.extract_strided_slice %380 {offsets = [0, 32], sizes = [8, 32], strides = [1, 1]} : vector<8x96xf32> to vector<8x32xf32>
    %391 = arith.addf %389, %390 : vector<8x32xf32>
    %392 = arith.negf %391 : vector<8x32xf32>
    %393 = math.exp %392 : vector<8x32xf32>
    %cst_98 = arith.constant 1.000000e+00 : f32
    %394 = vector.broadcast %cst_98 : f32 to vector<8x32xf32>
    %395 = arith.addf %394, %393 : vector<8x32xf32>
    %396 = arith.divf %394, %395 : vector<8x32xf32>
    %397 = vector.extract_strided_slice %368 {offsets = [0, 64], sizes = [8, 32], strides = [1, 1]} : vector<8x96xf32> to vector<8x32xf32>
    %398 = vector.extract_strided_slice %380 {offsets = [0, 64], sizes = [8, 32], strides = [1, 1]} : vector<8x96xf32> to vector<8x32xf32>
    %399 = arith.addf %398, %13 : vector<8x32xf32>
    %400 = arith.mulf %388, %399 : vector<8x32xf32>
    %401 = arith.addf %397, %400 : vector<8x32xf32>
    %402 = math.tanh %401 : vector<8x32xf32>
    %cst_99 = arith.constant 1.000000e+00 : f32
    %403 = vector.broadcast %cst_99 : f32 to vector<8x32xf32>
    %404 = arith.subf %403, %396 : vector<8x32xf32>
    %405 = arith.mulf %404, %402 : vector<8x32xf32>
    %406 = arith.mulf %396, %376 : vector<8x32xf32>
    %407 = arith.addf %405, %406 : vector<8x32xf32>
    %c8_100 = arith.constant 8 : index
    %c0_101 = arith.constant 0 : index
    %c0_102 = arith.constant 0 : index
    %408 = vector.load %arg12[%c8_100, %c0_101, %c0_102] : memref<16x8x32xf32, #tpu.memory_space<vmem>>, vector<1x8x32xf32>
    %409 = vector.shape_cast %408 : vector<1x8x32xf32> to vector<8x32xf32>
    %410 = vector.shape_cast %407 : vector<8x32xf32> to vector<1x8x32xf32>
    tpu.vector_store %arg12[%c8_100, %c0_101, %c0_102], %410 {strides = array<i32>} : memref<16x8x32xf32, #tpu.memory_space<vmem>>, vector<1x8x32xf32>,
    %c9 = arith.constant 9 : index
    %c0_103 = arith.constant 0 : index
    %c0_104 = arith.constant 0 : index
    %411 = vector.load %arg2[%c9, %c0_103, %c0_104] : memref<16x8x96xf32, #tpu.memory_space<vmem>>, vector<1x8x96xf32>
    %412 = vector.shape_cast %411 : vector<1x8x96xf32> to vector<8x96xf32>
    %cst_105 = arith.constant dense<0.000000e+00> : vector<8x160xf32>
    %413 = tpu.matmul %407, %0, %cst_105 {dimension_numbers = #tpu.dot_dimension_numbers<[1], [0], [0], [1], [0, 0, 1, 1], [], []>} : vector<8x32xf32>, vector<32x160xf32>, vector<8x160xf32> -> vector<8x160xf32>
    %414 = vector.extract_strided_slice %413 {offsets = [0, 0], sizes = [8, 64], strides = [1, 1]} : vector<8x160xf32> to vector<8x64xf32>
    %415 = arith.addf %414, %4 : vector<8x64xf32>
    %416 = math.tanh %415 : vector<8x64xf32>
    %cst_106 = arith.constant dense<0.000000e+00> : vector<8x128xf32>
    %417 = tpu.matmul %416, %1, %cst_106 {dimension_numbers = #tpu.dot_dimension_numbers<[1], [0], [0], [1], [0, 0, 1, 1], [], []>} : vector<8x64xf32>, vector<64x128xf32>, vector<8x128xf32> -> vector<8x128xf32>
    %418 = vector.extract_strided_slice %417 {offsets = [0, 0], sizes = [8, 32], strides = [1, 1]} : vector<8x128xf32> to vector<8x32xf32>
    %419 = arith.addf %407, %418 : vector<8x32xf32>
    %420 = arith.addf %419, %7 : vector<8x32xf32>
    %421 = vector.extract_strided_slice %413 {offsets = [0, 64], sizes = [8, 96], strides = [1, 1]} : vector<8x160xf32> to vector<8x96xf32>
    %422 = vector.extract_strided_slice %417 {offsets = [0, 32], sizes = [8, 96], strides = [1, 1]} : vector<8x128xf32> to vector<8x96xf32>
    %423 = arith.addf %421, %422 : vector<8x96xf32>
    %424 = arith.addf %423, %10 : vector<8x96xf32>
    %425 = vector.extract_strided_slice %412 {offsets = [0, 0], sizes = [8, 32], strides = [1, 1]} : vector<8x96xf32> to vector<8x32xf32>
    %426 = vector.extract_strided_slice %424 {offsets = [0, 0], sizes = [8, 32], strides = [1, 1]} : vector<8x96xf32> to vector<8x32xf32>
    %427 = arith.addf %425, %426 : vector<8x32xf32>
    %428 = arith.negf %427 : vector<8x32xf32>
    %429 = math.exp %428 : vector<8x32xf32>
    %cst_107 = arith.constant 1.000000e+00 : f32
    %430 = vector.broadcast %cst_107 : f32 to vector<8x32xf32>
    %431 = arith.addf %430, %429 : vector<8x32xf32>
    %432 = arith.divf %430, %431 : vector<8x32xf32>
    %433 = vector.extract_strided_slice %412 {offsets = [0, 32], sizes = [8, 32], strides = [1, 1]} : vector<8x96xf32> to vector<8x32xf32>
    %434 = vector.extract_strided_slice %424 {offsets = [0, 32], sizes = [8, 32], strides = [1, 1]} : vector<8x96xf32> to vector<8x32xf32>
    %435 = arith.addf %433, %434 : vector<8x32xf32>
    %436 = arith.negf %435 : vector<8x32xf32>
    %437 = math.exp %436 : vector<8x32xf32>
    %cst_108 = arith.constant 1.000000e+00 : f32
    %438 = vector.broadcast %cst_108 : f32 to vector<8x32xf32>
    %439 = arith.addf %438, %437 : vector<8x32xf32>
    %440 = arith.divf %438, %439 : vector<8x32xf32>
    %441 = vector.extract_strided_slice %412 {offsets = [0, 64], sizes = [8, 32], strides = [1, 1]} : vector<8x96xf32> to vector<8x32xf32>
    %442 = vector.extract_strided_slice %424 {offsets = [0, 64], sizes = [8, 32], strides = [1, 1]} : vector<8x96xf32> to vector<8x32xf32>
    %443 = arith.addf %442, %13 : vector<8x32xf32>
    %444 = arith.mulf %432, %443 : vector<8x32xf32>
    %445 = arith.addf %441, %444 : vector<8x32xf32>
    %446 = math.tanh %445 : vector<8x32xf32>
    %cst_109 = arith.constant 1.000000e+00 : f32
    %447 = vector.broadcast %cst_109 : f32 to vector<8x32xf32>
    %448 = arith.subf %447, %440 : vector<8x32xf32>
    %449 = arith.mulf %448, %446 : vector<8x32xf32>
    %450 = arith.mulf %440, %420 : vector<8x32xf32>
    %451 = arith.addf %449, %450 : vector<8x32xf32>
    %c9_110 = arith.constant 9 : index
    %c0_111 = arith.constant 0 : index
    %c0_112 = arith.constant 0 : index
    %452 = vector.load %arg12[%c9_110, %c0_111, %c0_112] : memref<16x8x32xf32, #tpu.memory_space<vmem>>, vector<1x8x32xf32>
    %453 = vector.shape_cast %452 : vector<1x8x32xf32> to vector<8x32xf32>
    %454 = vector.shape_cast %451 : vector<8x32xf32> to vector<1x8x32xf32>
    tpu.vector_store %arg12[%c9_110, %c0_111, %c0_112], %454 {strides = array<i32>} : memref<16x8x32xf32, #tpu.memory_space<vmem>>, vector<1x8x32xf32>,
    %c10 = arith.constant 10 : index
    %c0_113 = arith.constant 0 : index
    %c0_114 = arith.constant 0 : index
    %455 = vector.load %arg2[%c10, %c0_113, %c0_114] : memref<16x8x96xf32, #tpu.memory_space<vmem>>, vector<1x8x96xf32>
    %456 = vector.shape_cast %455 : vector<1x8x96xf32> to vector<8x96xf32>
    %cst_115 = arith.constant dense<0.000000e+00> : vector<8x160xf32>
    %457 = tpu.matmul %451, %0, %cst_115 {dimension_numbers = #tpu.dot_dimension_numbers<[1], [0], [0], [1], [0, 0, 1, 1], [], []>} : vector<8x32xf32>, vector<32x160xf32>, vector<8x160xf32> -> vector<8x160xf32>
    %458 = vector.extract_strided_slice %457 {offsets = [0, 0], sizes = [8, 64], strides = [1, 1]} : vector<8x160xf32> to vector<8x64xf32>
    %459 = arith.addf %458, %4 : vector<8x64xf32>
    %460 = math.tanh %459 : vector<8x64xf32>
    %cst_116 = arith.constant dense<0.000000e+00> : vector<8x128xf32>
    %461 = tpu.matmul %460, %1, %cst_116 {dimension_numbers = #tpu.dot_dimension_numbers<[1], [0], [0], [1], [0, 0, 1, 1], [], []>} : vector<8x64xf32>, vector<64x128xf32>, vector<8x128xf32> -> vector<8x128xf32>
    %462 = vector.extract_strided_slice %461 {offsets = [0, 0], sizes = [8, 32], strides = [1, 1]} : vector<8x128xf32> to vector<8x32xf32>
    %463 = arith.addf %451, %462 : vector<8x32xf32>
    %464 = arith.addf %463, %7 : vector<8x32xf32>
    %465 = vector.extract_strided_slice %457 {offsets = [0, 64], sizes = [8, 96], strides = [1, 1]} : vector<8x160xf32> to vector<8x96xf32>
    %466 = vector.extract_strided_slice %461 {offsets = [0, 32], sizes = [8, 96], strides = [1, 1]} : vector<8x128xf32> to vector<8x96xf32>
    %467 = arith.addf %465, %466 : vector<8x96xf32>
    %468 = arith.addf %467, %10 : vector<8x96xf32>
    %469 = vector.extract_strided_slice %456 {offsets = [0, 0], sizes = [8, 32], strides = [1, 1]} : vector<8x96xf32> to vector<8x32xf32>
    %470 = vector.extract_strided_slice %468 {offsets = [0, 0], sizes = [8, 32], strides = [1, 1]} : vector<8x96xf32> to vector<8x32xf32>
    %471 = arith.addf %469, %470 : vector<8x32xf32>
    %472 = arith.negf %471 : vector<8x32xf32>
    %473 = math.exp %472 : vector<8x32xf32>
    %cst_117 = arith.constant 1.000000e+00 : f32
    %474 = vector.broadcast %cst_117 : f32 to vector<8x32xf32>
    %475 = arith.addf %474, %473 : vector<8x32xf32>
    %476 = arith.divf %474, %475 : vector<8x32xf32>
    %477 = vector.extract_strided_slice %456 {offsets = [0, 32], sizes = [8, 32], strides = [1, 1]} : vector<8x96xf32> to vector<8x32xf32>
    %478 = vector.extract_strided_slice %468 {offsets = [0, 32], sizes = [8, 32], strides = [1, 1]} : vector<8x96xf32> to vector<8x32xf32>
    %479 = arith.addf %477, %478 : vector<8x32xf32>
    %480 = arith.negf %479 : vector<8x32xf32>
    %481 = math.exp %480 : vector<8x32xf32>
    %cst_118 = arith.constant 1.000000e+00 : f32
    %482 = vector.broadcast %cst_118 : f32 to vector<8x32xf32>
    %483 = arith.addf %482, %481 : vector<8x32xf32>
    %484 = arith.divf %482, %483 : vector<8x32xf32>
    %485 = vector.extract_strided_slice %456 {offsets = [0, 64], sizes = [8, 32], strides = [1, 1]} : vector<8x96xf32> to vector<8x32xf32>
    %486 = vector.extract_strided_slice %468 {offsets = [0, 64], sizes = [8, 32], strides = [1, 1]} : vector<8x96xf32> to vector<8x32xf32>
    %487 = arith.addf %486, %13 : vector<8x32xf32>
    %488 = arith.mulf %476, %487 : vector<8x32xf32>
    %489 = arith.addf %485, %488 : vector<8x32xf32>
    %490 = math.tanh %489 : vector<8x32xf32>
    %cst_119 = arith.constant 1.000000e+00 : f32
    %491 = vector.broadcast %cst_119 : f32 to vector<8x32xf32>
    %492 = arith.subf %491, %484 : vector<8x32xf32>
    %493 = arith.mulf %492, %490 : vector<8x32xf32>
    %494 = arith.mulf %484, %464 : vector<8x32xf32>
    %495 = arith.addf %493, %494 : vector<8x32xf32>
    %c10_120 = arith.constant 10 : index
    %c0_121 = arith.constant 0 : index
    %c0_122 = arith.constant 0 : index
    %496 = vector.load %arg12[%c10_120, %c0_121, %c0_122] : memref<16x8x32xf32, #tpu.memory_space<vmem>>, vector<1x8x32xf32>
    %497 = vector.shape_cast %496 : vector<1x8x32xf32> to vector<8x32xf32>
    %498 = vector.shape_cast %495 : vector<8x32xf32> to vector<1x8x32xf32>
    tpu.vector_store %arg12[%c10_120, %c0_121, %c0_122], %498 {strides = array<i32>} : memref<16x8x32xf32, #tpu.memory_space<vmem>>, vector<1x8x32xf32>,
    %c11 = arith.constant 11 : index
    %c0_123 = arith.constant 0 : index
    %c0_124 = arith.constant 0 : index
    %499 = vector.load %arg2[%c11, %c0_123, %c0_124] : memref<16x8x96xf32, #tpu.memory_space<vmem>>, vector<1x8x96xf32>
    %500 = vector.shape_cast %499 : vector<1x8x96xf32> to vector<8x96xf32>
    %cst_125 = arith.constant dense<0.000000e+00> : vector<8x160xf32>
    %501 = tpu.matmul %495, %0, %cst_125 {dimension_numbers = #tpu.dot_dimension_numbers<[1], [0], [0], [1], [0, 0, 1, 1], [], []>} : vector<8x32xf32>, vector<32x160xf32>, vector<8x160xf32> -> vector<8x160xf32>
    %502 = vector.extract_strided_slice %501 {offsets = [0, 0], sizes = [8, 64], strides = [1, 1]} : vector<8x160xf32> to vector<8x64xf32>
    %503 = arith.addf %502, %4 : vector<8x64xf32>
    %504 = math.tanh %503 : vector<8x64xf32>
    %cst_126 = arith.constant dense<0.000000e+00> : vector<8x128xf32>
    %505 = tpu.matmul %504, %1, %cst_126 {dimension_numbers = #tpu.dot_dimension_numbers<[1], [0], [0], [1], [0, 0, 1, 1], [], []>} : vector<8x64xf32>, vector<64x128xf32>, vector<8x128xf32> -> vector<8x128xf32>
    %506 = vector.extract_strided_slice %505 {offsets = [0, 0], sizes = [8, 32], strides = [1, 1]} : vector<8x128xf32> to vector<8x32xf32>
    %507 = arith.addf %495, %506 : vector<8x32xf32>
    %508 = arith.addf %507, %7 : vector<8x32xf32>
    %509 = vector.extract_strided_slice %501 {offsets = [0, 64], sizes = [8, 96], strides = [1, 1]} : vector<8x160xf32> to vector<8x96xf32>
    %510 = vector.extract_strided_slice %505 {offsets = [0, 32], sizes = [8, 96], strides = [1, 1]} : vector<8x128xf32> to vector<8x96xf32>
    %511 = arith.addf %509, %510 : vector<8x96xf32>
    %512 = arith.addf %511, %10 : vector<8x96xf32>
    %513 = vector.extract_strided_slice %500 {offsets = [0, 0], sizes = [8, 32], strides = [1, 1]} : vector<8x96xf32> to vector<8x32xf32>
    %514 = vector.extract_strided_slice %512 {offsets = [0, 0], sizes = [8, 32], strides = [1, 1]} : vector<8x96xf32> to vector<8x32xf32>
    %515 = arith.addf %513, %514 : vector<8x32xf32>
    %516 = arith.negf %515 : vector<8x32xf32>
    %517 = math.exp %516 : vector<8x32xf32>
    %cst_127 = arith.constant 1.000000e+00 : f32
    %518 = vector.broadcast %cst_127 : f32 to vector<8x32xf32>
    %519 = arith.addf %518, %517 : vector<8x32xf32>
    %520 = arith.divf %518, %519 : vector<8x32xf32>
    %521 = vector.extract_strided_slice %500 {offsets = [0, 32], sizes = [8, 32], strides = [1, 1]} : vector<8x96xf32> to vector<8x32xf32>
    %522 = vector.extract_strided_slice %512 {offsets = [0, 32], sizes = [8, 32], strides = [1, 1]} : vector<8x96xf32> to vector<8x32xf32>
    %523 = arith.addf %521, %522 : vector<8x32xf32>
    %524 = arith.negf %523 : vector<8x32xf32>
    %525 = math.exp %524 : vector<8x32xf32>
    %cst_128 = arith.constant 1.000000e+00 : f32
    %526 = vector.broadcast %cst_128 : f32 to vector<8x32xf32>
    %527 = arith.addf %526, %525 : vector<8x32xf32>
    %528 = arith.divf %526, %527 : vector<8x32xf32>
    %529 = vector.extract_strided_slice %500 {offsets = [0, 64], sizes = [8, 32], strides = [1, 1]} : vector<8x96xf32> to vector<8x32xf32>
    %530 = vector.extract_strided_slice %512 {offsets = [0, 64], sizes = [8, 32], strides = [1, 1]} : vector<8x96xf32> to vector<8x32xf32>
    %531 = arith.addf %530, %13 : vector<8x32xf32>
    %532 = arith.mulf %520, %531 : vector<8x32xf32>
    %533 = arith.addf %529, %532 : vector<8x32xf32>
    %534 = math.tanh %533 : vector<8x32xf32>
    %cst_129 = arith.constant 1.000000e+00 : f32
    %535 = vector.broadcast %cst_129 : f32 to vector<8x32xf32>
    %536 = arith.subf %535, %528 : vector<8x32xf32>
    %537 = arith.mulf %536, %534 : vector<8x32xf32>
    %538 = arith.mulf %528, %508 : vector<8x32xf32>
    %539 = arith.addf %537, %538 : vector<8x32xf32>
    %c11_130 = arith.constant 11 : index
    %c0_131 = arith.constant 0 : index
    %c0_132 = arith.constant 0 : index
    %540 = vector.load %arg12[%c11_130, %c0_131, %c0_132] : memref<16x8x32xf32, #tpu.memory_space<vmem>>, vector<1x8x32xf32>
    %541 = vector.shape_cast %540 : vector<1x8x32xf32> to vector<8x32xf32>
    %542 = vector.shape_cast %539 : vector<8x32xf32> to vector<1x8x32xf32>
    tpu.vector_store %arg12[%c11_130, %c0_131, %c0_132], %542 {strides = array<i32>} : memref<16x8x32xf32, #tpu.memory_space<vmem>>, vector<1x8x32xf32>,
    %c12 = arith.constant 12 : index
    %c0_133 = arith.constant 0 : index
    %c0_134 = arith.constant 0 : index
    %543 = vector.load %arg2[%c12, %c0_133, %c0_134] : memref<16x8x96xf32, #tpu.memory_space<vmem>>, vector<1x8x96xf32>
    %544 = vector.shape_cast %543 : vector<1x8x96xf32> to vector<8x96xf32>
    %cst_135 = arith.constant dense<0.000000e+00> : vector<8x160xf32>
    %545 = tpu.matmul %539, %0, %cst_135 {dimension_numbers = #tpu.dot_dimension_numbers<[1], [0], [0], [1], [0, 0, 1, 1], [], []>} : vector<8x32xf32>, vector<32x160xf32>, vector<8x160xf32> -> vector<8x160xf32>
    %546 = vector.extract_strided_slice %545 {offsets = [0, 0], sizes = [8, 64], strides = [1, 1]} : vector<8x160xf32> to vector<8x64xf32>
    %547 = arith.addf %546, %4 : vector<8x64xf32>
    %548 = math.tanh %547 : vector<8x64xf32>
    %cst_136 = arith.constant dense<0.000000e+00> : vector<8x128xf32>
    %549 = tpu.matmul %548, %1, %cst_136 {dimension_numbers = #tpu.dot_dimension_numbers<[1], [0], [0], [1], [0, 0, 1, 1], [], []>} : vector<8x64xf32>, vector<64x128xf32>, vector<8x128xf32> -> vector<8x128xf32>
    %550 = vector.extract_strided_slice %549 {offsets = [0, 0], sizes = [8, 32], strides = [1, 1]} : vector<8x128xf32> to vector<8x32xf32>
    %551 = arith.addf %539, %550 : vector<8x32xf32>
    %552 = arith.addf %551, %7 : vector<8x32xf32>
    %553 = vector.extract_strided_slice %545 {offsets = [0, 64], sizes = [8, 96], strides = [1, 1]} : vector<8x160xf32> to vector<8x96xf32>
    %554 = vector.extract_strided_slice %549 {offsets = [0, 32], sizes = [8, 96], strides = [1, 1]} : vector<8x128xf32> to vector<8x96xf32>
    %555 = arith.addf %553, %554 : vector<8x96xf32>
    %556 = arith.addf %555, %10 : vector<8x96xf32>
    %557 = vector.extract_strided_slice %544 {offsets = [0, 0], sizes = [8, 32], strides = [1, 1]} : vector<8x96xf32> to vector<8x32xf32>
    %558 = vector.extract_strided_slice %556 {offsets = [0, 0], sizes = [8, 32], strides = [1, 1]} : vector<8x96xf32> to vector<8x32xf32>
    %559 = arith.addf %557, %558 : vector<8x32xf32>
    %560 = arith.negf %559 : vector<8x32xf32>
    %561 = math.exp %560 : vector<8x32xf32>
    %cst_137 = arith.constant 1.000000e+00 : f32
    %562 = vector.broadcast %cst_137 : f32 to vector<8x32xf32>
    %563 = arith.addf %562, %561 : vector<8x32xf32>
    %564 = arith.divf %562, %563 : vector<8x32xf32>
    %565 = vector.extract_strided_slice %544 {offsets = [0, 32], sizes = [8, 32], strides = [1, 1]} : vector<8x96xf32> to vector<8x32xf32>
    %566 = vector.extract_strided_slice %556 {offsets = [0, 32], sizes = [8, 32], strides = [1, 1]} : vector<8x96xf32> to vector<8x32xf32>
    %567 = arith.addf %565, %566 : vector<8x32xf32>
    %568 = arith.negf %567 : vector<8x32xf32>
    %569 = math.exp %568 : vector<8x32xf32>
    %cst_138 = arith.constant 1.000000e+00 : f32
    %570 = vector.broadcast %cst_138 : f32 to vector<8x32xf32>
    %571 = arith.addf %570, %569 : vector<8x32xf32>
    %572 = arith.divf %570, %571 : vector<8x32xf32>
    %573 = vector.extract_strided_slice %544 {offsets = [0, 64], sizes = [8, 32], strides = [1, 1]} : vector<8x96xf32> to vector<8x32xf32>
    %574 = vector.extract_strided_slice %556 {offsets = [0, 64], sizes = [8, 32], strides = [1, 1]} : vector<8x96xf32> to vector<8x32xf32>
    %575 = arith.addf %574, %13 : vector<8x32xf32>
    %576 = arith.mulf %564, %575 : vector<8x32xf32>
    %577 = arith.addf %573, %576 : vector<8x32xf32>
    %578 = math.tanh %577 : vector<8x32xf32>
    %cst_139 = arith.constant 1.000000e+00 : f32
    %579 = vector.broadcast %cst_139 : f32 to vector<8x32xf32>
    %580 = arith.subf %579, %572 : vector<8x32xf32>
    %581 = arith.mulf %580, %578 : vector<8x32xf32>
    %582 = arith.mulf %572, %552 : vector<8x32xf32>
    %583 = arith.addf %581, %582 : vector<8x32xf32>
    %c12_140 = arith.constant 12 : index
    %c0_141 = arith.constant 0 : index
    %c0_142 = arith.constant 0 : index
    %584 = vector.load %arg12[%c12_140, %c0_141, %c0_142] : memref<16x8x32xf32, #tpu.memory_space<vmem>>, vector<1x8x32xf32>
    %585 = vector.shape_cast %584 : vector<1x8x32xf32> to vector<8x32xf32>
    %586 = vector.shape_cast %583 : vector<8x32xf32> to vector<1x8x32xf32>
    tpu.vector_store %arg12[%c12_140, %c0_141, %c0_142], %586 {strides = array<i32>} : memref<16x8x32xf32, #tpu.memory_space<vmem>>, vector<1x8x32xf32>,
    %c13 = arith.constant 13 : index
    %c0_143 = arith.constant 0 : index
    %c0_144 = arith.constant 0 : index
    %587 = vector.load %arg2[%c13, %c0_143, %c0_144] : memref<16x8x96xf32, #tpu.memory_space<vmem>>, vector<1x8x96xf32>
    %588 = vector.shape_cast %587 : vector<1x8x96xf32> to vector<8x96xf32>
    %cst_145 = arith.constant dense<0.000000e+00> : vector<8x160xf32>
    %589 = tpu.matmul %583, %0, %cst_145 {dimension_numbers = #tpu.dot_dimension_numbers<[1], [0], [0], [1], [0, 0, 1, 1], [], []>} : vector<8x32xf32>, vector<32x160xf32>, vector<8x160xf32> -> vector<8x160xf32>
    %590 = vector.extract_strided_slice %589 {offsets = [0, 0], sizes = [8, 64], strides = [1, 1]} : vector<8x160xf32> to vector<8x64xf32>
    %591 = arith.addf %590, %4 : vector<8x64xf32>
    %592 = math.tanh %591 : vector<8x64xf32>
    %cst_146 = arith.constant dense<0.000000e+00> : vector<8x128xf32>
    %593 = tpu.matmul %592, %1, %cst_146 {dimension_numbers = #tpu.dot_dimension_numbers<[1], [0], [0], [1], [0, 0, 1, 1], [], []>} : vector<8x64xf32>, vector<64x128xf32>, vector<8x128xf32> -> vector<8x128xf32>
    %594 = vector.extract_strided_slice %593 {offsets = [0, 0], sizes = [8, 32], strides = [1, 1]} : vector<8x128xf32> to vector<8x32xf32>
    %595 = arith.addf %583, %594 : vector<8x32xf32>
    %596 = arith.addf %595, %7 : vector<8x32xf32>
    %597 = vector.extract_strided_slice %589 {offsets = [0, 64], sizes = [8, 96], strides = [1, 1]} : vector<8x160xf32> to vector<8x96xf32>
    %598 = vector.extract_strided_slice %593 {offsets = [0, 32], sizes = [8, 96], strides = [1, 1]} : vector<8x128xf32> to vector<8x96xf32>
    %599 = arith.addf %597, %598 : vector<8x96xf32>
    %600 = arith.addf %599, %10 : vector<8x96xf32>
    %601 = vector.extract_strided_slice %588 {offsets = [0, 0], sizes = [8, 32], strides = [1, 1]} : vector<8x96xf32> to vector<8x32xf32>
    %602 = vector.extract_strided_slice %600 {offsets = [0, 0], sizes = [8, 32], strides = [1, 1]} : vector<8x96xf32> to vector<8x32xf32>
    %603 = arith.addf %601, %602 : vector<8x32xf32>
    %604 = arith.negf %603 : vector<8x32xf32>
    %605 = math.exp %604 : vector<8x32xf32>
    %cst_147 = arith.constant 1.000000e+00 : f32
    %606 = vector.broadcast %cst_147 : f32 to vector<8x32xf32>
    %607 = arith.addf %606, %605 : vector<8x32xf32>
    %608 = arith.divf %606, %607 : vector<8x32xf32>
    %609 = vector.extract_strided_slice %588 {offsets = [0, 32], sizes = [8, 32], strides = [1, 1]} : vector<8x96xf32> to vector<8x32xf32>
    %610 = vector.extract_strided_slice %600 {offsets = [0, 32], sizes = [8, 32], strides = [1, 1]} : vector<8x96xf32> to vector<8x32xf32>
    %611 = arith.addf %609, %610 : vector<8x32xf32>
    %612 = arith.negf %611 : vector<8x32xf32>
    %613 = math.exp %612 : vector<8x32xf32>
    %cst_148 = arith.constant 1.000000e+00 : f32
    %614 = vector.broadcast %cst_148 : f32 to vector<8x32xf32>
    %615 = arith.addf %614, %613 : vector<8x32xf32>
    %616 = arith.divf %614, %615 : vector<8x32xf32>
    %617 = vector.extract_strided_slice %588 {offsets = [0, 64], sizes = [8, 32], strides = [1, 1]} : vector<8x96xf32> to vector<8x32xf32>
    %618 = vector.extract_strided_slice %600 {offsets = [0, 64], sizes = [8, 32], strides = [1, 1]} : vector<8x96xf32> to vector<8x32xf32>
    %619 = arith.addf %618, %13 : vector<8x32xf32>
    %620 = arith.mulf %608, %619 : vector<8x32xf32>
    %621 = arith.addf %617, %620 : vector<8x32xf32>
    %622 = math.tanh %621 : vector<8x32xf32>
    %cst_149 = arith.constant 1.000000e+00 : f32
    %623 = vector.broadcast %cst_149 : f32 to vector<8x32xf32>
    %624 = arith.subf %623, %616 : vector<8x32xf32>
    %625 = arith.mulf %624, %622 : vector<8x32xf32>
    %626 = arith.mulf %616, %596 : vector<8x32xf32>
    %627 = arith.addf %625, %626 : vector<8x32xf32>
    %c13_150 = arith.constant 13 : index
    %c0_151 = arith.constant 0 : index
    %c0_152 = arith.constant 0 : index
    %628 = vector.load %arg12[%c13_150, %c0_151, %c0_152] : memref<16x8x32xf32, #tpu.memory_space<vmem>>, vector<1x8x32xf32>
    %629 = vector.shape_cast %628 : vector<1x8x32xf32> to vector<8x32xf32>
    %630 = vector.shape_cast %627 : vector<8x32xf32> to vector<1x8x32xf32>
    tpu.vector_store %arg12[%c13_150, %c0_151, %c0_152], %630 {strides = array<i32>} : memref<16x8x32xf32, #tpu.memory_space<vmem>>, vector<1x8x32xf32>,
    %c14 = arith.constant 14 : index
    %c0_153 = arith.constant 0 : index
    %c0_154 = arith.constant 0 : index
    %631 = vector.load %arg2[%c14, %c0_153, %c0_154] : memref<16x8x96xf32, #tpu.memory_space<vmem>>, vector<1x8x96xf32>
    %632 = vector.shape_cast %631 : vector<1x8x96xf32> to vector<8x96xf32>
    %cst_155 = arith.constant dense<0.000000e+00> : vector<8x160xf32>
    %633 = tpu.matmul %627, %0, %cst_155 {dimension_numbers = #tpu.dot_dimension_numbers<[1], [0], [0], [1], [0, 0, 1, 1], [], []>} : vector<8x32xf32>, vector<32x160xf32>, vector<8x160xf32> -> vector<8x160xf32>
    %634 = vector.extract_strided_slice %633 {offsets = [0, 0], sizes = [8, 64], strides = [1, 1]} : vector<8x160xf32> to vector<8x64xf32>
    %635 = arith.addf %634, %4 : vector<8x64xf32>
    %636 = math.tanh %635 : vector<8x64xf32>
    %cst_156 = arith.constant dense<0.000000e+00> : vector<8x128xf32>
    %637 = tpu.matmul %636, %1, %cst_156 {dimension_numbers = #tpu.dot_dimension_numbers<[1], [0], [0], [1], [0, 0, 1, 1], [], []>} : vector<8x64xf32>, vector<64x128xf32>, vector<8x128xf32> -> vector<8x128xf32>
    %638 = vector.extract_strided_slice %637 {offsets = [0, 0], sizes = [8, 32], strides = [1, 1]} : vector<8x128xf32> to vector<8x32xf32>
    %639 = arith.addf %627, %638 : vector<8x32xf32>
    %640 = arith.addf %639, %7 : vector<8x32xf32>
    %641 = vector.extract_strided_slice %633 {offsets = [0, 64], sizes = [8, 96], strides = [1, 1]} : vector<8x160xf32> to vector<8x96xf32>
    %642 = vector.extract_strided_slice %637 {offsets = [0, 32], sizes = [8, 96], strides = [1, 1]} : vector<8x128xf32> to vector<8x96xf32>
    %643 = arith.addf %641, %642 : vector<8x96xf32>
    %644 = arith.addf %643, %10 : vector<8x96xf32>
    %645 = vector.extract_strided_slice %632 {offsets = [0, 0], sizes = [8, 32], strides = [1, 1]} : vector<8x96xf32> to vector<8x32xf32>
    %646 = vector.extract_strided_slice %644 {offsets = [0, 0], sizes = [8, 32], strides = [1, 1]} : vector<8x96xf32> to vector<8x32xf32>
    %647 = arith.addf %645, %646 : vector<8x32xf32>
    %648 = arith.negf %647 : vector<8x32xf32>
    %649 = math.exp %648 : vector<8x32xf32>
    %cst_157 = arith.constant 1.000000e+00 : f32
    %650 = vector.broadcast %cst_157 : f32 to vector<8x32xf32>
    %651 = arith.addf %650, %649 : vector<8x32xf32>
    %652 = arith.divf %650, %651 : vector<8x32xf32>
    %653 = vector.extract_strided_slice %632 {offsets = [0, 32], sizes = [8, 32], strides = [1, 1]} : vector<8x96xf32> to vector<8x32xf32>
    %654 = vector.extract_strided_slice %644 {offsets = [0, 32], sizes = [8, 32], strides = [1, 1]} : vector<8x96xf32> to vector<8x32xf32>
    %655 = arith.addf %653, %654 : vector<8x32xf32>
    %656 = arith.negf %655 : vector<8x32xf32>
    %657 = math.exp %656 : vector<8x32xf32>
    %cst_158 = arith.constant 1.000000e+00 : f32
    %658 = vector.broadcast %cst_158 : f32 to vector<8x32xf32>
    %659 = arith.addf %658, %657 : vector<8x32xf32>
    %660 = arith.divf %658, %659 : vector<8x32xf32>
    %661 = vector.extract_strided_slice %632 {offsets = [0, 64], sizes = [8, 32], strides = [1, 1]} : vector<8x96xf32> to vector<8x32xf32>
    %662 = vector.extract_strided_slice %644 {offsets = [0, 64], sizes = [8, 32], strides = [1, 1]} : vector<8x96xf32> to vector<8x32xf32>
    %663 = arith.addf %662, %13 : vector<8x32xf32>
    %664 = arith.mulf %652, %663 : vector<8x32xf32>
    %665 = arith.addf %661, %664 : vector<8x32xf32>
    %666 = math.tanh %665 : vector<8x32xf32>
    %cst_159 = arith.constant 1.000000e+00 : f32
    %667 = vector.broadcast %cst_159 : f32 to vector<8x32xf32>
    %668 = arith.subf %667, %660 : vector<8x32xf32>
    %669 = arith.mulf %668, %666 : vector<8x32xf32>
    %670 = arith.mulf %660, %640 : vector<8x32xf32>
    %671 = arith.addf %669, %670 : vector<8x32xf32>
    %c14_160 = arith.constant 14 : index
    %c0_161 = arith.constant 0 : index
    %c0_162 = arith.constant 0 : index
    %672 = vector.load %arg12[%c14_160, %c0_161, %c0_162] : memref<16x8x32xf32, #tpu.memory_space<vmem>>, vector<1x8x32xf32>
    %673 = vector.shape_cast %672 : vector<1x8x32xf32> to vector<8x32xf32>
    %674 = vector.shape_cast %671 : vector<8x32xf32> to vector<1x8x32xf32>
    tpu.vector_store %arg12[%c14_160, %c0_161, %c0_162], %674 {strides = array<i32>} : memref<16x8x32xf32, #tpu.memory_space<vmem>>, vector<1x8x32xf32>,
    %c15 = arith.constant 15 : index
    %c0_163 = arith.constant 0 : index
    %c0_164 = arith.constant 0 : index
    %675 = vector.load %arg2[%c15, %c0_163, %c0_164] : memref<16x8x96xf32, #tpu.memory_space<vmem>>, vector<1x8x96xf32>
    %676 = vector.shape_cast %675 : vector<1x8x96xf32> to vector<8x96xf32>
    %cst_165 = arith.constant dense<0.000000e+00> : vector<8x160xf32>
    %677 = tpu.matmul %671, %0, %cst_165 {dimension_numbers = #tpu.dot_dimension_numbers<[1], [0], [0], [1], [0, 0, 1, 1], [], []>} : vector<8x32xf32>, vector<32x160xf32>, vector<8x160xf32> -> vector<8x160xf32>
    %678 = vector.extract_strided_slice %677 {offsets = [0, 0], sizes = [8, 64], strides = [1, 1]} : vector<8x160xf32> to vector<8x64xf32>
    %679 = arith.addf %678, %4 : vector<8x64xf32>
    %680 = math.tanh %679 : vector<8x64xf32>
    %cst_166 = arith.constant dense<0.000000e+00> : vector<8x128xf32>
    %681 = tpu.matmul %680, %1, %cst_166 {dimension_numbers = #tpu.dot_dimension_numbers<[1], [0], [0], [1], [0, 0, 1, 1], [], []>} : vector<8x64xf32>, vector<64x128xf32>, vector<8x128xf32> -> vector<8x128xf32>
    %682 = vector.extract_strided_slice %681 {offsets = [0, 0], sizes = [8, 32], strides = [1, 1]} : vector<8x128xf32> to vector<8x32xf32>
    %683 = arith.addf %671, %682 : vector<8x32xf32>
    %684 = arith.addf %683, %7 : vector<8x32xf32>
    %685 = vector.extract_strided_slice %677 {offsets = [0, 64], sizes = [8, 96], strides = [1, 1]} : vector<8x160xf32> to vector<8x96xf32>
    %686 = vector.extract_strided_slice %681 {offsets = [0, 32], sizes = [8, 96], strides = [1, 1]} : vector<8x128xf32> to vector<8x96xf32>
    %687 = arith.addf %685, %686 : vector<8x96xf32>
    %688 = arith.addf %687, %10 : vector<8x96xf32>
    %689 = vector.extract_strided_slice %676 {offsets = [0, 0], sizes = [8, 32], strides = [1, 1]} : vector<8x96xf32> to vector<8x32xf32>
    %690 = vector.extract_strided_slice %688 {offsets = [0, 0], sizes = [8, 32], strides = [1, 1]} : vector<8x96xf32> to vector<8x32xf32>
    %691 = arith.addf %689, %690 : vector<8x32xf32>
    %692 = arith.negf %691 : vector<8x32xf32>
    %693 = math.exp %692 : vector<8x32xf32>
    %cst_167 = arith.constant 1.000000e+00 : f32
    %694 = vector.broadcast %cst_167 : f32 to vector<8x32xf32>
    %695 = arith.addf %694, %693 : vector<8x32xf32>
    %696 = arith.divf %694, %695 : vector<8x32xf32>
    %697 = vector.extract_strided_slice %676 {offsets = [0, 32], sizes = [8, 32], strides = [1, 1]} : vector<8x96xf32> to vector<8x32xf32>
    %698 = vector.extract_strided_slice %688 {offsets = [0, 32], sizes = [8, 32], strides = [1, 1]} : vector<8x96xf32> to vector<8x32xf32>
    %699 = arith.addf %697, %698 : vector<8x32xf32>
    %700 = arith.negf %699 : vector<8x32xf32>
    %701 = math.exp %700 : vector<8x32xf32>
    %cst_168 = arith.constant 1.000000e+00 : f32
    %702 = vector.broadcast %cst_168 : f32 to vector<8x32xf32>
    %703 = arith.addf %702, %701 : vector<8x32xf32>
    %704 = arith.divf %702, %703 : vector<8x32xf32>
    %705 = vector.extract_strided_slice %676 {offsets = [0, 64], sizes = [8, 32], strides = [1, 1]} : vector<8x96xf32> to vector<8x32xf32>
    %706 = vector.extract_strided_slice %688 {offsets = [0, 64], sizes = [8, 32], strides = [1, 1]} : vector<8x96xf32> to vector<8x32xf32>
    %707 = arith.addf %706, %13 : vector<8x32xf32>
    %708 = arith.mulf %696, %707 : vector<8x32xf32>
    %709 = arith.addf %705, %708 : vector<8x32xf32>
    %710 = math.tanh %709 : vector<8x32xf32>
    %cst_169 = arith.constant 1.000000e+00 : f32
    %711 = vector.broadcast %cst_169 : f32 to vector<8x32xf32>
    %712 = arith.subf %711, %704 : vector<8x32xf32>
    %713 = arith.mulf %712, %710 : vector<8x32xf32>
    %714 = arith.mulf %704, %684 : vector<8x32xf32>
    %715 = arith.addf %713, %714 : vector<8x32xf32>
    %c15_170 = arith.constant 15 : index
    %c0_171 = arith.constant 0 : index
    %c0_172 = arith.constant 0 : index
    %716 = vector.load %arg12[%c15_170, %c0_171, %c0_172] : memref<16x8x32xf32, #tpu.memory_space<vmem>>, vector<1x8x32xf32>
    %717 = vector.shape_cast %716 : vector<1x8x32xf32> to vector<8x32xf32>
    %718 = vector.shape_cast %715 : vector<8x32xf32> to vector<1x8x32xf32>
    tpu.vector_store %arg12[%c15_170, %c0_171, %c0_172], %718 {strides = array<i32>} : memref<16x8x32xf32, #tpu.memory_space<vmem>>, vector<1x8x32xf32>,
    %c0_173 = arith.constant 0 : index
    %c0_174 = arith.constant 0 : index
    %c0_175 = arith.constant 0 : index
    %719 = vector.load %arg12[%c0_173, %c0_174, %c0_175] : memref<16x8x32xf32, #tpu.memory_space<vmem>>, vector<16x8x32xf32>
    %720 = vector.shape_cast %719 : vector<16x8x32xf32> to vector<128x32xf32>
    %c0_176 = arith.constant 0 : index
    %c0_177 = arith.constant 0 : index
    %721 = vector.load %arg9[%c0_176, %c0_177] : memref<32x4xf32, #tpu.memory_space<vmem>>, vector<32x4xf32>
    %cst_178 = arith.constant dense<0.000000e+00> : vector<128x4xf32>
    %722 = tpu.matmul %720, %721, %cst_178 {dimension_numbers = #tpu.dot_dimension_numbers<[1], [0], [0], [1], [0, 0, 1, 1], [], []>} : vector<128x32xf32>, vector<32x4xf32>, vector<128x4xf32> -> vector<128x4xf32>
    %c0_179 = arith.constant 0 : index
    %c0_180 = arith.constant 0 : index
    %723 = vector.load %arg10[%c0_179, %c0_180] : memref<2x4xf32, #tpu.memory_space<vmem>>, vector<1x4xf32>
    %724 = vector.broadcast %723 : vector<1x4xf32> to vector<128x4xf32>
    %725 = arith.addf %722, %724 : vector<128x4xf32>
    %726 = vector.shape_cast %725 : vector<128x4xf32> to vector<16x8x4xf32>
    %c1_181 = arith.constant 1 : index
    %c0_182 = arith.constant 0 : index
    %727 = vector.load %arg10[%c1_181, %c0_182] : memref<2x4xf32, #tpu.memory_space<vmem>>, vector<1x4xf32>
    %cst_183 = arith.constant 5.000000e-01 : f32
    %728 = vector.broadcast %cst_183 : f32 to vector<1x4xf32>
    %729 = arith.cmpf ogt, %727, %728 : vector<1x4xf32>
    %c0_184 = arith.constant 0 : index
    %c0_185 = arith.constant 0 : index
    %730 = vector.load %arg0[%c0_184, %c0_185] : memref<8x4xf32, #tpu.memory_space<vmem>>, vector<8x4xf32>
    %731 = vector.shape_cast %729 : vector<1x4xi1> to vector<1x1x4xi1>
    %732 = vector.shape_cast %730 : vector<8x4xf32> to vector<1x8x4xf32>
    %733 = vector.shape_cast %731 : vector<1x1x4xi1> to vector<1x1x4xi1>
    %734 = vector.broadcast %733 : vector<1x1x4xi1> to vector<16x8x4xi1>
    %735 = vector.shape_cast %732 : vector<1x8x4xf32> to vector<1x8x4xf32>
    %736 = vector.broadcast %735 : vector<1x8x4xf32> to vector<16x8x4xf32>
    %737 = arith.select %734, %736, %726 : vector<16x8x4xi1>, vector<16x8x4xf32>
    %c0_186 = arith.constant 0 : index
    %c0_187 = arith.constant 0 : index
    %c0_188 = arith.constant 0 : index
    %738 = vector.load %arg11[%c0_186, %c0_187, %c0_188] : memref<16x8x4xf32, #tpu.memory_space<vmem>>, vector<16x8x4xf32>
    tpu.vector_store %arg11[%c0_186, %c0_187, %c0_188], %737 {strides = array<i32>} : memref<16x8x4xf32, #tpu.memory_space<vmem>>, vector<16x8x4xf32>,
    return
  }
}

</mosaic_0001>

<bundles_post_ra>
// kernel: ode_rnn_forward_seq.1
= control target key start
LH: loop header
LB: loop body
LE: loop exit
PB: predicated region body
PF: predicated region fallthrough
CT: control target
= control target key end

     0   :  { %v4540_v7 = vmov 0.0   ;;  %v4541_v8 = vmov 0.0|0.0   ;;  %s5409_s0 = inlined_call_operand.vmem [shape: f32[8,4], index: 0, kind: input, shape index: {}]   ;;  %s5410_s1 = inlined_call_operand.vmem [shape: f32[8,32], index: 1, kind: input, shape index: {}]   ;;  %s5411_s2 = inlined_call_operand.vmem [shape: f32[16,8,96], index: 2, kind: input, shape index: {}]   ;;  %s5412_s3 = inlined_call_operand.vmem [shape: f32[32,160], index: 3, kind: input, shape index: {}]   ;;  %s5413_s4 = inlined_call_operand.vmem [shape: f32[1,64], index: 4, kind: input, shape index: {}]   ;;  %s5414_s5 = inlined_call_operand.vmem [shape: f32[64,128], index: 5, kind: input, shape index: {}]   ;;  %s5415_s6 = inlined_call_operand.vmem [shape: f32[1,32], index: 6, kind: input, shape index: {}]   ;;  %s5416_s7 = inlined_call_operand.vmem [shape: f32[1,96], index: 7, kind: input, shape index: {}]   ;;  %s5417_s8 = inlined_call_operand.vmem [shape: f32[1,32], index: 8, kind: input, shape index: {}]   ;;  %s5418_s9 = inlined_call_operand.vmem [shape: f32[32,4], index: 9, kind: input, shape index: {}]   ;;  %s5419_s10 = inlined_call_operand.vmem [shape: f32[2,4], index: 10, kind: input, shape index: {}]   ;;  %s5420_s11 = inlined_call_operand.vmem [shape: f32[16,8,4], index: 11, kind: output, shape index: {0}]   ;;  %s5421_s12 = inlined_call_operand.hbm [shape: f32[16,8,32], index: 12, kind: output, shape index: {1}]  }
   0x1   :  { %v42_v0 = vld [vmem:[%s5412_s3 + $0x8] sm:$0xff]  ;;  %v44_v1 = vld [vmem:[%s5412_s3 + $0x18] sm:$0xff]  ;;  %v41_v2 = vld [vmem:[%s5412_s3] sm:$0xff]  ;;  %154 = vmatprep.mubr.f32.mxu0 %v4540_v7  ;;  %4056 = vmatprep.subr.bf16.mxu1 %v4541_v8 }
   0x2   :  { %v4624_v3 = vpack.c.bf16 %v44_v1, %v42_v0  ;;  %v43_v4 = vld [vmem:[%s5412_s3 + $0x10] sm:$0xff]  ;;  %v46_v5 = vld [vmem:[%s5412_s3 + $0x28] sm:$0xff]  ;;  %v48_v6 = vld [vmem:[%s5412_s3 + $0x38] sm:$0xff] }
   0x3   :  { %v4637_v9 = vpack.c.bf16 %v43_v4, %v41_v2  ;;  %v4639_v10 = vpack.c.bf16 %v48_v6, %v46_v5  ;;  %v45_v11 = vld [vmem:[%s5412_s3 + $0x20] sm:$0xff]  ;;  %v47_v12 = vld [vmem:[%s5412_s3 + $0x30] sm:$0xff]  ;;  %v50_v14 = vld [vmem:[%s5414_s5 + $0x8] sm:$0xff] }
   0x4   :  { %4049 = vmatprep.subr.bf16.mxu0 %v4624_v3  ;;  %v49_v13 = vld [vmem:[%s5414_s5] sm:$0xff]  ;;  %v4655_v15 = vpack.c.bf16 %v47_v12, %v45_v11 }
   0x5   :  { %4051 = vmatpush1.bf16.msra.mxu0 %v4637_v9  ;;  %v4657_v16 = vpack.c.bf16 %v50_v14, %v49_v13 }
   0x6   :  { %18 = vsyncpa [#allocation3], 0  ;;  %4053 = vmatprep.subr.bf16.mxu0 %v4639_v10  ;;  %v4666_v17 = vld [vmem:[%s5410_s1] sm:$0xff]  ;;  %vm86_vm0 = vcmask 261120   ;;  %v51_v18 = vld [vmem:[%s5414_s5 + $0x10] sm:$0xff]  ;;  %vm4542_vm1 = vmmov 0  }
   0x7   :  { %4058 = vmatpush3.bf16.msra.mxu1 %v4657_v16  ;;  %v52_v19 = vld [vmem:[%s5414_s5 + $0x18] sm:$0xff]  ;;  %v53_v21 = vld [vmem:[%s5414_s5 + $0x20] sm:$0xff]  ;;  %v54_v22 = vld [vmem:[%s5414_s5 + $0x28] sm:$0xff]  ;;  %3728 = vmatprep.mubr.msk.f32.mxu1 %vm4542_vm1, %v4540_v7  ;;  %vm163_vm2 = vcmask 523264   ;;  %s4544_s21 = smov 64   ;;  %s4545_s1 = smov 96  }
   0x8   :  { %4059 = vmatprep.subr.bf16.mxu1 %v4541_v8  ;;  %v4682_v20 = vpack.c.bf16 %v52_v19, %v51_v18  ;;  %v4692_v23 = vpack.c.bf16 %v54_v22, %v53_v21  ;;  %v55_v24 = vld [vmem:[%s5414_s5 + $0x30] sm:$0xff]  ;;  %v56_v25 = vld [vmem:[%s5414_s5 + $0x38] sm:$0xff]  ;;  %v4711_v27 = vld [vmem:[%s5413_s4] ss:$0 sm:$0xff]  ;;  %s4543_s5 = smov 32   ;;  %vm3427_vm5 = vcmask 31744  }
   0x9   :  { %4055 = vmatpush1.bf16.msra.mxu0 %v4655_v15  ;;  %v4703_v26 = vpack.c.bf16 %v56_v25, %v55_v24  ;;  %v3466_v34 = vld [vmem:[%s5416_s7] ss:$0 sm:$0xff]  ;;  %v3471_v14 = vld [vmem:[%s5411_s2 + $0x8] sm:$0xff] }
   0xa   :  { %4069 = vmatprep.subr.bf16.mxu0 %v4624_v3  ;;  %v85_v40 = vld [vmem:[%s5411_s2] sm:$0xff] }
   0xb   :  { %4061 = vmatpush3.bf16.msra.mxu1 %v4682_v20  ;;  %v4741_v47 = vld [vmem:[%s5417_s8] ss:$0 sm:$0xff] }
   0xc   :  { %3468 = vmatmul.mubr.msk.f32.vlgmr.msra.gmra.mrb[0].mxu0 %vm86_vm0, %v4666_v17  ;;  %4062 = vmatprep.subr.bf16.mxu1 %v4541_v8  ;;  %v3465_v52 = vld [vmem:[%s5415_s6] ss:$0 sm:$0xff] }
   0xd   :  { %4071 = vmatpush1.bf16.msra.mxu0 %v4637_v9  ;;  %354 = vmatprep.mubr.f32.mxu0 %v4540_v7 }
   0xe   :  { %4073 = vmatprep.subr.bf16.mxu0 %v4639_v10 }
   0xf   :  { %4064 = vmatpush3.bf16.msra.mxu1 %v4692_v23 }
  0x10   :  { %4065 = vmatprep.subr.bf16.mxu1 %v4541_v8 }
  0x11   :  { %4075 = vmatpush1.bf16.msra.mxu0 %v4655_v15 }
  0x12   :  { %4076 = vmatprep.subr.bf16.mxu0 %v4541_v8 }
  0x13   :  { %4067 = vmatpush3.bf16.msra.mxu1 %v4703_v26 }
  0x14   :  { %4096 = vmatprep.subr.bf16.mxu1 %v4541_v8 }
  0xdf   :  { %v156_v28 = vpop.f32.mrb[0].mxu0 }
  0xe0   :  { %v161_v29 = vadd.f32 %v4711_v27, %v156_v28  ;;  %v158_v30 = vpop.f32.mrb[1].mxu0 }
  0xe2   :  { %4386 = vtanh.f32 %v161_v29 }
  0xec   :  { %v4387_v31 = vpop.eup %4386 }
  0xed   :  { %3729 = vmatmul.mubr.msk.f32.vlgmr.msra.gmra.mrb[0].mxu1 %vm163_vm2, %v4387_v31 }
  0xee   :  { %4098 = vmatpush3.bf16.msra.mxu1 %v4657_v16  ;;  %3766 = vmatprep.mubr.msk.f32.mxu1 %vm4542_vm1, %v4540_v7 }
  0xef   :  { %4099 = vmatprep.subr.bf16.mxu1 %v4541_v8 }
  0xf2   :  { %4101 = vmatpush3.bf16.msra.mxu1 %v4682_v20 }
  0xf3   :  { %4102 = vmatprep.subr.bf16.mxu1 %v4541_v8 }
  0xf6   :  { %4104 = vmatpush3.bf16.msra.mxu1 %v4692_v23 }
  0xf7   :  { %4105 = vmatprep.subr.bf16.mxu1 %v4541_v8 }
  0xfa   :  { %4107 = vmatpush3.bf16.msra.mxu1 %v4703_v26 }
  0xfb   :  { %4129 = vmatprep.subr.bf16.mxu1 %v4624_v3 }
 0x1c0   :  { %v233_v32 = vpop.f32.mrb[0].mxu1 }
 0x1c1   :  { %240 = vrot.lane.b32.xlu0 %v233_v32, %s4543_s5  ;;  %v3730_v33 = vpop.f32.mrb[1].mxu1  ;;  %v237_v50 = vadd.f32 %v233_v32, %v4666_v17 }
 0x1c3   :  { %v238_v53 = vadd.f32 %v3465_v52, %v237_v50 }
 0x1c5   :  { %245 = vrot.lane.b32.xlu0 %v3466_v34, %s4544_s21 }
 0x233   :  { %v241_v35 = vpop.permute.xlu0 %240 }
 0x234   :  { %v244_v36 = vadd.f32 %v241_v35, %v158_v30  ;;  %v243_v37 = vadd.f32 %v241_v35, %v156_v28 }
 0x237   :  { %v4730_v38 = vpop.permute.xlu0 %245 }
 0x238   :  { %v248_v39 = vadd.f32 %v4730_v38, %v243_v37  ;;  %v249_v46 = vadd.f32 %v4730_v38, %v244_v36 }
 0x23a   :  { %251 = vrot.lane.b32.xlu1 %v248_v39, %s4544_s21  ;;  %v261_v48 = vadd.f32 %v4741_v47, %v249_v46 }
 0x2ac   :  { %v252_v41 = vpop.permute.xlu1 %251 }
 0x2ad   :  { %v254_v42 = vadd.f32 %v252_v41, %v85_v40 }
 0x2af   :  { %v3470_v43 = vmul.f32 -1.442695, %v254_v42 }
 0x2b1   :  { %4388 = vpow2.f32 %v3470_v43 }
 0x2bb   :  { %v4389_v44 = vpop.eup %4388 }
 0x2bc   :  { %v258_v45 = vadd.f32 1.0, %v4389_v44 }
 0x2be   :  { %4390 = vrcp.f32 %v258_v45 }
 0x2c8   :  { %v4391_v49 = vpop.eup %4390 }
 0x2c9   :  { %v262_v51 = vmul.f32 %v4391_v49, %v261_v48  ;;  %v269_v58 = vsub.f32 1.0, %v4391_v49 }
 0x2cb   :  { %264 = vrot.lane.b32.xlu1 %v262_v51, %s4544_s21 }
 0x2cf   :  { %276 = vrot.lane.b32.xlu1 %v238_v53, %s4543_s5 }
 0x33d   :  { %v265_v54 = vpop.permute.xlu1 %264 }
 0x33e   :  { %v267_v55 = vadd.f32 %v265_v54, %v85_v40  ;;  %v3475_v54 = vld [vmem:[%s5411_s2 + $0x10] sm:$0xff] }
 0x340   :  { %4392 = vtanh.f32 %v267_v55 }
 0x341   :  { %v277_v57 = vpop.permute.xlu1 %276 }
 0x342   :  { %v279_v60 = vmul.f32 %v4391_v49, %v277_v57 }
 0x34a   :  { %v4393_v56 = vpop.eup %4392 }
 0x34b   :  { %271 = vrot.lane.b32.xlu0 %v4393_v56, %s4545_s1 }
 0x3bd   :  { %v272_v59 = vpop.permute.xlu0 %271 }
 0x3be   :  { %v274_v61 = vmul.f32 %v272_v59, %v269_v58 }
 0x3c0   :  { %v280_v62 = vadd.f32 %v279_v60, %v274_v61 }
 0x3c2   :  { %282 = vrot.lane.b32.xlu0 %v280_v62, %s4545_s1 }
 0x434   :  { %v283_v63 = vpop.permute.xlu0 %282 }
 0x435   :  { %285 = vst.msk [vmem:[#allocation2] sm:$0xff] %vm86_vm0, %v283_v63  ;;  %3472 = vmatmul.mubr.msk.f32.vlgmr.msra.gmra.mrb[2].mxu0 %vm86_vm0, %v283_v63 }
 0x436   :  { %4078 = vmatpush3.bf16.msra.mxu0 %v4657_v16  ;;  %3747 = vmatprep.mubr.msk.f32.mxu0 %vm4542_vm1, %v4540_v7 }
 0x437   :  { %4079 = vmatprep.subr.bf16.mxu0 %v4541_v8 }
 0x43a   :  { %4081 = vmatpush3.bf16.msra.mxu0 %v4682_v20 }
 0x43b   :  { %4082 = vmatprep.subr.bf16.mxu0 %v4541_v8 }
 0x43e   :  { %4084 = vmatpush3.bf16.msra.mxu0 %v4692_v23 }
 0x43f   :  { %4085 = vmatprep.subr.bf16.mxu0 %v4541_v8 }
 0x442   :  { %4087 = vmatpush3.bf16.msra.mxu0 %v4703_v26 }
 0x443   :  { %4089 = vmatprep.subr.bf16.mxu0 %v4624_v3 }
 0x508   :  { %v356_v0 = vpop.f32.mrb[2].mxu0 }
 0x509   :  { %v361_v1 = vadd.f32 %v4711_v27, %v356_v0  ;;  %v358_v2 = vpop.f32.mrb[3].mxu0 }
 0x50b   :  { %4394 = vtanh.f32 %v361_v1 }
 0x515   :  { %v4395_v4 = vpop.eup %4394 }
 0x516   :  { %3748 = vmatmul.mubr.msk.f32.vlgmr.msra.gmra.mrb[4].mxu0 %vm163_vm2, %v4395_v4 }
 0x517   :  { %4091 = vmatpush1.bf16.msra.mxu0 %v4637_v9  ;;  %550 = vmatprep.mubr.f32.mxu0 %v4540_v7 }
 0x518   :  { %4093 = vmatprep.subr.bf16.mxu0 %v4639_v10 }
 0x51b   :  { %4095 = vmatpush1.bf16.msra.mxu0 %v4655_v15 }
 0x51c   :  { %4109 = vmatprep.subr.bf16.mxu0 %v4624_v3 }
 0x5e9   :  { %v432_v5 = vpop.f32.mrb[4].mxu0 }
 0x5ea   :  { %437 = vrot.lane.b32.xlu1 %v432_v5, %s4543_s5  ;;  %v3749_v6 = vpop.f32.mrb[5].mxu0 }
 0x65c   :  { %v438_v11 = vpop.permute.xlu1 %437 }
 0x65d   :  { %v445_v12 = vadd.f32 %v438_v11, %v356_v0  ;;  %v446_v24 = vadd.f32 %v438_v11, %v358_v2  ;;  %v440_v35 = vadd.f32 %v438_v11, %v280_v62 }
 0x65f   :  { %v447_v13 = vadd.f32 %v445_v12, %v4730_v38  ;;  %v448_v25 = vadd.f32 %v446_v24, %v4730_v38 }
 0x661   :  { %450 = vrot.lane.b32.xlu0 %v447_v13, %s4544_s21  ;;  %v460_v28 = vadd.f32 %v4741_v47, %v448_v25 }
 0x665   :  { %441 = vrot.lane.b32.xlu0 %v3465_v52, %s4543_s5 }
 0x6d3   :  { %v451_v17 = vpop.permute.xlu0 %450 }
 0x6d4   :  { %v453_v18 = vadd.f32 %v3471_v14, %v451_v17 }
 0x6d6   :  { %v3474_v19 = vmul.f32 -1.442695, %v453_v18 }
 0x6d7   :  { %v4782_v34 = vpop.permute.xlu0 %441 }
 0x6d8   :  { %4396 = vpow2.f32 %v3474_v19  ;;  %v444_v37 = vadd.f32 %v4782_v34, %v440_v35 }
 0x6e2   :  { %v4397_v21 = vpop.eup %4396 }
 0x6e3   :  { %v457_v22 = vadd.f32 1.0, %v4397_v21 }
 0x6e5   :  { %4398 = vrcp.f32 %v457_v22 }
 0x6ef   :  { %v4399_v29 = vpop.eup %4398 }
 0x6f0   :  { %v461_v30 = vmul.f32 %v4399_v29, %v460_v28  ;;  %v468_v36 = vsub.f32 1.0, %v4399_v29  ;;  %v474_v41 = vmul.f32 %v4399_v29, %v444_v37 }
 0x6f2   :  { %463 = vrot.lane.b32.xlu1 %v461_v30, %s4544_s21 }
 0x764   :  { %v464_v31 = vpop.permute.xlu1 %463 }
 0x765   :  { %v466_v32 = vadd.f32 %v3471_v14, %v464_v31 }
 0x767   :  { %4400 = vtanh.f32 %v466_v32  ;;  %v3479_v32 = vld [vmem:[%s5411_s2 + $0x18] sm:$0xff] }
 0x771   :  { %v4401_v33 = vpop.eup %4400 }
 0x772   :  { %470 = vrot.lane.b32.xlu1 %v4401_v33, %s4545_s1 }
 0x7e4   :  { %v471_v39 = vpop.permute.xlu1 %470 }
 0x7e5   :  { %v473_v40 = vmul.f32 %v471_v39, %v468_v36 }
 0x7e7   :  { %v475_v42 = vadd.f32 %v474_v41, %v473_v40 }
 0x7e9   :  { %477 = vrot.lane.b32.xlu0 %v475_v42, %s4545_s1 }
 0x85b   :  { %v478_v43 = vpop.permute.xlu0 %477 }
 0x85c   :  { %481 = vst.msk [vmem:[#allocation2 + $0x8] sm:$0xff] %vm86_vm0, %v478_v43  ;;  %3476 = vmatmul.mubr.msk.f32.vlgmr.msra.gmra.mrb[6].mxu0 %vm86_vm0, %v478_v43 }
 0x85d   :  { %4111 = vmatpush1.bf16.msra.mxu0 %v4637_v9  ;;  %743 = vmatprep.mubr.f32.mxu0 %v4540_v7 }
 0x85e   :  { %4113 = vmatprep.subr.bf16.mxu0 %v4639_v10 }
 0x861   :  { %4115 = vmatpush1.bf16.msra.mxu0 %v4655_v15 }
 0x862   :  { %4116 = vmatprep.subr.bf16.mxu0 %v4541_v8 }
 0x92f   :  { %v552_v44 = vpop.f32.mrb[6].mxu0 }
 0x930   :  { %v557_v45 = vadd.f32 %v4711_v27, %v552_v44  ;;  %v554_v46 = vpop.f32.mrb[7].mxu0 }
 0x932   :  { %4402 = vtanh.f32 %v557_v45 }
 0x93c   :  { %v4403_v48 = vpop.eup %4402 }
 0x93d   :  { %3767 = vmatmul.mubr.msk.f32.vlgmr.msra.gmra.mrb[2].mxu1 %vm163_vm2, %v4403_v48 }
 0x93e   :  { %4131 = vmatpush1.bf16.msra.mxu1 %v4637_v9  ;;  %936 = vmatprep.mubr.f32.mxu1 %v4540_v7 }
 0x93f   :  { %4133 = vmatprep.subr.bf16.mxu1 %v4639_v10 }
 0x942   :  { %4135 = vmatpush1.bf16.msra.mxu1 %v4655_v15 }
 0x943   :  { %4136 = vmatprep.subr.bf16.mxu1 %v4541_v8 }
 0xa10   :  { %v628_v49 = vpop.f32.mrb[2].mxu1 }
 0xa11   :  { %633 = vrot.lane.b32.xlu1 %v628_v49, %s4543_s5  ;;  %v3768_v50 = vpop.f32.mrb[3].mxu1 }
 0xa83   :  { %v634_v51 = vpop.permute.xlu1 %633 }
 0xa84   :  { %v638_v52 = vadd.f32 %v634_v51, %v552_v44  ;;  %v639_v60 = vadd.f32 %v634_v51, %v554_v46  ;;  %v636_v5 = vadd.f32 %v634_v51, %v475_v42 }
 0xa86   :  { %v640_v53 = vadd.f32 %v638_v52, %v4730_v38  ;;  %v641_v61 = vadd.f32 %v639_v60, %v4730_v38  ;;  %v637_v6 = vadd.f32 %v636_v5, %v4782_v34 }
 0xa88   :  { %643 = vrot.lane.b32.xlu0 %v640_v53, %s4544_s21  ;;  %v653_v62 = vadd.f32 %v4741_v47, %v641_v61 }
 0xafa   :  { %v644_v55 = vpop.permute.xlu0 %643 }
 0xafb   :  { %v646_v56 = vadd.f32 %v3475_v54, %v644_v55 }
 0xafd   :  { %v3478_v57 = vmul.f32 -1.442695, %v646_v56 }
 0xaff   :  { %4404 = vpow2.f32 %v3478_v57 }
 0xb09   :  { %v4405_v58 = vpop.eup %4404 }
 0xb0a   :  { %v650_v59 = vadd.f32 1.0, %v4405_v58 }
 0xb0c   :  { %4406 = vrcp.f32 %v650_v59 }
 0xb16   :  { %v4407_v63 = vpop.eup %4406 }
 0xb17   :  { %v654_v0 = vmul.f32 %v4407_v63, %v653_v62  ;;  %v661_v11 = vsub.f32 1.0, %v4407_v63  ;;  %v667_v13 = vmul.f32 %v4407_v63, %v637_v6 }
 0xb19   :  { %656 = vrot.lane.b32.xlu1 %v654_v0, %s4544_s21 }
 0xb8b   :  { %v657_v1 = vpop.permute.xlu1 %656 }
 0xb8c   :  { %v659_v2 = vadd.f32 %v3475_v54, %v657_v1 }
 0xb8e   :  { %4408 = vtanh.f32 %v659_v2  ;;  %v3483_v2 = vld [vmem:[%s5411_s2 + $0x20] sm:$0xff] }
 0xb98   :  { %v4409_v4 = vpop.eup %4408 }
 0xb99   :  { %663 = vrot.lane.b32.xlu0 %v4409_v4, %s4545_s1 }
 0xc0b   :  { %v664_v12 = vpop.permute.xlu0 %663 }
 0xc0c   :  { %v666_v14 = vmul.f32 %v664_v12, %v661_v11 }
 0xc0e   :  { %v668_v17 = vadd.f32 %v667_v13, %v666_v14 }
 0xc10   :  { %670 = vrot.lane.b32.xlu1 %v668_v17, %s4545_s1 }
 0xc82   :  { %v671_v18 = vpop.permute.xlu1 %670 }
 0xc83   :  { %674 = vst.msk [vmem:[#allocation2 + $0x10] sm:$0xff] %vm86_vm0, %v671_v18  ;;  %3480 = vmatmul.mubr.msk.f32.vlgmr.msra.gmra.mrb[8].mxu0 %vm86_vm0, %v671_v18 }
 0xc84   :  { %4118 = vmatpush3.bf16.msra.mxu0 %v4657_v16  ;;  %3785 = vmatprep.mubr.msk.f32.mxu0 %vm4542_vm1, %v4540_v7 }
 0xc85   :  { %4119 = vmatprep.subr.bf16.mxu0 %v4541_v8 }
 0xc88   :  { %4121 = vmatpush3.bf16.msra.mxu0 %v4682_v20 }
 0xc89   :  { %4122 = vmatprep.subr.bf16.mxu0 %v4541_v8 }
 0xc8c   :  { %4124 = vmatpush3.bf16.msra.mxu0 %v4692_v23 }
 0xc8d   :  { %4125 = vmatprep.subr.bf16.mxu0 %v4541_v8 }
 0xc90   :  { %4127 = vmatpush3.bf16.msra.mxu0 %v4703_v26 }
 0xc91   :  { %4149 = vmatprep.subr.bf16.mxu0 %v4624_v3 }
 0xd56   :  { %v745_v19 = vpop.f32.mrb[8].mxu0 }
 0xd57   :  { %v750_v21 = vadd.f32 %v4711_v27, %v745_v19  ;;  %v747_v22 = vpop.f32.mrb[9].mxu0 }
 0xd59   :  { %4410 = vtanh.f32 %v750_v21 }
 0xd63   :  { %v4411_v24 = vpop.eup %4410 }
 0xd64   :  { %3786 = vmatmul.mubr.msk.f32.vlgmr.msra.gmra.mrb[10].mxu0 %vm163_vm2, %v4411_v24 }
 0xd65   :  { %4151 = vmatpush1.bf16.msra.mxu0 %v4637_v9  ;;  %1129 = vmatprep.mubr.f32.mxu0 %v4540_v7 }
 0xd66   :  { %4153 = vmatprep.subr.bf16.mxu0 %v4639_v10 }
 0xd69   :  { %4155 = vmatpush1.bf16.msra.mxu0 %v4655_v15 }
 0xd6a   :  { %4156 = vmatprep.subr.bf16.mxu0 %v4541_v8 }
 0xe37   :  { %v821_v25 = vpop.f32.mrb[10].mxu0 }
 0xe38   :  { %826 = vrot.lane.b32.xlu0 %v821_v25, %s4543_s5  ;;  %v3787_v28 = vpop.f32.mrb[11].mxu0 }
 0xeaa   :  { %v827_v29 = vpop.permute.xlu0 %826 }
 0xeab   :  { %v831_v30 = vadd.f32 %v827_v29, %v745_v19  ;;  %v832_v40 = vadd.f32 %v827_v29, %v747_v22  ;;  %v829_v49 = vadd.f32 %v827_v29, %v668_v17 }
 0xead   :  { %v833_v31 = vadd.f32 %v831_v30, %v4730_v38  ;;  %v834_v41 = vadd.f32 %v832_v40, %v4730_v38  ;;  %v830_v50 = vadd.f32 %v829_v49, %v4782_v34 }
 0xeaf   :  { %836 = vrot.lane.b32.xlu1 %v833_v31, %s4544_s21  ;;  %v846_v42 = vadd.f32 %v4741_v47, %v834_v41 }
 0xf21   :  { %v837_v33 = vpop.permute.xlu1 %836 }
 0xf22   :  { %v839_v35 = vadd.f32 %v3479_v32, %v837_v33 }
 0xf24   :  { %v3482_v36 = vmul.f32 -1.442695, %v839_v35 }
 0xf26   :  { %4412 = vpow2.f32 %v3482_v36 }
 0xf30   :  { %v4413_v37 = vpop.eup %4412 }
 0xf31   :  { %v843_v39 = vadd.f32 1.0, %v4413_v37 }
 0xf33   :  { %4414 = vrcp.f32 %v843_v39 }
 0xf3d   :  { %v4415_v43 = vpop.eup %4414 }
 0xf3e   :  { %v847_v44 = vmul.f32 %v4415_v43, %v846_v42  ;;  %v854_v51 = vsub.f32 1.0, %v4415_v43  ;;  %v860_v54 = vmul.f32 %v4415_v43, %v830_v50 }
 0xf40   :  { %849 = vrot.lane.b32.xlu0 %v847_v44, %s4544_s21 }
 0xfb2   :  { %v850_v45 = vpop.permute.xlu0 %849 }
 0xfb3   :  { %v852_v46 = vadd.f32 %v3479_v32, %v850_v45 }
 0xfb5   :  { %4416 = vtanh.f32 %v852_v46  ;;  %v3487_v46 = vld [vmem:[%s5411_s2 + $0x28] sm:$0xff] }
 0xfbf   :  { %v4417_v48 = vpop.eup %4416 }
 0xfc0   :  { %856 = vrot.lane.b32.xlu1 %v4417_v48, %s4545_s1 }
0x1032   :  { %v857_v52 = vpop.permute.xlu1 %856 }
0x1033   :  { %v859_v53 = vmul.f32 %v857_v52, %v854_v51 }
0x1035   :  { %v861_v55 = vadd.f32 %v860_v54, %v859_v53 }
0x1037   :  { %863 = vrot.lane.b32.xlu0 %v861_v55, %s4545_s1 }
0x10a9   :  { %v864_v56 = vpop.permute.xlu0 %863 }
0x10aa   :  { %867 = vst.msk [vmem:[#allocation2 + $0x18] sm:$0xff] %vm86_vm0, %v864_v56  ;;  %3484 = vmatmul.mubr.msk.f32.vlgmr.msra.gmra.mrb[4].mxu1 %vm86_vm0, %v864_v56 }
0x10ab   :  { %4138 = vmatpush3.bf16.msra.mxu1 %v4657_v16  ;;  %3804 = vmatprep.mubr.msk.f32.mxu1 %vm4542_vm1, %v4540_v7 }
0x10ac   :  { %4139 = vmatprep.subr.bf16.mxu1 %v4541_v8 }
0x10af   :  { %4141 = vmatpush3.bf16.msra.mxu1 %v4682_v20 }
0x10b0   :  { %4142 = vmatprep.subr.bf16.mxu1 %v4541_v8 }
0x10b3   :  { %4144 = vmatpush3.bf16.msra.mxu1 %v4692_v23 }
0x10b4   :  { %4145 = vmatprep.subr.bf16.mxu1 %v4541_v8 }
0x10b7   :  { %4147 = vmatpush3.bf16.msra.mxu1 %v4703_v26 }
0x10b8   :  { %4169 = vmatprep.subr.bf16.mxu1 %v4624_v3 }
0x117d   :  { %v938_v57 = vpop.f32.mrb[4].mxu1 }
0x117e   :  { %v943_v58 = vadd.f32 %v4711_v27, %v938_v57  ;;  %v940_v59 = vpop.f32.mrb[5].mxu1 }
0x1180   :  { %4418 = vtanh.f32 %v943_v58 }
0x118a   :  { %v4419_v60 = vpop.eup %4418 }
0x118b   :  { %3805 = vmatmul.mubr.msk.f32.vlgmr.msra.gmra.mrb[6].mxu1 %vm163_vm2, %v4419_v60 }
0x118c   :  { %4171 = vmatpush1.bf16.msra.mxu1 %v4637_v9  ;;  %1322 = vmatprep.mubr.f32.mxu1 %v4540_v7 }
0x118d   :  { %4173 = vmatprep.subr.bf16.mxu1 %v4639_v10 }
0x1190   :  { %4175 = vmatpush1.bf16.msra.mxu1 %v4655_v15 }
0x1191   :  { %4176 = vmatprep.subr.bf16.mxu1 %v4541_v8 }
0x125e   :  { %v1014_v61 = vpop.f32.mrb[6].mxu1 }
0x125f   :  { %1019 = vrot.lane.b32.xlu1 %v1014_v61, %s4543_s5  ;;  %v3806_v62 = vpop.f32.mrb[7].mxu1 }
0x12d1   :  { %v1020_v63 = vpop.permute.xlu1 %1019 }
0x12d2   :  { %v1024_v0 = vadd.f32 %v1020_v63, %v938_v57  ;;  %v1025_v13 = vadd.f32 %v1020_v63, %v940_v59  ;;  %v1022_v25 = vadd.f32 %v1020_v63, %v861_v55 }
0x12d4   :  { %v1026_v1 = vadd.f32 %v1024_v0, %v4730_v38  ;;  %v1027_v14 = vadd.f32 %v1025_v13, %v4730_v38  ;;  %v1023_v28 = vadd.f32 %v1022_v25, %v4782_v34 }
0x12d6   :  { %1029 = vrot.lane.b32.xlu0 %v1026_v1, %s4544_s21  ;;  %v1039_v17 = vadd.f32 %v4741_v47, %v1027_v14 }
0x1348   :  { %v1030_v4 = vpop.permute.xlu0 %1029 }
0x1349   :  { %v1032_v5 = vadd.f32 %v3483_v2, %v1030_v4 }
0x134b   :  { %v3486_v6 = vmul.f32 -1.442695, %v1032_v5 }
0x134d   :  { %4420 = vpow2.f32 %v3486_v6 }
0x1357   :  { %v4421_v11 = vpop.eup %4420 }
0x1358   :  { %v1036_v12 = vadd.f32 1.0, %v4421_v11 }
0x135a   :  { %4422 = vrcp.f32 %v1036_v12 }
0x1364   :  { %v4423_v18 = vpop.eup %4422 }
0x1365   :  { %v1040_v19 = vmul.f32 %v4423_v18, %v1039_v17  ;;  %v1047_v29 = vsub.f32 1.0, %v4423_v18  ;;  %v1053_v32 = vmul.f32 %v4423_v18, %v1023_v28 }
0x1367   :  { %1042 = vrot.lane.b32.xlu1 %v1040_v19, %s4544_s21 }
0x13d9   :  { %v1043_v21 = vpop.permute.xlu1 %1042 }
0x13da   :  { %v1045_v22 = vadd.f32 %v3483_v2, %v1043_v21 }
0x13dc   :  { %4424 = vtanh.f32 %v1045_v22  ;;  %v3491_v22 = vld [vmem:[%s5411_s2 + $0x30] sm:$0xff] }
0x13e6   :  { %v4425_v24 = vpop.eup %4424 }
0x13e7   :  { %1049 = vrot.lane.b32.xlu0 %v4425_v24, %s4545_s1 }
0x1459   :  { %v1050_v30 = vpop.permute.xlu0 %1049 }
0x145a   :  { %v1052_v31 = vmul.f32 %v1050_v30, %v1047_v29 }
0x145c   :  { %v1054_v33 = vadd.f32 %v1053_v32, %v1052_v31 }
0x145e   :  { %1056 = vrot.lane.b32.xlu1 %v1054_v33, %s4545_s1 }
0x14d0   :  { %v1057_v35 = vpop.permute.xlu1 %1056 }
0x14d1   :  { %1060 = vst.msk [vmem:[#allocation2 + $0x20] sm:$0xff] %vm86_vm0, %v1057_v35  ;;  %3488 = vmatmul.mubr.msk.f32.vlgmr.msra.gmra.mrb[12].mxu0 %vm86_vm0, %v1057_v35 }
0x14d2   :  { %4158 = vmatpush3.bf16.msra.mxu0 %v4657_v16  ;;  %3823 = vmatprep.mubr.msk.f32.mxu0 %vm4542_vm1, %v4540_v7 }
0x14d3   :  { %4159 = vmatprep.subr.bf16.mxu0 %v4541_v8 }
0x14d6   :  { %4161 = vmatpush3.bf16.msra.mxu0 %v4682_v20 }
0x14d7   :  { %4162 = vmatprep.subr.bf16.mxu0 %v4541_v8 }
0x14da   :  { %4164 = vmatpush3.bf16.msra.mxu0 %v4692_v23 }
0x14db   :  { %4165 = vmatprep.subr.bf16.mxu0 %v4541_v8 }
0x14de   :  { %4167 = vmatpush3.bf16.msra.mxu0 %v4703_v26 }
0x14df   :  { %4189 = vmatprep.subr.bf16.mxu0 %v4624_v3 }
0x15a4   :  { %v1131_v36 = vpop.f32.mrb[12].mxu0 }
0x15a5   :  { %v1136_v37 = vadd.f32 %v4711_v27, %v1131_v36  ;;  %v1133_v39 = vpop.f32.mrb[13].mxu0 }
0x15a7   :  { %4426 = vtanh.f32 %v1136_v37 }
0x15b1   :  { %v4427_v40 = vpop.eup %4426 }
0x15b2   :  { %3824 = vmatmul.mubr.msk.f32.vlgmr.msra.gmra.mrb[14].mxu0 %vm163_vm2, %v4427_v40 }
0x15b3   :  { %4191 = vmatpush1.bf16.msra.mxu0 %v4637_v9  ;;  %1515 = vmatprep.mubr.f32.mxu0 %v4540_v7 }
0x15b4   :  { %4193 = vmatprep.subr.bf16.mxu0 %v4639_v10 }
0x15b7   :  { %4195 = vmatpush1.bf16.msra.mxu0 %v4655_v15 }
0x15b8   :  { %4196 = vmatprep.subr.bf16.mxu0 %v4541_v8 }
0x1685   :  { %v1207_v41 = vpop.f32.mrb[14].mxu0 }
0x1686   :  { %1212 = vrot.lane.b32.xlu0 %v1207_v41, %s4543_s5  ;;  %v3825_v42 = vpop.f32.mrb[15].mxu0 }
0x16f8   :  { %v1213_v43 = vpop.permute.xlu0 %1212 }
0x16f9   :  { %v1217_v44 = vadd.f32 %v1213_v43, %v1131_v36  ;;  %v1218_v53 = vadd.f32 %v1213_v43, %v1133_v39  ;;  %v1215_v61 = vadd.f32 %v1213_v43, %v1054_v33 }
0x16fb   :  { %v1219_v45 = vadd.f32 %v1217_v44, %v4730_v38  ;;  %v1220_v54 = vadd.f32 %v1218_v53, %v4730_v38  ;;  %v1216_v62 = vadd.f32 %v1215_v61, %v4782_v34 }
0x16fd   :  { %1222 = vrot.lane.b32.xlu1 %v1219_v45, %s4544_s21  ;;  %v1232_v55 = vadd.f32 %v4741_v47, %v1220_v54 }
0x176f   :  { %v1223_v48 = vpop.permute.xlu1 %1222 }
0x1770   :  { %v1225_v49 = vadd.f32 %v3487_v46, %v1223_v48 }
0x1772   :  { %v3490_v50 = vmul.f32 -1.442695, %v1225_v49 }
0x1774   :  { %4428 = vpow2.f32 %v3490_v50 }
0x177e   :  { %v4429_v51 = vpop.eup %4428 }
0x177f   :  { %v1229_v52 = vadd.f32 1.0, %v4429_v51 }
0x1781   :  { %4430 = vrcp.f32 %v1229_v52 }
0x178b   :  { %v4431_v56 = vpop.eup %4430 }
0x178c   :  { %v1233_v57 = vmul.f32 %v4431_v56, %v1232_v55  ;;  %v1240_v63 = vsub.f32 1.0, %v4431_v56  ;;  %v1246_v2 = vmul.f32 %v4431_v56, %v1216_v62 }
0x178e   :  { %1235 = vrot.lane.b32.xlu0 %v1233_v57, %s4544_s21 }
0x1800   :  { %v1236_v58 = vpop.permute.xlu0 %1235 }
0x1801   :  { %v1238_v59 = vadd.f32 %v3487_v46, %v1236_v58 }
0x1803   :  { %4432 = vtanh.f32 %v1238_v59  ;;  %v3495_v59 = vld [vmem:[%s5411_s2 + $0x38] sm:$0xff] }
0x180d   :  { %v4433_v60 = vpop.eup %4432 }
0x180e   :  { %1242 = vrot.lane.b32.xlu1 %v4433_v60, %s4545_s1 }
0x1880   :  { %v1243_v0 = vpop.permute.xlu1 %1242 }
0x1881   :  { %v1245_v1 = vmul.f32 %v1243_v0, %v1240_v63 }
0x1883   :  { %v1247_v4 = vadd.f32 %v1246_v2, %v1245_v1 }
0x1885   :  { %1249 = vrot.lane.b32.xlu0 %v1247_v4, %s4545_s1 }
0x18f7   :  { %v1250_v5 = vpop.permute.xlu0 %1249 }
0x18f8   :  { %1253 = vst.msk [vmem:[#allocation2 + $0x28] sm:$0xff] %vm86_vm0, %v1250_v5  ;;  %3492 = vmatmul.mubr.msk.f32.vlgmr.msra.gmra.mrb[8].mxu1 %vm86_vm0, %v1250_v5 }
0x18f9   :  { %4178 = vmatpush3.bf16.msra.mxu1 %v4657_v16  ;;  %3842 = vmatprep.mubr.msk.f32.mxu1 %vm4542_vm1, %v4540_v7 }
0x18fa   :  { %4179 = vmatprep.subr.bf16.mxu1 %v4541_v8 }
0x18fd   :  { %4181 = vmatpush3.bf16.msra.mxu1 %v4682_v20 }
0x18fe   :  { %4182 = vmatprep.subr.bf16.mxu1 %v4541_v8 }
0x1901   :  { %4184 = vmatpush3.bf16.msra.mxu1 %v4692_v23 }
0x1902   :  { %4185 = vmatprep.subr.bf16.mxu1 %v4541_v8 }
0x1905   :  { %4187 = vmatpush3.bf16.msra.mxu1 %v4703_v26 }
0x1906   :  { %4209 = vmatprep.subr.bf16.mxu1 %v4624_v3 }
0x19cb   :  { %v1324_v6 = vpop.f32.mrb[8].mxu1 }
0x19cc   :  { %v1329_v11 = vadd.f32 %v4711_v27, %v1324_v6  ;;  %v1326_v12 = vpop.f32.mrb[9].mxu1 }
0x19ce   :  { %4434 = vtanh.f32 %v1329_v11 }
0x19d8   :  { %v4435_v13 = vpop.eup %4434 }
0x19d9   :  { %3843 = vmatmul.mubr.msk.f32.vlgmr.msra.gmra.mrb[10].mxu1 %vm163_vm2, %v4435_v13 }
0x19da   :  { %4211 = vmatpush1.bf16.msra.mxu1 %v4637_v9  ;;  %1708 = vmatprep.mubr.f32.mxu1 %v4540_v7 }
0x19db   :  { %4213 = vmatprep.subr.bf16.mxu1 %v4639_v10 }
0x19de   :  { %4215 = vmatpush1.bf16.msra.mxu1 %v4655_v15 }
0x19df   :  { %4216 = vmatprep.subr.bf16.mxu1 %v4541_v8 }
0x1aac   :  { %v1400_v14 = vpop.f32.mrb[10].mxu1 }
0x1aad   :  { %1405 = vrot.lane.b32.xlu1 %v1400_v14, %s4543_s5  ;;  %v3844_v17 = vpop.f32.mrb[11].mxu1 }
0x1b1f   :  { %v1406_v18 = vpop.permute.xlu1 %1405 }
0x1b20   :  { %v1410_v19 = vadd.f32 %v1406_v18, %v1324_v6  ;;  %v1411_v31 = vadd.f32 %v1406_v18, %v1326_v12  ;;  %v1408_v41 = vadd.f32 %v1406_v18, %v1247_v4 }
0x1b22   :  { %v1412_v21 = vadd.f32 %v1410_v19, %v4730_v38  ;;  %v1413_v32 = vadd.f32 %v1411_v31, %v4730_v38  ;;  %v1409_v42 = vadd.f32 %v1408_v41, %v4782_v34 }
0x1b24   :  { %1415 = vrot.lane.b32.xlu0 %v1412_v21, %s4544_s21  ;;  %v1425_v33 = vadd.f32 %v4741_v47, %v1413_v32 }
0x1b96   :  { %v1416_v24 = vpop.permute.xlu0 %1415 }
0x1b97   :  { %v1418_v25 = vadd.f32 %v3491_v22, %v1416_v24 }
0x1b99   :  { %v3494_v28 = vmul.f32 -1.442695, %v1418_v25 }
0x1b9b   :  { %4436 = vpow2.f32 %v3494_v28 }
0x1ba5   :  { %v4437_v29 = vpop.eup %4436 }
0x1ba6   :  { %v1422_v30 = vadd.f32 1.0, %v4437_v29 }
0x1ba8   :  { %4438 = vrcp.f32 %v1422_v30 }
0x1bb2   :  { %v4439_v35 = vpop.eup %4438 }
0x1bb3   :  { %v1426_v36 = vmul.f32 %v4439_v35, %v1425_v33  ;;  %v1433_v43 = vsub.f32 1.0, %v4439_v35  ;;  %v1439_v46 = vmul.f32 %v4439_v35, %v1409_v42 }
0x1bb5   :  { %1428 = vrot.lane.b32.xlu1 %v1426_v36, %s4544_s21 }
0x1c27   :  { %v1429_v37 = vpop.permute.xlu1 %1428 }
0x1c28   :  { %v1431_v39 = vadd.f32 %v3491_v22, %v1429_v37  ;;  %v3499_v37 = vld [vmem:[%s5411_s2 + $0x40] sm:$0xff] }
0x1c2a   :  { %4440 = vtanh.f32 %v1431_v39 }
0x1c34   :  { %v4441_v40 = vpop.eup %4440 }
0x1c35   :  { %1435 = vrot.lane.b32.xlu0 %v4441_v40, %s4545_s1 }
0x1ca7   :  { %v1436_v44 = vpop.permute.xlu0 %1435 }
0x1ca8   :  { %v1438_v45 = vmul.f32 %v1436_v44, %v1433_v43 }
0x1caa   :  { %v1440_v48 = vadd.f32 %v1439_v46, %v1438_v45 }
0x1cac   :  { %1442 = vrot.lane.b32.xlu1 %v1440_v48, %s4545_s1 }
0x1d1e   :  { %v1443_v49 = vpop.permute.xlu1 %1442 }
0x1d1f   :  { %1446 = vst.msk [vmem:[#allocation2 + $0x30] sm:$0xff] %vm86_vm0, %v1443_v49  ;;  %3496 = vmatmul.mubr.msk.f32.vlgmr.msra.gmra.mrb[16].mxu0 %vm86_vm0, %v1443_v49 }
0x1d20   :  { %4198 = vmatpush3.bf16.msra.mxu0 %v4657_v16  ;;  %3861 = vmatprep.mubr.msk.f32.mxu0 %vm4542_vm1, %v4540_v7 }
0x1d21   :  { %4199 = vmatprep.subr.bf16.mxu0 %v4541_v8 }
0x1d24   :  { %4201 = vmatpush3.bf16.msra.mxu0 %v4682_v20 }
0x1d25   :  { %4202 = vmatprep.subr.bf16.mxu0 %v4541_v8 }
0x1d28   :  { %4204 = vmatpush3.bf16.msra.mxu0 %v4692_v23 }
0x1d29   :  { %4205 = vmatprep.subr.bf16.mxu0 %v4541_v8 }
0x1d2c   :  { %4207 = vmatpush3.bf16.msra.mxu0 %v4703_v26 }
0x1d2d   :  { %4229 = vmatprep.subr.bf16.mxu0 %v4624_v3 }
0x1df2   :  { %v1517_v50 = vpop.f32.mrb[16].mxu0 }
0x1df3   :  { %v1522_v51 = vadd.f32 %v4711_v27, %v1517_v50  ;;  %v1519_v52 = vpop.f32.mrb[17].mxu0 }
0x1df5   :  { %4442 = vtanh.f32 %v1522_v51 }
0x1dff   :  { %v4443_v53 = vpop.eup %4442 }
0x1e00   :  { %3862 = vmatmul.mubr.msk.f32.vlgmr.msra.gmra.mrb[18].mxu0 %vm163_vm2, %v4443_v53 }
0x1e01   :  { %4231 = vmatpush1.bf16.msra.mxu0 %v4637_v9  ;;  %1901 = vmatprep.mubr.f32.mxu0 %v4540_v7 }
0x1e02   :  { %4233 = vmatprep.subr.bf16.mxu0 %v4639_v10 }
0x1e05   :  { %4235 = vmatpush1.bf16.msra.mxu0 %v4655_v15 }
0x1e06   :  { %4236 = vmatprep.subr.bf16.mxu0 %v4541_v8 }
0x1ed3   :  { %v1593_v54 = vpop.f32.mrb[18].mxu0 }
0x1ed4   :  { %1598 = vrot.lane.b32.xlu0 %v1593_v54, %s4543_s5  ;;  %v3863_v55 = vpop.f32.mrb[19].mxu0 }
0x1f46   :  { %v1599_v56 = vpop.permute.xlu0 %1598 }
0x1f47   :  { %v1603_v57 = vadd.f32 %v1599_v56, %v1517_v50  ;;  %v1604_v1 = vadd.f32 %v1599_v56, %v1519_v52  ;;  %v1601_v14 = vadd.f32 %v1599_v56, %v1440_v48 }
0x1f49   :  { %v1605_v58 = vadd.f32 %v1603_v57, %v4730_v38  ;;  %v1606_v2 = vadd.f32 %v1604_v1, %v4730_v38  ;;  %v1602_v17 = vadd.f32 %v1601_v14, %v4782_v34 }
0x1f4b   :  { %1608 = vrot.lane.b32.xlu1 %v1605_v58, %s4544_s21  ;;  %v1618_v4 = vadd.f32 %v4741_v47, %v1606_v2 }
0x1fbd   :  { %v1609_v60 = vpop.permute.xlu1 %1608 }
0x1fbe   :  { %v1611_v61 = vadd.f32 %v3495_v59, %v1609_v60 }
0x1fc0   :  { %v3498_v62 = vmul.f32 -1.442695, %v1611_v61  ;;  %v5013_v61 = vld [vmem:[%s5413_s4] ss:$0 sm:$0xff] }
0x1fc2   :  { %4444 = vpow2.f32 %v3498_v62 }
0x1fcc   :  { %v4445_v63 = vpop.eup %4444 }
0x1fcd   :  { %v1615_v0 = vadd.f32 1.0, %v4445_v63 }
0x1fcf   :  { %4446 = vrcp.f32 %v1615_v0 }
0x1fd9   :  { %v4447_v5 = vpop.eup %4446 }
0x1fda   :  { %v1619_v6 = vmul.f32 %v4447_v5, %v1618_v4  ;;  %v1626_v18 = vsub.f32 1.0, %v4447_v5  ;;  %v1632_v22 = vmul.f32 %v4447_v5, %v1602_v17 }
0x1fdc   :  { %1621 = vrot.lane.b32.xlu0 %v1619_v6, %s4544_s21 }
0x204e   :  { %v1622_v11 = vpop.permute.xlu0 %1621 }
0x204f   :  { %v1624_v12 = vadd.f32 %v3495_v59, %v1622_v11  ;;  %v3503_v11 = vld [vmem:[%s5411_s2 + $0x48] sm:$0xff] }
0x2051   :  { %4448 = vtanh.f32 %v1624_v12 }
0x205b   :  { %v4449_v13 = vpop.eup %4448 }
0x205c   :  { %1628 = vrot.lane.b32.xlu1 %v4449_v13, %s4545_s1 }
0x20ce   :  { %v1629_v19 = vpop.permute.xlu1 %1628 }
0x20cf   :  { %v1631_v21 = vmul.f32 %v1629_v19, %v1626_v18 }
0x20d1   :  { %v1633_v24 = vadd.f32 %v1632_v22, %v1631_v21  ;;  %v5032_v22 = vld [vmem:[%s5417_s8] ss:$0 sm:$0xff] }
0x20d3   :  { %1635 = vrot.lane.b32.xlu0 %v1633_v24, %s4545_s1 }
0x2145   :  { %v1636_v25 = vpop.permute.xlu0 %1635 }
0x2146   :  { %1639 = vst.msk [vmem:[#allocation2 + $0x38] sm:$0xff] %vm86_vm0, %v1636_v25  ;;  %3500 = vmatmul.mubr.msk.f32.vlgmr.msra.gmra.mrb[12].mxu1 %vm86_vm0, %v1636_v25 }
0x2147   :  { %4218 = vmatpush3.bf16.msra.mxu1 %v4657_v16  ;;  %3880 = vmatprep.mubr.msk.f32.mxu1 %vm4542_vm1, %v4540_v7 }
0x2148   :  { %4219 = vmatprep.subr.bf16.mxu1 %v4541_v8 }
0x214b   :  { %4221 = vmatpush3.bf16.msra.mxu1 %v4682_v20 }
0x214c   :  { %4222 = vmatprep.subr.bf16.mxu1 %v4541_v8 }
0x214f   :  { %4224 = vmatpush3.bf16.msra.mxu1 %v4692_v23 }
0x2150   :  { %4225 = vmatprep.subr.bf16.mxu1 %v4541_v8 }
0x2153   :  { %4227 = vmatpush3.bf16.msra.mxu1 %v4703_v26 }
0x2154   :  { %4249 = vmatprep.subr.bf16.mxu1 %v4624_v3 }
0x2219   :  { %v1710_v28 = vpop.f32.mrb[12].mxu1 }
0x221a   :  { %v1715_v29 = vadd.f32 %v4711_v27, %v1710_v28  ;;  %v1712_v30 = vpop.f32.mrb[13].mxu1 }
0x221c   :  { %4450 = vtanh.f32 %v1715_v29 }
0x2226   :  { %v4451_v31 = vpop.eup %4450 }
0x2227   :  { %3881 = vmatmul.mubr.msk.f32.vlgmr.msra.gmra.mrb[14].mxu1 %vm163_vm2, %v4451_v31 }
0x2228   :  { %4251 = vmatpush1.bf16.msra.mxu1 %v4637_v9  ;;  %2094 = vmatprep.mubr.f32.mxu1 %v4540_v7 }
0x2229   :  { %4253 = vmatprep.subr.bf16.mxu1 %v4639_v10 }
0x222c   :  { %4255 = vmatpush1.bf16.msra.mxu1 %v4655_v15 }
0x222d   :  { %4256 = vmatprep.subr.bf16.mxu1 %v4541_v8 }
0x22fa   :  { %v1786_v32 = vpop.f32.mrb[14].mxu1 }
0x22fb   :  { %1791 = vrot.lane.b32.xlu1 %v1786_v32, %s4543_s5  ;;  %v3882_v33 = vpop.f32.mrb[15].mxu1 }
0x236d   :  { %v1792_v27 = vpop.permute.xlu1 %1791 }
0x236e   :  { %v1796_v35 = vadd.f32 %v1792_v27, %v1710_v28  ;;  %v1797_v44 = vadd.f32 %v1792_v27, %v1712_v30  ;;  %v1794_v53 = vadd.f32 %v1792_v27, %v1633_v24 }
0x2370   :  { %v1798_v36 = vadd.f32 %v1796_v35, %v4730_v38  ;;  %v1799_v45 = vadd.f32 %v1797_v44, %v4730_v38  ;;  %v1795_v54 = vadd.f32 %v1794_v53, %v4782_v34 }
0x2372   :  { %1801 = vrot.lane.b32.xlu0 %v1798_v36, %s4544_s21  ;;  %v1811_v46 = vadd.f32 %v4741_v47, %v1799_v45 }
0x23e4   :  { %v1802_v39 = vpop.permute.xlu0 %1801 }
0x23e5   :  { %v1804_v40 = vadd.f32 %v3499_v37, %v1802_v39 }
0x23e7   :  { %v3502_v41 = vmul.f32 -1.442695, %v1804_v40 }
0x23e9   :  { %4452 = vpow2.f32 %v3502_v41 }
0x23f3   :  { %v4453_v42 = vpop.eup %4452 }
0x23f4   :  { %v1808_v43 = vadd.f32 1.0, %v4453_v42 }
0x23f6   :  { %4454 = vrcp.f32 %v1808_v43 }
0x2400   :  { %v4455_v48 = vpop.eup %4454 }
0x2401   :  { %v1812_v49 = vmul.f32 %v4455_v48, %v1811_v46  ;;  %v1819_v55 = vsub.f32 1.0, %v4455_v48  ;;  %v1825_v58 = vmul.f32 %v4455_v48, %v1795_v54 }
0x2403   :  { %1814 = vrot.lane.b32.xlu1 %v1812_v49, %s4544_s21 }
0x2475   :  { %v1815_v50 = vpop.permute.xlu1 %1814 }
0x2476   :  { %v1817_v51 = vadd.f32 %v3499_v37, %v1815_v50 }
0x2478   :  { %4456 = vtanh.f32 %v1817_v51  ;;  %v3507_v51 = vld [vmem:[%s5411_s2 + $0x50] sm:$0xff] }
0x2482   :  { %v4457_v52 = vpop.eup %4456 }
0x2483   :  { %1821 = vrot.lane.b32.xlu0 %v4457_v52, %s4545_s1 }
0x24f5   :  { %v1822_v56 = vpop.permute.xlu0 %1821 }
0x24f6   :  { %v1824_v57 = vmul.f32 %v1822_v56, %v1819_v55 }
0x24f8   :  { %v1826_v59 = vadd.f32 %v1825_v58, %v1824_v57 }
0x24fa   :  { %1828 = vrot.lane.b32.xlu1 %v1826_v59, %s4545_s1 }
0x256c   :  { %v1829_v47 = vpop.permute.xlu1 %1828 }
0x256d   :  { %1832 = vst.msk [vmem:[#allocation2 + $0x40] sm:$0xff] %vm86_vm0, %v1829_v47  ;;  %3504 = vmatmul.mubr.msk.f32.vlgmr.msra.gmra.mrb[20].mxu0 %vm86_vm0, %v1829_v47 }
0x256e   :  { %4238 = vmatpush3.bf16.msra.mxu0 %v4657_v16  ;;  %3899 = vmatprep.mubr.msk.f32.mxu0 %vm4542_vm1, %v4540_v7 }
0x256f   :  { %4239 = vmatprep.subr.bf16.mxu0 %v4541_v8 }
0x2572   :  { %4241 = vmatpush3.bf16.msra.mxu0 %v4682_v20 }
0x2573   :  { %4242 = vmatprep.subr.bf16.mxu0 %v4541_v8 }
0x2576   :  { %4244 = vmatpush3.bf16.msra.mxu0 %v4692_v23 }
0x2577   :  { %4245 = vmatprep.subr.bf16.mxu0 %v4541_v8 }
0x257a   :  { %4247 = vmatpush3.bf16.msra.mxu0 %v4703_v26 }
0x257b   :  { %4269 = vmatprep.subr.bf16.mxu0 %v4624_v3 }
0x2640   :  { %v1903_v60 = vpop.f32.mrb[20].mxu0 }
0x2641   :  { %v1908_v62 = vadd.f32 %v5013_v61, %v1903_v60  ;;  %v1905_v63 = vpop.f32.mrb[21].mxu0 }
0x2643   :  { %4458 = vtanh.f32 %v1908_v62 }
0x264d   :  { %v4459_v0 = vpop.eup %4458 }
0x264e   :  { %3900 = vmatmul.mubr.msk.f32.vlgmr.msra.gmra.mrb[22].mxu0 %vm163_vm2, %v4459_v0 }
0x264f   :  { %4271 = vmatpush1.bf16.msra.mxu0 %v4637_v9  ;;  %2287 = vmatprep.mubr.f32.mxu0 %v4540_v7 }
0x2650   :  { %4273 = vmatprep.subr.bf16.mxu0 %v4639_v10 }
0x2653   :  { %4275 = vmatpush1.bf16.msra.mxu0 %v4655_v15 }
0x2654   :  { %4276 = vmatprep.subr.bf16.mxu0 %v4541_v8 }
0x2721   :  { %v1979_v1 = vpop.f32.mrb[22].mxu0 }
0x2722   :  { %1984 = vrot.lane.b32.xlu0 %v1979_v1, %s4543_s5  ;;  %v3901_v2 = vpop.f32.mrb[23].mxu0 }
0x2794   :  { %v1985_v4 = vpop.permute.xlu0 %1984 }
0x2795   :  { %v1989_v5 = vadd.f32 %v1985_v4, %v1903_v60  ;;  %v1990_v19 = vadd.f32 %v1985_v4, %v1905_v63  ;;  %v1987_v32 = vadd.f32 %v1985_v4, %v1826_v59 }
0x2797   :  { %v1991_v6 = vadd.f32 %v1989_v5, %v4730_v38  ;;  %v1992_v21 = vadd.f32 %v1990_v19, %v4730_v38  ;;  %v1988_v33 = vadd.f32 %v1987_v32, %v4782_v34 }
0x2799   :  { %1994 = vrot.lane.b32.xlu1 %v1991_v6, %s4544_s21  ;;  %v2004_v24 = vadd.f32 %v5032_v22, %v1992_v21 }
0x280b   :  { %v1995_v12 = vpop.permute.xlu1 %1994 }
0x280c   :  { %v1997_v13 = vadd.f32 %v3503_v11, %v1995_v12 }
0x280e   :  { %v3506_v14 = vmul.f32 -1.442695, %v1997_v13 }
0x2810   :  { %4460 = vpow2.f32 %v3506_v14 }
0x281a   :  { %v4461_v17 = vpop.eup %4460 }
0x281b   :  { %v2001_v18 = vadd.f32 1.0, %v4461_v17 }
0x281d   :  { %4462 = vrcp.f32 %v2001_v18 }
0x2827   :  { %v4463_v25 = vpop.eup %4462 }
0x2828   :  { %v2005_v28 = vmul.f32 %v4463_v25, %v2004_v24  ;;  %v2012_v27 = vsub.f32 1.0, %v4463_v25  ;;  %v2018_v37 = vmul.f32 %v4463_v25, %v1988_v33 }
0x282a   :  { %2007 = vrot.lane.b32.xlu0 %v2005_v28, %s4544_s21 }
0x289c   :  { %v2008_v29 = vpop.permute.xlu0 %2007 }
0x289d   :  { %v2010_v30 = vadd.f32 %v3503_v11, %v2008_v29 }
0x289f   :  { %4464 = vtanh.f32 %v2010_v30  ;;  %v3511_v30 = vld [vmem:[%s5411_s2 + $0x58] sm:$0xff] }
0x28a9   :  { %v4465_v31 = vpop.eup %4464 }
0x28aa   :  { %2014 = vrot.lane.b32.xlu1 %v4465_v31, %s4545_s1 }
0x291c   :  { %v2015_v35 = vpop.permute.xlu1 %2014 }
0x291d   :  { %v2017_v36 = vmul.f32 %v2015_v35, %v2012_v27 }
0x291f   :  { %v2019_v39 = vadd.f32 %v2018_v37, %v2017_v36 }
0x2921   :  { %2021 = vrot.lane.b32.xlu0 %v2019_v39, %s4545_s1 }
0x2993   :  { %v2022_v40 = vpop.permute.xlu0 %2021 }
0x2994   :  { %2025 = vst.msk [vmem:[#allocation2 + $0x48] sm:$0xff] %vm86_vm0, %v2022_v40  ;;  %3508 = vmatmul.mubr.msk.f32.vlgmr.msra.gmra.mrb[16].mxu1 %vm86_vm0, %v2022_v40 }
0x2995   :  { %4258 = vmatpush3.bf16.msra.mxu1 %v4657_v16  ;;  %3918 = vmatprep.mubr.msk.f32.mxu1 %vm4542_vm1, %v4540_v7 }
0x2996   :  { %4259 = vmatprep.subr.bf16.mxu1 %v4541_v8 }
0x2999   :  { %4261 = vmatpush3.bf16.msra.mxu1 %v4682_v20 }
0x299a   :  { %4262 = vmatprep.subr.bf16.mxu1 %v4541_v8 }
0x299d   :  { %4264 = vmatpush3.bf16.msra.mxu1 %v4692_v23 }
0x299e   :  { %4265 = vmatprep.subr.bf16.mxu1 %v4541_v8 }
0x29a1   :  { %4267 = vmatpush3.bf16.msra.mxu1 %v4703_v26 }
0x29a2   :  { %4289 = vmatprep.subr.bf16.mxu1 %v4624_v3 }
0x2a67   :  { %v2096_v41 = vpop.f32.mrb[16].mxu1 }
0x2a68   :  { %v2101_v42 = vadd.f32 %v5013_v61, %v2096_v41  ;;  %v2098_v43 = vpop.f32.mrb[17].mxu1 }
0x2a6a   :  { %4466 = vtanh.f32 %v2101_v42 }
0x2a74   :  { %v4467_v44 = vpop.eup %4466 }
0x2a75   :  { %3919 = vmatmul.mubr.msk.f32.vlgmr.msra.gmra.mrb[18].mxu1 %vm163_vm2, %v4467_v44 }
0x2a76   :  { %4291 = vmatpush1.bf16.msra.mxu1 %v4637_v9  ;;  %2480 = vmatprep.mubr.f32.mxu1 %v4540_v7 }
0x2a77   :  { %4293 = vmatprep.subr.bf16.mxu1 %v4639_v10 }
0x2a7a   :  { %4295 = vmatpush1.bf16.msra.mxu1 %v4655_v15 }
0x2a7b   :  { %4296 = vmatprep.subr.bf16.mxu1 %v4541_v8 }
0x2b48   :  { %v2172_v45 = vpop.f32.mrb[18].mxu1 }
0x2b49   :  { %2177 = vrot.lane.b32.xlu1 %v2172_v45, %s4543_s5  ;;  %v3920_v46 = vpop.f32.mrb[19].mxu1 }
0x2bbb   :  { %v2178_v48 = vpop.permute.xlu1 %2177 }
0x2bbc   :  { %v2182_v49 = vadd.f32 %v2178_v48, %v2096_v41  ;;  %v2183_v57 = vadd.f32 %v2178_v48, %v2098_v43  ;;  %v2180_v1 = vadd.f32 %v2178_v48, %v2019_v39 }
0x2bbe   :  { %v2184_v50 = vadd.f32 %v2182_v49, %v4730_v38  ;;  %v2185_v58 = vadd.f32 %v2183_v57, %v4730_v38  ;;  %v2181_v2 = vadd.f32 %v2180_v1, %v4782_v34 }
0x2bc0   :  { %2187 = vrot.lane.b32.xlu0 %v2184_v50, %s4544_s21  ;;  %v2197_v59 = vadd.f32 %v5032_v22, %v2185_v58 }
0x2c32   :  { %v2188_v52 = vpop.permute.xlu0 %2187 }
0x2c33   :  { %v2190_v53 = vadd.f32 %v3507_v51, %v2188_v52 }
0x2c35   :  { %v3510_v54 = vmul.f32 -1.442695, %v2190_v53 }
0x2c37   :  { %4468 = vpow2.f32 %v3510_v54 }
0x2c41   :  { %v4469_v55 = vpop.eup %4468 }
0x2c42   :  { %v2194_v56 = vadd.f32 1.0, %v4469_v55 }
0x2c44   :  { %4470 = vrcp.f32 %v2194_v56 }
0x2c4e   :  { %v4471_v47 = vpop.eup %4470 }
0x2c4f   :  { %v2198_v60 = vmul.f32 %v4471_v47, %v2197_v59  ;;  %v2205_v4 = vsub.f32 1.0, %v4471_v47  ;;  %v2211_v11 = vmul.f32 %v4471_v47, %v2181_v2 }
0x2c51   :  { %2200 = vrot.lane.b32.xlu1 %v2198_v60, %s4544_s21 }
0x2cc3   :  { %v2201_v62 = vpop.permute.xlu1 %2200 }
0x2cc4   :  { %v2203_v63 = vadd.f32 %v3507_v51, %v2201_v62 }
0x2cc6   :  { %4472 = vtanh.f32 %v2203_v63  ;;  %v3515_v63 = vld [vmem:[%s5411_s2 + $0x60] sm:$0xff] }
0x2cd0   :  { %v4473_v0 = vpop.eup %4472 }
0x2cd1   :  { %2207 = vrot.lane.b32.xlu0 %v4473_v0, %s4545_s1 }
0x2d43   :  { %v2208_v5 = vpop.permute.xlu0 %2207 }
0x2d44   :  { %v2210_v6 = vmul.f32 %v2208_v5, %v2205_v4 }
0x2d46   :  { %v2212_v12 = vadd.f32 %v2211_v11, %v2210_v6 }
0x2d48   :  { %2214 = vrot.lane.b32.xlu1 %v2212_v12, %s4545_s1 }
0x2dba   :  { %v2215_v13 = vpop.permute.xlu1 %2214 }
0x2dbb   :  { %2218 = vst.msk [vmem:[#allocation2 + $0x50] sm:$0xff] %vm86_vm0, %v2215_v13  ;;  %3512 = vmatmul.mubr.msk.f32.vlgmr.msra.gmra.mrb[24].mxu0 %vm86_vm0, %v2215_v13 }
0x2dbc   :  { %4278 = vmatpush3.bf16.msra.mxu0 %v4657_v16  ;;  %3937 = vmatprep.mubr.msk.f32.mxu0 %vm4542_vm1, %v4540_v7 }
0x2dbd   :  { %4279 = vmatprep.subr.bf16.mxu0 %v4541_v8 }
0x2dc0   :  { %4281 = vmatpush3.bf16.msra.mxu0 %v4682_v20 }
0x2dc1   :  { %4282 = vmatprep.subr.bf16.mxu0 %v4541_v8 }
0x2dc4   :  { %4284 = vmatpush3.bf16.msra.mxu0 %v4692_v23 }
0x2dc5   :  { %4285 = vmatprep.subr.bf16.mxu0 %v4541_v8 }
0x2dc8   :  { %4287 = vmatpush3.bf16.msra.mxu0 %v4703_v26 }
0x2dc9   :  { %4309 = vmatprep.subr.bf16.mxu0 %v4624_v3 }
0x2e8e   :  { %v2289_v14 = vpop.f32.mrb[24].mxu0 }
0x2e8f   :  { %v2294_v17 = vadd.f32 %v5013_v61, %v2289_v14  ;;  %v2291_v18 = vpop.f32.mrb[25].mxu0 }
0x2e91   :  { %4474 = vtanh.f32 %v2294_v17 }
0x2e9b   :  { %v4475_v19 = vpop.eup %4474 }
0x2e9c   :  { %3938 = vmatmul.mubr.msk.f32.vlgmr.msra.gmra.mrb[26].mxu0 %vm163_vm2, %v4475_v19 }
0x2e9d   :  { %4311 = vmatpush1.bf16.msra.mxu0 %v4637_v9  ;;  %2673 = vmatprep.mubr.f32.mxu0 %v4540_v7 }
0x2e9e   :  { %4313 = vmatprep.subr.bf16.mxu0 %v4639_v10 }
0x2ea1   :  { %4315 = vmatpush1.bf16.msra.mxu0 %v4655_v15 }
0x2ea2   :  { %4316 = vmatprep.subr.bf16.mxu0 %v4541_v8 }
0x2f6f   :  { %v2365_v21 = vpop.f32.mrb[26].mxu0 }
0x2f70   :  { %2370 = vrot.lane.b32.xlu0 %v2365_v21, %s4543_s5  ;;  %v3939_v24 = vpop.f32.mrb[27].mxu0 }
0x2fe2   :  { %v2371_v25 = vpop.permute.xlu0 %2370 }
0x2fe3   :  { %v2375_v28 = vadd.f32 %v2371_v25, %v2289_v14  ;;  %v2376_v36 = vadd.f32 %v2371_v25, %v2291_v18  ;;  %v2373_v45 = vadd.f32 %v2371_v25, %v2212_v12 }
0x2fe5   :  { %v2377_v29 = vadd.f32 %v2375_v28, %v4730_v38  ;;  %v2378_v37 = vadd.f32 %v2376_v36, %v4730_v38  ;;  %v2374_v46 = vadd.f32 %v2373_v45, %v4782_v34 }
0x2fe7   :  { %2380 = vrot.lane.b32.xlu1 %v2377_v29, %s4544_s21  ;;  %v2390_v39 = vadd.f32 %v5032_v22, %v2378_v37 }
0x3059   :  { %v2381_v31 = vpop.permute.xlu1 %2380 }
0x305a   :  { %v2383_v32 = vadd.f32 %v3511_v30, %v2381_v31 }
0x305c   :  { %v3514_v33 = vmul.f32 -1.442695, %v2383_v32 }
0x305e   :  { %4476 = vpow2.f32 %v3514_v33 }
0x3068   :  { %v4477_v27 = vpop.eup %4476 }
0x3069   :  { %v2387_v35 = vadd.f32 1.0, %v4477_v27 }
0x306b   :  { %4478 = vrcp.f32 %v2387_v35 }
0x3075   :  { %v4479_v40 = vpop.eup %4478 }
0x3076   :  { %v2391_v41 = vmul.f32 %v4479_v40, %v2390_v39  ;;  %v2398_v48 = vsub.f32 1.0, %v4479_v40  ;;  %v2404_v51 = vmul.f32 %v4479_v40, %v2374_v46 }
0x3078   :  { %2393 = vrot.lane.b32.xlu0 %v2391_v41, %s4544_s21 }
0x30ea   :  { %v2394_v42 = vpop.permute.xlu0 %2393 }
0x30eb   :  { %v2396_v43 = vadd.f32 %v3511_v30, %v2394_v42 }
0x30ed   :  { %4480 = vtanh.f32 %v2396_v43 }
0x30f7   :  { %v4481_v44 = vpop.eup %4480 }
0x30f8   :  { %2400 = vrot.lane.b32.xlu1 %v4481_v44, %s4545_s1 }
0x316a   :  { %v2401_v49 = vpop.permute.xlu1 %2400 }
0x316b   :  { %v2403_v50 = vmul.f32 %v2401_v49, %v2398_v48 }
0x316d   :  { %v2405_v52 = vadd.f32 %v2404_v51, %v2403_v50 }
0x316f   :  { %2407 = vrot.lane.b32.xlu0 %v2405_v52, %s4545_s1 }
0x31e1   :  { %v2408_v53 = vpop.permute.xlu0 %2407 }
0x31e2   :  { %2411 = vst.msk [vmem:[#allocation2 + $0x58] sm:$0xff] %vm86_vm0, %v2408_v53  ;;  %3516 = vmatmul.mubr.msk.f32.vlgmr.msra.gmra.mrb[20].mxu1 %vm86_vm0, %v2408_v53 }
0x31e3   :  { %4298 = vmatpush3.bf16.msra.mxu1 %v4657_v16  ;;  %3956 = vmatprep.mubr.msk.f32.mxu1 %vm4542_vm1, %v4540_v7 }
0x31e4   :  { %4299 = vmatprep.subr.bf16.mxu1 %v4541_v8 }
0x31e7   :  { %4301 = vmatpush3.bf16.msra.mxu1 %v4682_v20 }
0x31e8   :  { %4302 = vmatprep.subr.bf16.mxu1 %v4541_v8 }
0x31eb   :  { %4304 = vmatpush3.bf16.msra.mxu1 %v4692_v23 }
0x31ec   :  { %4305 = vmatprep.subr.bf16.mxu1 %v4541_v8 }
0x31ef   :  { %4307 = vmatpush3.bf16.msra.mxu1 %v4703_v26 }
0x31f0   :  { %4329 = vmatprep.subr.bf16.mxu1 %v4624_v3 }
0x32b5   :  { %v2482_v54 = vpop.f32.mrb[20].mxu1 }
0x32b6   :  { %v2487_v55 = vadd.f32 %v5013_v61, %v2482_v54  ;;  %v2484_v56 = vpop.f32.mrb[21].mxu1 }
0x32b8   :  { %4482 = vtanh.f32 %v2487_v55 }
0x32c2   :  { %v4483_v57 = vpop.eup %4482 }
0x32c3   :  { %3957 = vmatmul.mubr.msk.f32.vlgmr.msra.gmra.mrb[22].mxu1 %vm163_vm2, %v4483_v57 }
0x32c4   :  { %4331 = vmatpush1.bf16.msra.mxu1 %v4637_v9  ;;  %2866 = vmatprep.mubr.f32.mxu1 %v4540_v7 }
0x32c5   :  { %4333 = vmatprep.subr.bf16.mxu1 %v4639_v10 }
0x32c8   :  { %4335 = vmatpush1.bf16.msra.mxu1 %v4655_v15 }
0x32c9   :  { %4336 = vmatprep.subr.bf16.mxu1 %v4541_v8 }
0x3396   :  { %v2558_v58 = vpop.f32.mrb[22].mxu1 }
0x3397   :  { %2563 = vrot.lane.b32.xlu1 %v2558_v58, %s4543_s5  ;;  %v3958_v59 = vpop.f32.mrb[23].mxu1 }
0x3409   :  { %v2564_v47 = vpop.permute.xlu1 %2563 }
0x340a   :  { %v2568_v60 = vadd.f32 %v2564_v47, %v2482_v54  ;;  %v2569_v6 = vadd.f32 %v2564_v47, %v2484_v56  ;;  %v2566_v21 = vadd.f32 %v2564_v47, %v2405_v52 }
0x340c   :  { %v2570_v62 = vadd.f32 %v2568_v60, %v4730_v38  ;;  %v2571_v11 = vadd.f32 %v2569_v6, %v4730_v38  ;;  %v2567_v24 = vadd.f32 %v2566_v21, %v4782_v34  ;;  %v3203_v6 = vld [vmem:[%s5418_s9 + $0x18] sm:$0xff]  ;;  %v3189_v21 = vld [vmem:[#allocation2 + $0x28] sm:$0xff] }
0x340e   :  { %2573 = vrot.lane.b32.xlu0 %v2570_v62, %s4544_s21  ;;  %v2583_v12 = vadd.f32 %v5032_v22, %v2571_v11  ;;  %v3200_v62 = vld [vmem:[%s5418_s9] sm:$0xff] }
0x3480   :  { %v2574_v0 = vpop.permute.xlu0 %2573 }
0x3481   :  { %v2576_v1 = vadd.f32 %v3515_v63, %v2574_v0 }
0x3483   :  { %v3518_v2 = vmul.f32 -1.442695, %v2576_v1 }
0x3485   :  { %4484 = vpow2.f32 %v3518_v2 }
0x348f   :  { %v4485_v4 = vpop.eup %4484 }
0x3490   :  { %v2580_v5 = vadd.f32 1.0, %v4485_v4 }
0x3492   :  { %4486 = vrcp.f32 %v2580_v5  ;;  %v3202_v5 = vld [vmem:[%s5418_s9 + $0x10] sm:$0xff] }
0x3493   :  { %v4372_v11 = vpack.c.bf16 %v3203_v6, %v3202_v5 }
0x349c   :  { %v4487_v13 = vpop.eup %4486 }
0x349d   :  { %v2584_v14 = vmul.f32 %v4487_v13, %v2583_v12  ;;  %v2591_v25 = vsub.f32 1.0, %v4487_v13  ;;  %v2597_v30 = vmul.f32 %v4487_v13, %v2567_v24  ;;  %v3184_v13 = vld [vmem:[#allocation2] sm:$0xff]  ;;  %v3190_v24 = vld [vmem:[#allocation2 + $0x30] sm:$0xff] }
0x349f   :  { %2586 = vrot.lane.b32.xlu1 %v2584_v14, %s4544_s21  ;;  %v3185_v14 = vld [vmem:[#allocation2 + $0x8] sm:$0xff] }
0x3511   :  { %v2587_v17 = vpop.permute.xlu1 %2586 }
0x3512   :  { %v2589_v18 = vadd.f32 %v3515_v63, %v2587_v17  ;;  %v3201_v63 = vld [vmem:[%s5418_s9 + $0x8] sm:$0xff]  ;;  %v3186_v17 = vld [vmem:[#allocation2 + $0x10] sm:$0xff] }
0x3513   :  { %v4368_v0 = vpack.c.bf16 %v3201_v63, %v3200_v62 }
0x3514   :  { %4488 = vtanh.f32 %v2589_v18  ;;  %v3187_v18 = vld [vmem:[#allocation2 + $0x18] sm:$0xff] }
0x351e   :  { %v4489_v19 = vpop.eup %4488 }
0x351f   :  { %2593 = vrot.lane.b32.xlu0 %v4489_v19, %s4545_s1  ;;  %v3188_v19 = vld [vmem:[#allocation2 + $0x20] sm:$0xff] }
0x3591   :  { %v2594_v28 = vpop.permute.xlu0 %2593 }
0x3592   :  { %v2596_v29 = vmul.f32 %v2594_v28, %v2591_v25  ;;  %v3191_v25 = vld [vmem:[#allocation2 + $0x38] sm:$0xff]  ;;  %v3192_v28 = vld [vmem:[#allocation2 + $0x40] sm:$0xff] }
0x3594   :  { %v2598_v31 = vadd.f32 %v2597_v30, %v2596_v29  ;;  %v3193_v29 = vld [vmem:[#allocation2 + $0x48] sm:$0xff]  ;;  %v3194_v30 = vld [vmem:[#allocation2 + $0x50] sm:$0xff] }
0x3596   :  { %2600 = vrot.lane.b32.xlu1 %v2598_v31, %s4545_s1 }
0x3608   :  { %v2601_v32 = vpop.permute.xlu1 %2600 }
0x3609   :  { %2604 = vst.msk [vmem:[#allocation2 + $0x60] sm:$0xff] %vm86_vm0, %v2601_v32  ;;  %3520 = vmatmul.mubr.msk.f32.vlgmr.msra.gmra.mrb[28].mxu0 %vm86_vm0, %v2601_v32 }
0x360a   :  { %4318 = vmatpush3.bf16.msra.mxu0 %v4657_v16  ;;  %3975 = vmatprep.mubr.msk.f32.mxu0 %vm4542_vm1, %v4540_v7 }
0x360b   :  { %4319 = vmatprep.subr.bf16.mxu0 %v4541_v8 }
0x360e   :  { %4321 = vmatpush3.bf16.msra.mxu0 %v4682_v20 }
0x360f   :  { %4322 = vmatprep.subr.bf16.mxu0 %v4541_v8 }
0x3610   :  { %v3196_v32 = vld [vmem:[#allocation2 + $0x60] sm:$0xff] }
0x3612   :  { %4324 = vmatpush3.bf16.msra.mxu0 %v4692_v23 }
0x3613   :  { %4325 = vmatprep.subr.bf16.mxu0 %v4541_v8 }
0x3616   :  { %4327 = vmatpush3.bf16.msra.mxu0 %v4703_v26 }
0x3617   :  { %4349 = vmatprep.subr.bf16.mxu0 %v4624_v3 }
0x36dc   :  { %v2675_v33 = vpop.f32.mrb[28].mxu0 }
0x36dd   :  { %v2680_v27 = vadd.f32 %v5013_v61, %v2675_v33  ;;  %v2677_v35 = vpop.f32.mrb[29].mxu0 }
0x36df   :  { %4490 = vtanh.f32 %v2680_v27  ;;  %v3406_v27 = vlaneseq }
0x36e9   :  { %v4491_v36 = vpop.eup %4490 }
0x36ea   :  { %3976 = vmatmul.mubr.msk.f32.vlgmr.msra.gmra.mrb[30].mxu0 %vm163_vm2, %v4491_v36  ;;  %v3407_v36 = vshrl.u32 %v3406_v27, 7 }
0x36eb   :  { %4351 = vmatpush1.bf16.msra.mxu0 %v4637_v9  ;;  %3059 = vmatprep.mubr.f32.mxu0 %v4540_v7  ;;  %v3519_v9 = vld [vmem:[%s5411_s2 + $0x68] sm:$0xff] }
0x36ec   :  { %4353 = vmatprep.subr.bf16.mxu0 %v4639_v10 }
0x36ef   :  { %4355 = vmatpush1.bf16.msra.mxu0 %v4655_v15 }
0x36f0   :  { %4356 = vmatprep.subr.bf16.mxu0 %v4541_v8 }
0x37bd   :  { %v2751_v37 = vpop.f32.mrb[30].mxu0 }
0x37be   :  { %2756 = vrot.lane.b32.xlu0 %v2751_v37, %s4543_s5  ;;  %v3977_v3 = vpop.f32.mrb[31].mxu0 }
0x37bf   :  { %v3408_v3 = vsub.s32 0, %v3407_v36 }
0x3830   :  { %v2757_v39 = vpop.permute.xlu0 %2756 }
0x3831   :  { %v2761_v40 = vadd.f32 %v2757_v39, %v2675_v33  ;;  %v2762_v45 = vadd.f32 %v2757_v39, %v2677_v35  ;;  %v2759_v54 = vadd.f32 %v2757_v39, %v2598_v31  ;;  %v3195_v31 = vld [vmem:[#allocation2 + $0x58] sm:$0xff]  ;;  %v3402_v35 = vld [vmem:[%s5419_s10 + $0x1] sm:$0x1] }
0x3832   :  { %vm3403_vm3 = vcmp.gt.f32.partialorder %v3402_v35, 0.5 }
0x3833   :  { %v2763_v41 = vadd.f32 %v2761_v40, %v4730_v38  ;;  %v2764_v46 = vadd.f32 %v2762_v45, %v4730_v38  ;;  %v2760_v55 = vadd.f32 %v2759_v54, %v4782_v34  ;;  %v4546_v40 = vmov 0  }
0x3835   :  { %2766 = vrot.lane.b32.xlu1 %v2763_v41, %s4544_s21  ;;  %v2776_v48 = vadd.f32 %v5032_v22, %v2764_v46  ;;  %v3405_v41 = vsel %vm3403_vm3, 1, %v4546_v40 }
0x38a7   :  { %v2767_v42 = vpop.permute.xlu1 %2766 }
0x38a8   :  { %v2769_v10 = vadd.f32 %v3519_v9, %v2767_v42  ;;  %v5219_v42 = vld [vmem:[%s5419_s10] ss:$0 sm:$0xff] }
0x38aa   :  { %v3522_v43 = vmul.f32 -1.442695, %v2769_v10 }
0x38ac   :  { %4492 = vpow2.f32 %v3522_v43  ;;  %v5224_v43 = vld [vmem:[%s5409_s0] sm:$0xff] }
0x38b6   :  { %v4493_v15 = vpop.eup %4492 }
0x38b7   :  { %v2773_v44 = vadd.f32 1.0, %v4493_v15 }
0x38b9   :  { %4494 = vrcp.f32 %v2773_v44 }
0x38c3   :  { %v4495_v49 = vpop.eup %4494 }
0x38c4   :  { %v2777_v50 = vmul.f32 %v4495_v49, %v2776_v48  ;;  %v2784_v56 = vsub.f32 1.0, %v4495_v49  ;;  %v2790_v59 = vmul.f32 %v4495_v49, %v2760_v55 }
0x38c6   :  { %2779 = vrot.lane.b32.xlu0 %v2777_v50, %s4544_s21 }
0x3938   :  { %v2780_v51 = vpop.permute.xlu0 %2779 }
0x3939   :  { %v2782_v52 = vadd.f32 %v3519_v9, %v2780_v51  ;;  %v5214_v9 = vrot.slane %v3405_v41, %v3408_v3 }
0x393b   :  { %4496 = vtanh.f32 %v2782_v52  ;;  %vm3410_vm4 = vcmp.eq.s32.totalorder %v5214_v9, 1 }
0x3945   :  { %v4497_v53 = vpop.eup %4496 }
0x3946   :  { %2786 = vrot.lane.b32.xlu1 %v4497_v53, %s4545_s1 }
0x39b8   :  { %v2787_v57 = vpop.permute.xlu1 %2786 }
0x39b9   :  { %v2789_v58 = vmul.f32 %v2787_v57, %v2784_v56 }
0x39bb   :  { %v5162_v47 = vadd.f32 %v2790_v59, %v2789_v58 }
0x39bd   :  { %2793 = vrot.lane.b32.xlu0 %v5162_v47, %s4545_s1 }
0x3a2f   :  { %v2794_v60 = vpop.permute.xlu0 %2793 }
0x3a30   :  { %2797 = vst.msk [vmem:[#allocation2 + $0x68] sm:$0xff] %vm86_vm0, %v2794_v60  ;;  %3524 = vmatmul.mubr.msk.f32.vlgmr.msra.gmra.mrb[24].mxu1 %vm86_vm0, %v2794_v60 }
0x3a31   :  { %4338 = vmatpush3.bf16.msra.mxu1 %v4657_v16  ;;  %3994 = vmatprep.mubr.msk.f32.mxu1 %vm4542_vm1, %v4540_v7 }
0x3a32   :  { %4339 = vmatprep.subr.bf16.mxu1 %v4541_v8 }
0x3a35   :  { %4341 = vmatpush3.bf16.msra.mxu1 %v4682_v20 }
0x3a36   :  { %4342 = vmatprep.subr.bf16.mxu1 %v4541_v8 }
0x3a37   :  { %v3197_v33 = vld [vmem:[#allocation2 + $0x68] sm:$0xff] }
0x3a39   :  { %4344 = vmatpush3.bf16.msra.mxu1 %v4692_v23 }
0x3a3a   :  { %4345 = vmatprep.subr.bf16.mxu1 %v4541_v8 }
0x3a3d   :  { %4347 = vmatpush3.bf16.msra.mxu1 %v4703_v26 }
0x3a3e   :  { %4369 = vmatprep.subr.bf16.mxu1 %v4368_v0 }
0x3b03   :  { %v5183_v1 = vpop.f32.mrb[24].mxu1 }
0x3b04   :  { %v2873_v2 = vadd.f32 %v5013_v61, %v5183_v1  ;;  %v5187_v4 = vpop.f32.mrb[25].mxu1 }
0x3b06   :  { %4498 = vtanh.f32 %v2873_v2 }
0x3b10   :  { %v4499_v12 = vpop.eup %4498 }
0x3b11   :  { %3995 = vmatmul.mubr.msk.f32.vlgmr.msra.gmra.mrb[26].mxu1 %vm163_vm2, %v4499_v12 }
0x3b12   :  { %4371 = vmatpush3.bf16.msra.mxu1 %v4368_v0  ;;  %4024 = vmatprep.mubr.msk.f32.mxu1 %vm86_vm0, %v3184_v13 }
0x3b13   :  { %4373 = vmatprep.subr.bf16.mxu1 %v4372_v11 }
0x3b16   :  { %4375 = vmatpush3.bf16.msra.mxu1 %v4372_v11 }
0x3b19   :  { %4025 = vmatmul.mubr.msk.f32.vlgmr.msra.gmra.mrb[28].mxu1 %vm86_vm0, %v3185_v14 }
0x3b1a   :  { %4027 = vmatprep.mubr.msk.f32.mxu1 %vm86_vm0, %v3186_v17 }
0x3b1d   :  { %4028 = vmatmul.mubr.msk.f32.gmra.mrb[30].mxu1 %vm86_vm0, %v3187_v18 }
0x3b1e   :  { %4030 = vmatprep.mubr.msk.f32.mxu1 %vm86_vm0, %v3188_v19 }
0x3b21   :  { %4031 = vmatmul.mubr.msk.f32.gmra.mrb[32].mxu1 %vm86_vm0, %v3189_v21 }
0x3b22   :  { %4033 = vmatprep.mubr.msk.f32.mxu1 %vm86_vm0, %v3190_v24 }
0x3b25   :  { %4034 = vmatmul.mubr.msk.f32.gmra.mrb[34].mxu1 %vm86_vm0, %v3191_v25 }
0x3b26   :  { %4036 = vmatprep.mubr.msk.f32.mxu1 %vm86_vm0, %v3192_v28 }
0x3b29   :  { %4037 = vmatmul.mubr.msk.f32.gmra.mrb[36].mxu1 %vm86_vm0, %v3193_v29 }
0x3b2a   :  { %4039 = vmatprep.mubr.msk.f32.mxu1 %vm86_vm0, %v3194_v30 }
0x3b2d   :  { %4040 = vmatmul.mubr.msk.f32.gmra.mrb[38].mxu1 %vm86_vm0, %v3195_v31 }
0x3b2e   :  { %4042 = vmatprep.mubr.msk.f32.mxu1 %vm86_vm0, %v3196_v32 }
0x3b31   :  { %4043 = vmatmul.mubr.msk.f32.gmra.mrb[40].mxu1 %vm86_vm0, %v3197_v33 }
0x3be4   :  { %v2944_v37 = vpop.f32.mrb[26].mxu1 }
0x3be5   :  { %2949 = vrot.lane.b32.xlu1 %v2944_v37, %s4543_s5  ;;  %v3996_v39 = vpop.f32.mrb[27].mxu1 }
0x3be6   :  { %v3523_v39 = vld [vmem:[%s5411_s2 + $0x70] sm:$0xff] }
0x3bec   :  { %v4026_v10 = vpop.f32.mrb[28].mxu1 }
0x3bed   :  { %v3329_v15 = vadd.f32 %v4026_v10, %v5219_v42  ;;  %v3323_v44 = vpop.f32.mrb[29].mxu1 }
0x3bee   :  { %v3324_v45 = vadd.f32 %v5219_v42, %v3323_v44 }
0x3bef   :  { %v3412_v46 = vsel %vm3410_vm4, %v5224_v43, %v3329_v15 }
0x3bf0   :  { %3429 = vst.msk [vmem:[%s5420_s11 + $0x8] sm:$0xff] %vm3427_vm5, %v3412_v46  ;;  %v3411_v48 = vsel %vm3410_vm4, %v5224_v43, %v3324_v45  ;;  %v4029_v49 = vpop.f32.mrb[30].mxu1 }
0x3bf1   :  { %3428 = vst.msk [vmem:[%s5420_s11] sm:$0xff] %vm3427_vm5, %v3411_v48  ;;  %v3339_v50 = vadd.f32 %v4029_v49, %v5219_v42  ;;  %v3333_v51 = vpop.f32.mrb[31].mxu1 }
0x3bf2   :  { %v3334_v52 = vadd.f32 %v5219_v42, %v3333_v51 }
0x3bf3   :  { %v3414_v53 = vsel %vm3410_vm4, %v5224_v43, %v3339_v50 }
0x3bf4   :  { %3431 = vst.msk [vmem:[%s5420_s11 + $0x18] sm:$0xff] %vm3427_vm5, %v3414_v53  ;;  %v3413_v54 = vsel %vm3410_vm4, %v5224_v43, %v3334_v52  ;;  %v4032_v55 = vpop.f32.mrb[32].mxu1 }
0x3bf5   :  { %3430 = vst.msk [vmem:[%s5420_s11 + $0x10] sm:$0xff] %vm3427_vm5, %v3413_v54  ;;  %v3349_v56 = vadd.f32 %v4032_v55, %v5219_v42  ;;  %v3343_v57 = vpop.f32.mrb[33].mxu1 }
0x3bf6   :  { %v3344_v58 = vadd.f32 %v5219_v42, %v3343_v57 }
0x3bf7   :  { %v3416_v59 = vsel %vm3410_vm4, %v5224_v43, %v3349_v56 }
0x3bf8   :  { %3433 = vst.msk [vmem:[%s5420_s11 + $0x28] sm:$0xff] %vm3427_vm5, %v3416_v59  ;;  %v3415_v60 = vsel %vm3410_vm4, %v5224_v43, %v3344_v58  ;;  %v4035_v62 = vpop.f32.mrb[34].mxu1 }
0x3bf9   :  { %3432 = vst.msk [vmem:[%s5420_s11 + $0x20] sm:$0xff] %vm3427_vm5, %v3415_v60  ;;  %v3359_v63 = vadd.f32 %v4035_v62, %v5219_v42  ;;  %v3353_v0 = vpop.f32.mrb[35].mxu1 }
0x3bfa   :  { %v3354_v2 = vadd.f32 %v5219_v42, %v3353_v0 }
0x3bfb   :  { %v3418_v5 = vsel %vm3410_vm4, %v5224_v43, %v3359_v63 }
0x3bfc   :  { %3435 = vst.msk [vmem:[%s5420_s11 + $0x38] sm:$0xff] %vm3427_vm5, %v3418_v5  ;;  %v3417_v6 = vsel %vm3410_vm4, %v5224_v43, %v3354_v2  ;;  %v4038_v11 = vpop.f32.mrb[36].mxu1 }
0x3bfd   :  { %3434 = vst.msk [vmem:[%s5420_s11 + $0x30] sm:$0xff] %vm3427_vm5, %v3417_v6  ;;  %v3369_v12 = vadd.f32 %v4038_v11, %v5219_v42  ;;  %v3363_v13 = vpop.f32.mrb[37].mxu1 }
0x3bfe   :  { %v3364_v14 = vadd.f32 %v5219_v42, %v3363_v13 }
0x3bff   :  { %v3420_v17 = vsel %vm3410_vm4, %v5224_v43, %v3369_v12 }
0x3c00   :  { %3437 = vst.msk [vmem:[%s5420_s11 + $0x48] sm:$0xff] %vm3427_vm5, %v3420_v17  ;;  %v3419_v18 = vsel %vm3410_vm4, %v5224_v43, %v3364_v14  ;;  %v4041_v19 = vpop.f32.mrb[38].mxu1 }
0x3c01   :  { %3436 = vst.msk [vmem:[%s5420_s11 + $0x40] sm:$0xff] %vm3427_vm5, %v3419_v18  ;;  %v3379_v21 = vadd.f32 %v4041_v19, %v5219_v42  ;;  %v3373_v24 = vpop.f32.mrb[39].mxu1 }
0x3c02   :  { %v3374_v25 = vadd.f32 %v5219_v42, %v3373_v24 }
0x3c03   :  { %v3422_v28 = vsel %vm3410_vm4, %v5224_v43, %v3379_v21 }
0x3c04   :  { %3439 = vst.msk [vmem:[%s5420_s11 + $0x58] sm:$0xff] %vm3427_vm5, %v3422_v28  ;;  %v3421_v29 = vsel %vm3410_vm4, %v5224_v43, %v3374_v25  ;;  %v4044_v30 = vpop.f32.mrb[40].mxu1 }
0x3c05   :  { %3438 = vst.msk [vmem:[%s5420_s11 + $0x50] sm:$0xff] %vm3427_vm5, %v3421_v29  ;;  %v3389_v31 = vadd.f32 %v4044_v30, %v5219_v42  ;;  %v3383_v32 = vpop.f32.mrb[41].mxu1 }
0x3c06   :  { %v3384_v33 = vadd.f32 %v5219_v42, %v3383_v32 }
0x3c07   :  { %v3424_v27 = vsel %vm3410_vm4, %v5224_v43, %v3389_v31 }
0x3c08   :  { %3441 = vst.msk [vmem:[%s5420_s11 + $0x68] sm:$0xff] %vm3427_vm5, %v3424_v27  ;;  %v3423_v35 = vsel %vm3410_vm4, %v5224_v43, %v3384_v33 }
0x3c09   :  { %3440 = vst.msk [vmem:[%s5420_s11 + $0x60] sm:$0xff] %vm3427_vm5, %v3423_v35 }
0x3c57   :  { %v2950_v36 = vpop.permute.xlu1 %2949 }
0x3c58   :  { %v2954_v37 = vadd.f32 %v2950_v36, %v5183_v1  ;;  %v2955_v45 = vadd.f32 %v2950_v36, %v5187_v4  ;;  %v2952_v53 = vadd.f32 %v2950_v36, %v5162_v47 }
0x3c5a   :  { %v2956_v3 = vadd.f32 %v2954_v37, %v4730_v38  ;;  %v2957_v46 = vadd.f32 %v2955_v45, %v4730_v38  ;;  %v2953_v54 = vadd.f32 %v2952_v53, %v4782_v34 }
0x3c5c   :  { %2959 = vrot.lane.b32.xlu0 %v2956_v3, %s4544_s21  ;;  %v2969_v1 = vadd.f32 %v5032_v22, %v2957_v46 }
0x3cce   :  { %v2960_v40 = vpop.permute.xlu0 %2959 }
0x3ccf   :  { %v2962_v41 = vadd.f32 %v3523_v39, %v2960_v40 }
0x3cd1   :  { %v3526_v10 = vmul.f32 -1.442695, %v2962_v41 }
0x3cd3   :  { %4500 = vpow2.f32 %v3526_v10 }
0x3cdd   :  { %v4501_v15 = vpop.eup %4500 }
0x3cde   :  { %v2966_v44 = vadd.f32 1.0, %v4501_v15 }
0x3ce0   :  { %4502 = vrcp.f32 %v2966_v44 }
0x3cea   :  { %v4503_v48 = vpop.eup %4502 }
0x3ceb   :  { %v2970_v49 = vmul.f32 %v4503_v48, %v2969_v1  ;;  %v2977_v55 = vsub.f32 1.0, %v4503_v48  ;;  %v2983_v57 = vmul.f32 %v4503_v48, %v2953_v54 }
0x3ced   :  { %2972 = vrot.lane.b32.xlu1 %v2970_v49, %s4544_s21 }
0x3d5f   :  { %v2973_v50 = vpop.permute.xlu1 %2972 }
0x3d60   :  { %v2975_v51 = vadd.f32 %v3523_v39, %v2973_v50 }
0x3d62   :  { %4504 = vtanh.f32 %v2975_v51 }
0x3d6c   :  { %v4505_v52 = vpop.eup %4504 }
0x3d6d   :  { %2979 = vrot.lane.b32.xlu0 %v4505_v52, %s4545_s1 }
0x3ddf   :  { %v2980_v4 = vpop.permute.xlu0 %2979 }
0x3de0   :  { %v2982_v56 = vmul.f32 %v2980_v4, %v2977_v55 }
0x3de2   :  { %v2984_v58 = vadd.f32 %v2983_v57, %v2982_v56 }
0x3de4   :  { %2986 = vrot.lane.b32.xlu1 %v2984_v58, %s4545_s1 }
0x3e56   :  { %v2987_v59 = vpop.permute.xlu1 %2986 }
0x3e57   :  { %2990 = vst.msk [vmem:[#allocation2 + $0x70] sm:$0xff] %vm86_vm0, %v2987_v59  ;;  %3528 = vmatmul.mubr.msk.f32.vlgmr.msra.gmra.mrb[32].mxu0 %vm86_vm0, %v2987_v59 }
0x3e58   :  { %4358 = vmatpush3.bf16.msra.mxu0 %v4657_v16  ;;  %4013 = vmatprep.mubr.msk.f32.mxu0 %vm4542_vm1, %v4540_v7 }
0x3e59   :  { %4359 = vmatprep.subr.bf16.mxu0 %v4541_v8 }
0x3e5c   :  { %4361 = vmatpush3.bf16.msra.mxu0 %v4682_v20 }
0x3e5d   :  { %4362 = vmatprep.subr.bf16.mxu0 %v4541_v8 }
0x3e5e   :  { %v3198_v47 = vld [vmem:[#allocation2 + $0x70] sm:$0xff] }
0x3e5f   :  { %4045 = vmatprep.mubr.msk.f32.mxu1 %vm86_vm0, %v3198_v47 }
0x3e60   :  { %4364 = vmatpush3.bf16.msra.mxu0 %v4692_v23 }
0x3e61   :  { %4365 = vmatprep.subr.bf16.mxu0 %v4541_v8  ;;  %v3527_v8 = vld [vmem:[%s5411_s2 + $0x78] sm:$0xff]  ;;  %s4547_s2 = smov [#allocation2]  }
0x3e64   :  { %4367 = vmatpush3.bf16.msra.mxu0 %v4703_v26 }
0x3f2a   :  { %v3061_v60 = vpop.f32.mrb[32].mxu0 }
0x3f2b   :  { %v3066_v16 = vadd.f32 %v5013_v61, %v3061_v60  ;;  %v3063_v62 = vpop.f32.mrb[33].mxu0 }
0x3f2d   :  { %4506 = vtanh.f32 %v3066_v16 }
0x3f37   :  { %v4507_v7 = vpop.eup %4506 }
0x3f38   :  { %4014 = vmatmul.mubr.msk.f32.vlgmr.msra.gmra.mrb[34].mxu0 %vm163_vm2, %v4507_v7 }
0x400b   :  { %v3137_v20 = vpop.f32.mrb[34].mxu0 }
0x400c   :  { %3142 = vrot.lane.b32.xlu0 %v3137_v20, %s4543_s5  ;;  %v4015_v63 = vpop.f32.mrb[35].mxu0  ;;  %s3451_s5 = sshll.u32 %s4547_s2, 4  ;;  %s3452_s5 = int_to_ptr.vmem [resolvable:$true] %s3451_s5 }
0x400d   :  { %p4521_p1 = scmp.lt.s32.totalorder %s3452_s5, %s3452_s5 }
0x407e   :  { %v3143_v0 = vpop.permute.xlu0 %3142 }
0x407f   :  { %v3147_v2 = vadd.f32 %v3143_v0, %v3061_v60  ;;  %v3148_v12 = vadd.f32 %v3143_v0, %v3063_v62  ;;  %v3145_v25 = vadd.f32 %v3143_v0, %v2984_v58 }
0x4081   :  { %v3149_v23 = vadd.f32 %v3147_v2, %v4730_v38  ;;  %v3150_v13 = vadd.f32 %v3148_v12, %v4730_v38  ;;  %v3146_v28 = vadd.f32 %v3145_v25, %v4782_v34 }
0x4083   :  { %3152 = vrot.lane.b32.xlu1 %v3149_v23, %s4544_s21  ;;  %v3162_v14 = vadd.f32 %v5032_v22, %v3150_v13 }
0x40f5   :  { %v3153_v26 = vpop.permute.xlu1 %3152 }
0x40f6   :  { %v3155_v61 = vadd.f32 %v3527_v8, %v3153_v26 }
0x40f8   :  { %v3530_v5 = vmul.f32 -1.442695, %v3155_v61 }
0x40fa   :  { %4508 = vpow2.f32 %v3530_v5 }
0x4104   :  { %v4509_v6 = vpop.eup %4508 }
0x4105   :  { %v3159_v11 = vadd.f32 1.0, %v4509_v6 }
0x4107   :  { %4510 = vrcp.f32 %v3159_v11 }
0x4111   :  { %v4511_v17 = vpop.eup %4510 }
0x4112   :  { %v3163_v18 = vmul.f32 %v4511_v17, %v3162_v14  ;;  %v3170_v29 = vsub.f32 1.0, %v4511_v17  ;;  %v3176_v32 = vmul.f32 %v4511_v17, %v3146_v28 }
0x4114   :  { %3165 = vrot.lane.b32.xlu0 %v3163_v18, %s4544_s21  ;;  %s4516_s21 = scalar_lea.vmem %s3452_s5, 2048 }
0x4115   :  { %p4517_p0 = scmp.ne.s32.totalorder %s3452_s5, %s4516_s21  ;;  %p4522_p2 = scmp.lt.s32.totalorder %s4516_s21, %s4516_s21 }
0x4117   :  { %p4523_p3 = por %p4522_p2, %p4521_p1 }
0x4119   :  { %p4524_p4 = pnand %p4523_p3, %p4517_p0 }
0x4186   :  { %v3166_v19 = vpop.permute.xlu0 %3165 }
0x4187   :  { %v3168_v21 = vadd.f32 %v3527_v8, %v3166_v19 }
0x4189   :  { %4512 = vtanh.f32 %v3168_v21 }
0x4193   :  { %v4513_v24 = vpop.eup %4512 }
0x4194   :  { %3172 = vrot.lane.b32.xlu1 %v4513_v24, %s4545_s1 }
0x4206   :  { %v3173_v30 = vpop.permute.xlu1 %3172 }
0x4207   :  { %v3175_v31 = vmul.f32 %v3173_v30, %v3170_v29 }
0x4209   :  { %v3177_v38 = vadd.f32 %v3176_v32, %v3175_v31 }
0x420b   :  { %3179 = vrot.lane.b32.xlu0 %v3177_v38, %s4545_s1 }
0x427d   :  { %v3180_v22 = vpop.permute.xlu0 %3179 }
0x427e   :  { %3183 = vst.msk [vmem:[#allocation2 + $0x78] sm:$0xff] %vm86_vm0, %v3180_v22 }
0x4285   :  { %v3199_v33 = vld [vmem:[#allocation2 + $0x78] sm:$0xff] }
0x4286   :  { %4046 = vmatmul.mubr.msk.f32.gmra.mrb[42].mxu1 %vm86_vm0, %v3199_v33 }
0x4287   :  { %4527 = shalt.err (!%p4524_p4)
}
0x4288   :  { %s4528_s1 = scalar_lea.hbm %s5421_s12, 2048 }
0x4289   :  { %p4529_p5 = scmp.ne.s32.totalorder %s5421_s12, %s4528_s1  ;;  %p4532_p6 = scmp.lt.u32.totalorder %s4528_s1, %s5421_s12 }
0x428b   :  { %p4534_p7 = pnand %p4532_p6, %p4529_p5 }
0x428d   :  { %4537 = shalt.err (!%p4534_p7)
}
0x428e   :  { %s4548_s17 = smov 128   ;;  %s4549_s18 = smov 8  }
0x428f   :  { %3457 = dma.vmem_to_hbm [thread:$0]  %s3452_s5, 2048, %s5421_s12, [#allocation3], %s4548_s17, %s4548_s17, %s4549_s18  }
0x4359   :  { %v4047_v34 = vpop.f32.mrb[42].mxu1 }
0x435a   :  { %v3399_v27 = vadd.f32 %v4047_v34, %v5219_v42  ;;  %v3393_v35 = vpop.f32.mrb[43].mxu1 }
0x435b   :  { %v3394_v36 = vadd.f32 %v5219_v42, %v3393_v35 }
0x435c   :  { %v3426_v37 = vsel %vm3410_vm4, %v5224_v43, %v3399_v27 }
0x435d   :  { %3443 = vst.msk [vmem:[%s5420_s11 + $0x78] sm:$0xff] %vm3427_vm5, %v3426_v37  ;;  %v3425_v3 = vsel %vm3410_vm4, %v5224_v43, %v3394_v36 }
0x435e   :  { %3442 = vst.msk [vmem:[%s5420_s11 + $0x70] sm:$0xff] %vm3427_vm5, %v3425_v3 }
0x435f   :  { %4538 = dma.done.wait [#allocation3], 2048  }
0x4360   :  { %4539 = vsyncadd [#allocation3], 4294965248 }
0x4361   :  { %3463 = vsyncpa [#allocation3], 1 }

</bundles_post_ra>
